<compile_context>
chip_gen: v7x
topology: tpu7x:2x2x1
jax: 0.10.0
libtpu: 0.0.40
codegen_flags: <defaults>
</compile_context>

<pallas_src>
import functools

import jax
import jax.numpy as jnp
from jax.experimental import pallas as pl
from jax.experimental.pallas import tpu as pltpu


# ----------------------------------------------------------------------------
# The single fused kernel
# ----------------------------------------------------------------------------
def _mc_hgat_kernel(x_ref, tag_ref, mask_ref, adj_ref,
                    lstm_ref, tw1_ref, tb1_ref, tw2_ref, tb2_ref,
                    aw_ref, aa_ref, ow_ref, oa_ref,
                    mw_ref, mb_ref,
                    o_ref, hs_ref, *, B, L, E, H, nh, mlp_dims):
    D = 2 * H
    f32 = jnp.float32
    neg = jnp.float32(-1e30)

    # ---------------- BiLSTM (B folded, interleaved gates, time unrolled) ----
    x = x_ref[...]                                        # (B*L, E)
    lstm = lstm_ref[...]                                  # (2E + 2H + 1, 8H)
    wih_f = lstm[0:E]                                     # fwd input proj (bwd cols zero)
    wih_b = lstm[E:2 * E]                                 # bwd input proj (fwd cols zero)
    whh = lstm[2 * E:2 * E + D]                           # (2H, 8H) block structure
    bias = lstm[2 * E + D:2 * E + D + 1]                  # (1, 8H)

    xp_f = (jnp.dot(x, wih_f, preferred_element_type=f32) + bias).reshape(B, L, 4 * D)
    xp_b = jnp.dot(x, wih_b, preferred_element_type=f32).reshape(B, L, 4 * D)

    h = jnp.zeros((B, D), f32)                            # [h_fwd | h_bwd]
    c = jnp.zeros((B, D), f32)
    for t in range(L):                                    # static unroll (L small)
        gates = xp_f[:, t, :] + xp_b[:, L - 1 - t, :] + jnp.dot(
            h, whh, preferred_element_type=f32)           # (B, 8H)
        i = jax.nn.sigmoid(gates[:, 0:D])                 # contiguous 2H-lane slices
        f = jax.nn.sigmoid(gates[:, D:2 * D])
        g = jnp.tanh(gates[:, 2 * D:3 * D])
        o = jax.nn.sigmoid(gates[:, 3 * D:4 * D])
        c = f * c + i * g
        h = o * jnp.tanh(c)
        # direct scratch stores: fwd state -> row t, bwd state -> row L-1-t
        hs_ref[:, t:t + 1, 0:H] = h[:, 0:H].reshape(B, 1, H)
        hs_ref[:, L - 1 - t:L - t, H:D] = h[:, H:D].reshape(B, 1, H)
    feat = hs_ref[...]                                    # (B, L, D)
    feat2 = feat.reshape(B * L, D)

    # ---------------- Dep + POS tag attention (merged, block-diag weights) ---
    mask = mask_ref[...]                                  # (B*L, 1)
    th = jnp.maximum(
        jnp.dot(tag_ref[...], tw1_ref[...], preferred_element_type=f32)
        + tb1_ref[...], 0.0)                              # (B*L, 2*nh*H)
    tsc = jnp.dot(th, tw2_ref[...], preferred_element_type=f32) + tb2_ref[...]
    tsc = jnp.where(mask > 0.0, tsc, neg).reshape(B, L, 2 * nh)
    tsc = tsc - jnp.max(tsc, axis=1, keepdims=True)       # softmax over tokens
    tp = jnp.exp(tsc)
    talpha = tp / jnp.sum(tp, axis=1, keepdims=True)      # (B, L, 2*nh)
    dep_a = jnp.mean(talpha[:, :, 0:nh], axis=2, keepdims=True)       # head mean
    pos_a = jnp.mean(talpha[:, :, nh:2 * nh], axis=2, keepdims=True)
    dep_out = (dep_a * feat).reshape(B * L, D)
    pos_out = (pos_a * feat).reshape(B * L, D)

    # ---------------- Attr GAT layer 1 (nh heads, batched over B) ------------
    adj = adj_ref[...]                                    # (B, L, L)
    h_all = jnp.dot(feat2, aw_ref[...], preferred_element_type=f32)   # (B*L, nh*D)
    e_sd = jnp.dot(h_all, aa_ref[...], preferred_element_type=f32)    # (B*L, 2*nh)
    e_src = e_sd[:, 0:nh].reshape(B, L, nh)
    e_dst = e_sd[:, nh:2 * nh].reshape(B, L, nh)
    acc = jnp.zeros((B, L, D), f32)
    for k in range(nh):                                   # nh small & static
        h_k = h_all[:, k * D:(k + 1) * D].reshape(B, L, D)
        e = e_src[:, :, k:k + 1] + e_dst[:, :, k:k + 1].reshape(B, 1, L)   # (B,L,L)
        e = jnp.where(e > 0.0, e, 0.2 * e)                # LeakyReLU(0.2)
        e = jnp.where(adj > 0.0, e, neg)
        e = e - jnp.max(e, axis=-1, keepdims=True)
        p = jnp.exp(e)
        alpha = p / jnp.sum(p, axis=-1, keepdims=True)
        out_k = jnp.einsum('bij,bjd->bid', alpha, h_k, preferred_element_type=f32)
        acc = acc + jnp.where(out_k > 0.0, out_k,
                              jnp.exp(jnp.minimum(out_k, 0.0)) - 1.0)  # ELU
    attr1 = (acc * (1.0 / nh)).reshape(B * L, D)          # head mean

    # ---------------- out_att GAT (single head) + ReLU -----------------------
    h2 = jnp.dot(attr1, ow_ref[...], preferred_element_type=f32)      # (B*L, D)
    e2sd = jnp.dot(h2, oa_ref[...], preferred_element_type=f32)       # (B*L, 2)
    e2 = e2sd[:, 0:1].reshape(B, L, 1) + e2sd[:, 1:2].reshape(B, 1, L)
    e2 = jnp.where(e2 > 0.0, e2, 0.2 * e2)
    e2 = jnp.where(adj > 0.0, e2, neg)
    e2 = e2 - jnp.max(e2, axis=-1, keepdims=True)
    p2 = jnp.exp(e2)
    alpha2 = p2 / jnp.sum(p2, axis=-1, keepdims=True)
    attr_out = jnp.einsum('bij,bjd->bid', alpha2, h2.reshape(B, L, D),
                          preferred_element_type=f32)
    attr_out = jnp.maximum(attr_out, 0.0).reshape(B * L, D)           # F.relu

    # ---------------- MLP head (fc1 row-split over the three branches) -------
    mw = mw_ref[...]
    mb = mb_ref[...]
    nl = len(mlp_dims)
    xcur = jnp.maximum(
        jnp.dot(dep_out, mw[0:D, :], preferred_element_type=f32)
        + jnp.dot(pos_out, mw[D:2 * D, :], preferred_element_type=f32)
        + jnp.dot(attr_out, mw[2 * D:3 * D, :], preferred_element_type=f32)
        + mb[0:1, :], 0.0)
    row = mlp_dims[0][0]
    for li in range(1, nl - 1):
        in_d = mlp_dims[li][0]
        xcur = jnp.maximum(
            jnp.dot(xcur[:, 0:in_d], mw[row:row + in_d, :],
                    preferred_element_type=f32) + mb[li:li + 1, :], 0.0)
        row += in_d
    in_d, out_d = mlp_dims[-1]
    logits = jnp.dot(xcur[:, 0:in_d], mw[row:row + in_d, :],
                     preferred_element_type=f32) + mb[nl - 1:nl, :]
    o_ref[...] = logits[:, 0:out_d]


# ----------------------------------------------------------------------------
# Host-side weight packing (run once, outside jit)
# ----------------------------------------------------------------------------
def _interleave_gates(wf, wb):
    """(R,4H) fwd + (R,4H) bwd -> (R,8H) columns [i_f i_b f_f f_b g_f g_b o_f o_b]."""
    r, four_h = wf.shape
    h = four_h // 4
    return jnp.concatenate(
        [wf.reshape(r, 4, h), wb.reshape(r, 4, h)], axis=2).reshape(r, 8 * h)


def _pack_lstm(lstm_params):
    W_ih_f, W_hh_f, b_ih_f, b_hh_f = lstm_params["fwd"]
    W_ih_b, W_hh_b, b_ih_b, b_hh_b = lstm_params["bwd"]
    zE = jnp.zeros_like(W_ih_f)
    zH = jnp.zeros_like(W_hh_f)
    wih_f = _interleave_gates(W_ih_f, zE)                 # (E, 8H), bwd cols zero
    wih_b = _interleave_gates(zE, W_ih_b)                 # (E, 8H), fwd cols zero
    whh = jnp.concatenate([_interleave_gates(W_hh_f, zH),
                           _interleave_gates(zH, W_hh_b)], axis=0)      # (2H, 8H)
    bias = _interleave_gates((b_ih_f + b_hh_f).reshape(1, -1),
                             (b_ih_b + b_hh_b).reshape(1, -1))          # (1, 8H)
    return jnp.concatenate([wih_f, wih_b, whh, bias], axis=0)           # (2E+2H+1, 8H)


def _block_diag_cols(vecs):
    """(nh, K) -> (nh*K, nh); column k holds vecs[k] at rows k*K:(k+1)*K."""
    nh, K = vecs.shape
    eye = jnp.eye(nh, dtype=vecs.dtype)
    return (vecs[:, :, None] * eye[:, None, :]).reshape(nh * K, nh)


def _block_diag2(a, b):
    ra, ca = a.shape
    rb, cb = b.shape
    out = jnp.zeros((ra + rb, ca + cb), a.dtype)
    return out.at[:ra, :ca].set(a).at[ra:, ca:].set(b)


def _pack_tag(p):
    w1, b1, w2, b2 = p                      # (nh,E,H),(nh,1,H),(nh,1,H),(nh,1,1)
    nh, E, H = w1.shape
    w1c = jnp.transpose(w1, (1, 0, 2)).reshape(E, nh * H)      # head-concat
    b1c = b1.reshape(1, nh * H)
    w2bd = _block_diag_cols(w2.reshape(nh, H))                 # (nh*H, nh)
    b2c = b2.reshape(1, nh)
    return w1c, b1c, w2bd, b2c


def _pack_mlp(fcs, fc_final):
    layers = list(fcs) + [fc_final]
    wmax = max(w.shape[1] for (w, _b) in layers)
    ws, bs, dims = [], [], []
    for (w, b) in layers:
        in_d, out_d = w.shape
        ws.append(jnp.zeros((in_d, wmax), jnp.float32).at[:, :out_d].set(w))
        bs.append(jnp.zeros((1, wmax), jnp.float32).at[:, :out_d].set(b.reshape(1, -1)))
        dims.append((in_d, out_d))
    return jnp.concatenate(ws, axis=0), jnp.concatenate(bs, axis=0), tuple(dims)


# ----------------------------------------------------------------------------
# Forward builder: packs weights once, returns a jitted forward fn
# ----------------------------------------------------------------------------
def build_forward(params):
    E = params["word_embed"].shape[1]
    H = params["lstm"]["fwd"][1].shape[0]
    nh = params["gat_dep"][0].shape[0]
    D = 2 * H

    lstm_slab = _pack_lstm(params["lstm"])

    dw1, db1, dw2, db2 = _pack_tag(params["gat_dep"])
    pw1, pb1, pw2, pb2 = _pack_tag(params["gat_pos"])
    tag_w1 = _block_diag2(dw1, pw1)                       # (2E, 2*nh*H)
    tag_b1 = jnp.concatenate([db1, pb1], axis=1)          # (1, 2*nh*H)
    tag_w2 = _block_diag2(dw2, pw2)                       # (2*nh*H, 2*nh)
    tag_b2 = jnp.concatenate([db2, pb2], axis=1)          # (1, 2*nh)

    aW, a_src, a_dst = params["gat_attr"]
    attr_w = jnp.transpose(aW, (1, 0, 2)).reshape(D, nh * D)
    attr_a = jnp.concatenate([_block_diag_cols(a_src.reshape(nh, D)),
                              _block_diag_cols(a_dst.reshape(nh, D))], axis=1)

    oW, o_src, o_dst = params["out_att"]
    out_w = oW.reshape(D, D)
    out_a = jnp.concatenate([o_src.reshape(D, 1), o_dst.reshape(D, 1)], axis=1)

    mlp_w, mlp_b, mlp_dims = _pack_mlp(params["fcs"], params["fc_final"])
    assert mlp_dims[0][0] == 3 * D
    C = mlp_dims[-1][1]

    word_tab = params["word_embed"]
    dep_tab = params["dep_embed"]
    pos_tab = params["pos_embed"]

    def forward(tokens_ids, pos_class, dep_ids, text_len, level, adj, adj_node_type):
        # TODO(synk): text_len / level / adj_node_type are consumed inside the
        #             unpublished AttrAttentionLayer; unused in this canonical form.
        del text_len, level, adj_node_type
        B, L = tokens_ids.shape
        fmask = (tokens_ids != 0).astype(jnp.float32).reshape(B * L, 1)
        x_emb = word_tab[tokens_ids].reshape(B * L, E)    # dropout == identity (eval)
        tag_cat = jnp.concatenate(
            [dep_tab[dep_ids], pos_tab[pos_class]], axis=-1).reshape(B * L, 2 * E)
        kernel = functools.partial(_mc_hgat_kernel, B=B, L=L, E=E, H=H, nh=nh,
                                   mlp_dims=mlp_dims)
        return pl.pallas_call(
            kernel,
            out_shape=jax.ShapeDtypeStruct((B * L, C), jnp.float32),
            scratch_shapes=[pltpu.VMEM((B, L, D), jnp.float32)],   # BiLSTM hidden states
        )(x_emb, tag_cat, fmask, adj,
          lstm_slab, tag_w1, tag_b1, tag_w2, tag_b2,
          attr_w, attr_a, out_w, out_a, mlp_w, mlp_b)

    return jax.jit(forward)


# ----------------------------------------------------------------------------
# Deterministic parameter construction
# ----------------------------------------------------------------------------
def init_params(key, *, vocab, E, H, nh, dep_tag_num, pos_tag_num,
                final_hidden, num_mlps, num_classes):
    D = 2 * H
    keys = iter(jax.random.split(key, 48))

    def nrm(shape, scale=0.1):
        return (scale * jax.random.normal(next(keys), shape)).astype(jnp.float32)

    params = {
        "word_embed": nrm((vocab, E), 0.5),
        "dep_embed": nrm((dep_tag_num, E), 0.5),
        "pos_embed": nrm((pos_tag_num, E), 0.5),
        "lstm": {
            "fwd": (nrm((E, 4 * H)), nrm((H, 4 * H)), nrm((4 * H,)), nrm((4 * H,))),
            "bwd": (nrm((E, 4 * H)), nrm((H, 4 * H)), nrm((4 * H,)), nrm((4 * H,))),
        },
        "gat_dep": (nrm((nh, E, H)), nrm((nh, 1, H)), nrm((nh, 1, H)), nrm((nh, 1, 1))),
        "gat_pos": (nrm((nh, E, H)), nrm((nh, 1, H)), nrm((nh, 1, H)), nrm((nh, 1, 1))),
        "gat_attr": (nrm((nh, D, D)), nrm((nh, 1, D)), nrm((nh, 1, D))),
        "out_att": (nrm((1, D, D)), nrm((1, 1, D)), nrm((1, 1, D))),
    }
    fcs = []
    in_dim = 6 * H
    for _ in range(num_mlps):
        fcs.append((nrm((in_dim, final_hidden)), nrm((final_hidden,))))
        in_dim = final_hidden
    params["fcs"] = fcs
    params["fc_final"] = (nrm((final_hidden, num_classes)), nrm((num_classes,)))
    return params


# ----------------------------------------------------------------------------
# Main
# ----------------------------------------------------------------------------
if __name__ == "__main__":
    # Small config consistent with the module's __init__.
    B, L = 2, 8
    vocab, E, H = 50, 32, 16            # embedding_dim=32, hidden_size=16 -> 2H=32
    nh = 2                              # num_heads
    dep_tag_num, pos_tag_num = 10, 12
    final_hidden, num_mlps, num_classes = 32, 2, 3

    root = jax.random.PRNGKey(0)
    k_par, k_tok, k_pos, k_dep, k_adj = jax.random.split(root, 5)

    params = init_params(
        k_par, vocab=vocab, E=E, H=H, nh=nh,
        dep_tag_num=dep_tag_num, pos_tag_num=pos_tag_num,
        final_hidden=final_hidden, num_mlps=num_mlps, num_classes=num_classes)

    tokens_ids = jax.random.randint(k_tok, (B, L), 1, vocab, dtype=jnp.int32)
    tokens_ids = tokens_ids.at[1, -2:].set(0)                  # some padding
    pos_class = jax.random.randint(k_pos, (B, L), 0, pos_tag_num, dtype=jnp.int32)
    dep_ids = jax.random.randint(k_dep, (B, L), 0, dep_tag_num, dtype=jnp.int32)
    text_len = jnp.array([L, L - 2], dtype=jnp.int32)
    level = jnp.zeros((B, L), dtype=jnp.int32)
    adj = (jax.random.uniform(k_adj, (B, L, L)) > 0.5).astype(jnp.float32)
    adj = jnp.maximum(adj, jnp.eye(L, dtype=jnp.float32)[None])  # self-loops
    adj_node_type = jnp.zeros((B, L, L), dtype=jnp.int32)

    fwd = build_forward(params)
    logit = fwd(tokens_ids, pos_class, dep_ids, text_len, level, adj, adj_node_type)
    logit = jax.block_until_ready(logit)

    assert logit.shape == (B * L, num_classes), logit.shape
    assert bool(jnp.all(jnp.isfinite(logit)))
    print("KERNEL_OK")
</pallas_src>

<mosaic_0001>
module attributes {stable_mosaic.version = 11 : i64} {
  func.func @_mc_hgat_kernel(%arg0: memref<16x32xf32, #tpu.memory_space<vmem>>, %arg1: memref<16x64xf32, #tpu.memory_space<vmem>>, %arg2: memref<16x1xf32, #tpu.memory_space<vmem>>, %arg3: memref<2x8x8xf32, #tpu.memory_space<vmem>>, %arg4: memref<97x128xf32, #tpu.memory_space<vmem>>, %arg5: memref<64x64xf32, #tpu.memory_space<vmem>>, %arg6: memref<1x64xf32, #tpu.memory_space<vmem>>, %arg7: memref<64x4xf32, #tpu.memory_space<vmem>>, %arg8: memref<1x4xf32, #tpu.memory_space<vmem>>, %arg9: memref<32x64xf32, #tpu.memory_space<vmem>>, %arg10: memref<64x4xf32, #tpu.memory_space<vmem>>, %arg11: memref<32x32xf32, #tpu.memory_space<vmem>>, %arg12: memref<32x2xf32, #tpu.memory_space<vmem>>, %arg13: memref<160x32xf32, #tpu.memory_space<vmem>>, %arg14: memref<3x32xf32, #tpu.memory_space<vmem>>, %arg15: memref<16x3xf32, #tpu.memory_space<vmem>>, %arg16: memref<2x8x32xf32, #tpu.memory_space<vmem>>) attributes {dimension_semantics = [], scalar_prefetch = 0 : i64, scratch_operands = 1 : i64, tpu.core_type = #tpu.core_type<tc>} {
    %c0 = arith.constant 0 : index
    %c0_0 = arith.constant 0 : index
    %0 = vector.load %arg0[%c0, %c0_0] : memref<16x32xf32, #tpu.memory_space<vmem>>, vector<16x32xf32>
    %c0_1 = arith.constant 0 : index
    %c0_2 = arith.constant 0 : index
    %1 = vector.load %arg4[%c0_1, %c0_2] : memref<97x128xf32, #tpu.memory_space<vmem>>, vector<97x128xf32>
    %2 = vector.extract_strided_slice %1 {offsets = [0, 0], sizes = [32, 128], strides = [1, 1]} : vector<97x128xf32> to vector<32x128xf32>
    %3 = vector.extract_strided_slice %1 {offsets = [32, 0], sizes = [32, 128], strides = [1, 1]} : vector<97x128xf32> to vector<32x128xf32>
    %4 = vector.extract_strided_slice %1 {offsets = [64, 0], sizes = [32, 128], strides = [1, 1]} : vector<97x128xf32> to vector<32x128xf32>
    %5 = vector.extract_strided_slice %1 {offsets = [96, 0], sizes = [1, 128], strides = [1, 1]} : vector<97x128xf32> to vector<1x128xf32>
    %cst = arith.constant dense<0.000000e+00> : vector<16x128xf32>
    %6 = tpu.matmul %0, %2, %cst {dimension_numbers = #tpu.dot_dimension_numbers<[1], [0], [0], [1], [0, 0, 1, 1], [], []>} : vector<16x32xf32>, vector<32x128xf32>, vector<16x128xf32> -> vector<16x128xf32>
    %7 = vector.broadcast %5 : vector<1x128xf32> to vector<16x128xf32>
    %8 = arith.addf %6, %7 : vector<16x128xf32>
    %9 = vector.shape_cast %8 : vector<16x128xf32> to vector<2x8x128xf32>
    %cst_3 = arith.constant dense<0.000000e+00> : vector<16x128xf32>
    %10 = tpu.matmul %0, %3, %cst_3 {dimension_numbers = #tpu.dot_dimension_numbers<[1], [0], [0], [1], [0, 0, 1, 1], [], []>} : vector<16x32xf32>, vector<32x128xf32>, vector<16x128xf32> -> vector<16x128xf32>
    %11 = vector.shape_cast %10 : vector<16x128xf32> to vector<2x8x128xf32>
    %cst_4 = arith.constant 0.000000e+00 : f32
    %12 = vector.broadcast %cst_4 : f32 to vector<2x32xf32>
    %cst_5 = arith.constant 0.000000e+00 : f32
    %13 = vector.broadcast %cst_5 : f32 to vector<2x32xf32>
    %14 = vector.extract_strided_slice %9 {offsets = [0, 0, 0], sizes = [2, 1, 128], strides = [1, 1, 1]} : vector<2x8x128xf32> to vector<2x1x128xf32>
    %15 = vector.shape_cast %14 : vector<2x1x128xf32> to vector<2x128xf32>
    %16 = vector.extract_strided_slice %11 {offsets = [0, 7, 0], sizes = [2, 1, 128], strides = [1, 1, 1]} : vector<2x8x128xf32> to vector<2x1x128xf32>
    %17 = vector.shape_cast %16 : vector<2x1x128xf32> to vector<2x128xf32>
    %18 = arith.addf %15, %17 : vector<2x128xf32>
    %cst_6 = arith.constant dense<0.000000e+00> : vector<2x128xf32>
    %19 = tpu.matmul %12, %4, %cst_6 {dimension_numbers = #tpu.dot_dimension_numbers<[1], [0], [0], [1], [0, 0, 1, 1], [], []>} : vector<2x32xf32>, vector<32x128xf32>, vector<2x128xf32> -> vector<2x128xf32>
    %20 = arith.addf %18, %19 : vector<2x128xf32>
    %21 = vector.extract_strided_slice %20 {offsets = [0, 0], sizes = [2, 32], strides = [1, 1]} : vector<2x128xf32> to vector<2x32xf32>
    %22 = arith.negf %21 : vector<2x32xf32>
    %23 = math.exp %22 : vector<2x32xf32>
    %cst_7 = arith.constant 1.000000e+00 : f32
    %24 = vector.broadcast %cst_7 : f32 to vector<2x32xf32>
    %25 = arith.addf %24, %23 : vector<2x32xf32>
    %26 = arith.divf %24, %25 : vector<2x32xf32>
    %27 = vector.extract_strided_slice %20 {offsets = [0, 32], sizes = [2, 32], strides = [1, 1]} : vector<2x128xf32> to vector<2x32xf32>
    %28 = arith.negf %27 : vector<2x32xf32>
    %29 = math.exp %28 : vector<2x32xf32>
    %cst_8 = arith.constant 1.000000e+00 : f32
    %30 = vector.broadcast %cst_8 : f32 to vector<2x32xf32>
    %31 = arith.addf %30, %29 : vector<2x32xf32>
    %32 = arith.divf %30, %31 : vector<2x32xf32>
    %33 = vector.extract_strided_slice %20 {offsets = [0, 64], sizes = [2, 32], strides = [1, 1]} : vector<2x128xf32> to vector<2x32xf32>
    %34 = math.tanh %33 : vector<2x32xf32>
    %35 = vector.extract_strided_slice %20 {offsets = [0, 96], sizes = [2, 32], strides = [1, 1]} : vector<2x128xf32> to vector<2x32xf32>
    %36 = arith.negf %35 : vector<2x32xf32>
    %37 = math.exp %36 : vector<2x32xf32>
    %cst_9 = arith.constant 1.000000e+00 : f32
    %38 = vector.broadcast %cst_9 : f32 to vector<2x32xf32>
    %39 = arith.addf %38, %37 : vector<2x32xf32>
    %40 = arith.divf %38, %39 : vector<2x32xf32>
    %41 = arith.mulf %32, %13 : vector<2x32xf32>
    %42 = arith.mulf %26, %34 : vector<2x32xf32>
    %43 = arith.addf %41, %42 : vector<2x32xf32>
    %44 = math.tanh %43 : vector<2x32xf32>
    %45 = arith.mulf %40, %44 : vector<2x32xf32>
    %46 = vector.extract_strided_slice %45 {offsets = [0, 0], sizes = [2, 16], strides = [1, 1]} : vector<2x32xf32> to vector<2x16xf32>
    %47 = vector.shape_cast %46 : vector<2x16xf32> to vector<2x1x16xf32>
    %c0_10 = arith.constant 0 : index
    %c0_11 = arith.constant 0 : index
    %c0_12 = arith.constant 0 : index
    %48 = vector.load %arg16[%c0_10, %c0_11, %c0_12] : memref<2x8x32xf32, #tpu.memory_space<vmem>>, vector<2x1x16xf32>
    tpu.vector_store %arg16[%c0_10, %c0_11, %c0_12], %47 {strides = array<i32>} : memref<2x8x32xf32, #tpu.memory_space<vmem>>, vector<2x1x16xf32>,
    %49 = vector.extract_strided_slice %45 {offsets = [0, 16], sizes = [2, 16], strides = [1, 1]} : vector<2x32xf32> to vector<2x16xf32>
    %50 = vector.shape_cast %49 : vector<2x16xf32> to vector<2x1x16xf32>
    %c0_13 = arith.constant 0 : index
    %c7 = arith.constant 7 : index
    %c16 = arith.constant 16 : index
    %51 = vector.load %arg16[%c0_13, %c7, %c16] : memref<2x8x32xf32, #tpu.memory_space<vmem>>, vector<2x1x16xf32>
    tpu.vector_store %arg16[%c0_13, %c7, %c16], %50 {strides = array<i32>} : memref<2x8x32xf32, #tpu.memory_space<vmem>>, vector<2x1x16xf32>,
    %52 = vector.extract_strided_slice %9 {offsets = [0, 1, 0], sizes = [2, 1, 128], strides = [1, 1, 1]} : vector<2x8x128xf32> to vector<2x1x128xf32>
    %53 = vector.shape_cast %52 : vector<2x1x128xf32> to vector<2x128xf32>
    %54 = vector.extract_strided_slice %11 {offsets = [0, 6, 0], sizes = [2, 1, 128], strides = [1, 1, 1]} : vector<2x8x128xf32> to vector<2x1x128xf32>
    %55 = vector.shape_cast %54 : vector<2x1x128xf32> to vector<2x128xf32>
    %56 = arith.addf %53, %55 : vector<2x128xf32>
    %cst_14 = arith.constant dense<0.000000e+00> : vector<2x128xf32>
    %57 = tpu.matmul %45, %4, %cst_14 {dimension_numbers = #tpu.dot_dimension_numbers<[1], [0], [0], [1], [0, 0, 1, 1], [], []>} : vector<2x32xf32>, vector<32x128xf32>, vector<2x128xf32> -> vector<2x128xf32>
    %58 = arith.addf %56, %57 : vector<2x128xf32>
    %59 = vector.extract_strided_slice %58 {offsets = [0, 0], sizes = [2, 32], strides = [1, 1]} : vector<2x128xf32> to vector<2x32xf32>
    %60 = arith.negf %59 : vector<2x32xf32>
    %61 = math.exp %60 : vector<2x32xf32>
    %cst_15 = arith.constant 1.000000e+00 : f32
    %62 = vector.broadcast %cst_15 : f32 to vector<2x32xf32>
    %63 = arith.addf %62, %61 : vector<2x32xf32>
    %64 = arith.divf %62, %63 : vector<2x32xf32>
    %65 = vector.extract_strided_slice %58 {offsets = [0, 32], sizes = [2, 32], strides = [1, 1]} : vector<2x128xf32> to vector<2x32xf32>
    %66 = arith.negf %65 : vector<2x32xf32>
    %67 = math.exp %66 : vector<2x32xf32>
    %cst_16 = arith.constant 1.000000e+00 : f32
    %68 = vector.broadcast %cst_16 : f32 to vector<2x32xf32>
    %69 = arith.addf %68, %67 : vector<2x32xf32>
    %70 = arith.divf %68, %69 : vector<2x32xf32>
    %71 = vector.extract_strided_slice %58 {offsets = [0, 64], sizes = [2, 32], strides = [1, 1]} : vector<2x128xf32> to vector<2x32xf32>
    %72 = math.tanh %71 : vector<2x32xf32>
    %73 = vector.extract_strided_slice %58 {offsets = [0, 96], sizes = [2, 32], strides = [1, 1]} : vector<2x128xf32> to vector<2x32xf32>
    %74 = arith.negf %73 : vector<2x32xf32>
    %75 = math.exp %74 : vector<2x32xf32>
    %cst_17 = arith.constant 1.000000e+00 : f32
    %76 = vector.broadcast %cst_17 : f32 to vector<2x32xf32>
    %77 = arith.addf %76, %75 : vector<2x32xf32>
    %78 = arith.divf %76, %77 : vector<2x32xf32>
    %79 = arith.mulf %70, %43 : vector<2x32xf32>
    %80 = arith.mulf %64, %72 : vector<2x32xf32>
    %81 = arith.addf %79, %80 : vector<2x32xf32>
    %82 = math.tanh %81 : vector<2x32xf32>
    %83 = arith.mulf %78, %82 : vector<2x32xf32>
    %84 = vector.extract_strided_slice %83 {offsets = [0, 0], sizes = [2, 16], strides = [1, 1]} : vector<2x32xf32> to vector<2x16xf32>
    %85 = vector.shape_cast %84 : vector<2x16xf32> to vector<2x1x16xf32>
    %c0_18 = arith.constant 0 : index
    %c1 = arith.constant 1 : index
    %c0_19 = arith.constant 0 : index
    %86 = vector.load %arg16[%c0_18, %c1, %c0_19] : memref<2x8x32xf32, #tpu.memory_space<vmem>>, vector<2x1x16xf32>
    tpu.vector_store %arg16[%c0_18, %c1, %c0_19], %85 {strides = array<i32>} : memref<2x8x32xf32, #tpu.memory_space<vmem>>, vector<2x1x16xf32>,
    %87 = vector.extract_strided_slice %83 {offsets = [0, 16], sizes = [2, 16], strides = [1, 1]} : vector<2x32xf32> to vector<2x16xf32>
    %88 = vector.shape_cast %87 : vector<2x16xf32> to vector<2x1x16xf32>
    %c0_20 = arith.constant 0 : index
    %c6 = arith.constant 6 : index
    %c16_21 = arith.constant 16 : index
    %89 = vector.load %arg16[%c0_20, %c6, %c16_21] : memref<2x8x32xf32, #tpu.memory_space<vmem>>, vector<2x1x16xf32>
    tpu.vector_store %arg16[%c0_20, %c6, %c16_21], %88 {strides = array<i32>} : memref<2x8x32xf32, #tpu.memory_space<vmem>>, vector<2x1x16xf32>,
    %90 = vector.extract_strided_slice %9 {offsets = [0, 2, 0], sizes = [2, 1, 128], strides = [1, 1, 1]} : vector<2x8x128xf32> to vector<2x1x128xf32>
    %91 = vector.shape_cast %90 : vector<2x1x128xf32> to vector<2x128xf32>
    %92 = vector.extract_strided_slice %11 {offsets = [0, 5, 0], sizes = [2, 1, 128], strides = [1, 1, 1]} : vector<2x8x128xf32> to vector<2x1x128xf32>
    %93 = vector.shape_cast %92 : vector<2x1x128xf32> to vector<2x128xf32>
    %94 = arith.addf %91, %93 : vector<2x128xf32>
    %cst_22 = arith.constant dense<0.000000e+00> : vector<2x128xf32>
    %95 = tpu.matmul %83, %4, %cst_22 {dimension_numbers = #tpu.dot_dimension_numbers<[1], [0], [0], [1], [0, 0, 1, 1], [], []>} : vector<2x32xf32>, vector<32x128xf32>, vector<2x128xf32> -> vector<2x128xf32>
    %96 = arith.addf %94, %95 : vector<2x128xf32>
    %97 = vector.extract_strided_slice %96 {offsets = [0, 0], sizes = [2, 32], strides = [1, 1]} : vector<2x128xf32> to vector<2x32xf32>
    %98 = arith.negf %97 : vector<2x32xf32>
    %99 = math.exp %98 : vector<2x32xf32>
    %cst_23 = arith.constant 1.000000e+00 : f32
    %100 = vector.broadcast %cst_23 : f32 to vector<2x32xf32>
    %101 = arith.addf %100, %99 : vector<2x32xf32>
    %102 = arith.divf %100, %101 : vector<2x32xf32>
    %103 = vector.extract_strided_slice %96 {offsets = [0, 32], sizes = [2, 32], strides = [1, 1]} : vector<2x128xf32> to vector<2x32xf32>
    %104 = arith.negf %103 : vector<2x32xf32>
    %105 = math.exp %104 : vector<2x32xf32>
    %cst_24 = arith.constant 1.000000e+00 : f32
    %106 = vector.broadcast %cst_24 : f32 to vector<2x32xf32>
    %107 = arith.addf %106, %105 : vector<2x32xf32>
    %108 = arith.divf %106, %107 : vector<2x32xf32>
    %109 = vector.extract_strided_slice %96 {offsets = [0, 64], sizes = [2, 32], strides = [1, 1]} : vector<2x128xf32> to vector<2x32xf32>
    %110 = math.tanh %109 : vector<2x32xf32>
    %111 = vector.extract_strided_slice %96 {offsets = [0, 96], sizes = [2, 32], strides = [1, 1]} : vector<2x128xf32> to vector<2x32xf32>
    %112 = arith.negf %111 : vector<2x32xf32>
    %113 = math.exp %112 : vector<2x32xf32>
    %cst_25 = arith.constant 1.000000e+00 : f32
    %114 = vector.broadcast %cst_25 : f32 to vector<2x32xf32>
    %115 = arith.addf %114, %113 : vector<2x32xf32>
    %116 = arith.divf %114, %115 : vector<2x32xf32>
    %117 = arith.mulf %108, %81 : vector<2x32xf32>
    %118 = arith.mulf %102, %110 : vector<2x32xf32>
    %119 = arith.addf %117, %118 : vector<2x32xf32>
    %120 = math.tanh %119 : vector<2x32xf32>
    %121 = arith.mulf %116, %120 : vector<2x32xf32>
    %122 = vector.extract_strided_slice %121 {offsets = [0, 0], sizes = [2, 16], strides = [1, 1]} : vector<2x32xf32> to vector<2x16xf32>
    %123 = vector.shape_cast %122 : vector<2x16xf32> to vector<2x1x16xf32>
    %c0_26 = arith.constant 0 : index
    %c2 = arith.constant 2 : index
    %c0_27 = arith.constant 0 : index
    %124 = vector.load %arg16[%c0_26, %c2, %c0_27] : memref<2x8x32xf32, #tpu.memory_space<vmem>>, vector<2x1x16xf32>
    tpu.vector_store %arg16[%c0_26, %c2, %c0_27], %123 {strides = array<i32>} : memref<2x8x32xf32, #tpu.memory_space<vmem>>, vector<2x1x16xf32>,
    %125 = vector.extract_strided_slice %121 {offsets = [0, 16], sizes = [2, 16], strides = [1, 1]} : vector<2x32xf32> to vector<2x16xf32>
    %126 = vector.shape_cast %125 : vector<2x16xf32> to vector<2x1x16xf32>
    %c0_28 = arith.constant 0 : index
    %c5 = arith.constant 5 : index
    %c16_29 = arith.constant 16 : index
    %127 = vector.load %arg16[%c0_28, %c5, %c16_29] : memref<2x8x32xf32, #tpu.memory_space<vmem>>, vector<2x1x16xf32>
    tpu.vector_store %arg16[%c0_28, %c5, %c16_29], %126 {strides = array<i32>} : memref<2x8x32xf32, #tpu.memory_space<vmem>>, vector<2x1x16xf32>,
    %128 = vector.extract_strided_slice %9 {offsets = [0, 3, 0], sizes = [2, 1, 128], strides = [1, 1, 1]} : vector<2x8x128xf32> to vector<2x1x128xf32>
    %129 = vector.shape_cast %128 : vector<2x1x128xf32> to vector<2x128xf32>
    %130 = vector.extract_strided_slice %11 {offsets = [0, 4, 0], sizes = [2, 1, 128], strides = [1, 1, 1]} : vector<2x8x128xf32> to vector<2x1x128xf32>
    %131 = vector.shape_cast %130 : vector<2x1x128xf32> to vector<2x128xf32>
    %132 = arith.addf %129, %131 : vector<2x128xf32>
    %cst_30 = arith.constant dense<0.000000e+00> : vector<2x128xf32>
    %133 = tpu.matmul %121, %4, %cst_30 {dimension_numbers = #tpu.dot_dimension_numbers<[1], [0], [0], [1], [0, 0, 1, 1], [], []>} : vector<2x32xf32>, vector<32x128xf32>, vector<2x128xf32> -> vector<2x128xf32>
    %134 = arith.addf %132, %133 : vector<2x128xf32>
    %135 = vector.extract_strided_slice %134 {offsets = [0, 0], sizes = [2, 32], strides = [1, 1]} : vector<2x128xf32> to vector<2x32xf32>
    %136 = arith.negf %135 : vector<2x32xf32>
    %137 = math.exp %136 : vector<2x32xf32>
    %cst_31 = arith.constant 1.000000e+00 : f32
    %138 = vector.broadcast %cst_31 : f32 to vector<2x32xf32>
    %139 = arith.addf %138, %137 : vector<2x32xf32>
    %140 = arith.divf %138, %139 : vector<2x32xf32>
    %141 = vector.extract_strided_slice %134 {offsets = [0, 32], sizes = [2, 32], strides = [1, 1]} : vector<2x128xf32> to vector<2x32xf32>
    %142 = arith.negf %141 : vector<2x32xf32>
    %143 = math.exp %142 : vector<2x32xf32>
    %cst_32 = arith.constant 1.000000e+00 : f32
    %144 = vector.broadcast %cst_32 : f32 to vector<2x32xf32>
    %145 = arith.addf %144, %143 : vector<2x32xf32>
    %146 = arith.divf %144, %145 : vector<2x32xf32>
    %147 = vector.extract_strided_slice %134 {offsets = [0, 64], sizes = [2, 32], strides = [1, 1]} : vector<2x128xf32> to vector<2x32xf32>
    %148 = math.tanh %147 : vector<2x32xf32>
    %149 = vector.extract_strided_slice %134 {offsets = [0, 96], sizes = [2, 32], strides = [1, 1]} : vector<2x128xf32> to vector<2x32xf32>
    %150 = arith.negf %149 : vector<2x32xf32>
    %151 = math.exp %150 : vector<2x32xf32>
    %cst_33 = arith.constant 1.000000e+00 : f32
    %152 = vector.broadcast %cst_33 : f32 to vector<2x32xf32>
    %153 = arith.addf %152, %151 : vector<2x32xf32>
    %154 = arith.divf %152, %153 : vector<2x32xf32>
    %155 = arith.mulf %146, %119 : vector<2x32xf32>
    %156 = arith.mulf %140, %148 : vector<2x32xf32>
    %157 = arith.addf %155, %156 : vector<2x32xf32>
    %158 = math.tanh %157 : vector<2x32xf32>
    %159 = arith.mulf %154, %158 : vector<2x32xf32>
    %160 = vector.extract_strided_slice %159 {offsets = [0, 0], sizes = [2, 16], strides = [1, 1]} : vector<2x32xf32> to vector<2x16xf32>
    %161 = vector.shape_cast %160 : vector<2x16xf32> to vector<2x1x16xf32>
    %c0_34 = arith.constant 0 : index
    %c3 = arith.constant 3 : index
    %c0_35 = arith.constant 0 : index
    %162 = vector.load %arg16[%c0_34, %c3, %c0_35] : memref<2x8x32xf32, #tpu.memory_space<vmem>>, vector<2x1x16xf32>
    tpu.vector_store %arg16[%c0_34, %c3, %c0_35], %161 {strides = array<i32>} : memref<2x8x32xf32, #tpu.memory_space<vmem>>, vector<2x1x16xf32>,
    %163 = vector.extract_strided_slice %159 {offsets = [0, 16], sizes = [2, 16], strides = [1, 1]} : vector<2x32xf32> to vector<2x16xf32>
    %164 = vector.shape_cast %163 : vector<2x16xf32> to vector<2x1x16xf32>
    %c0_36 = arith.constant 0 : index
    %c4 = arith.constant 4 : index
    %c16_37 = arith.constant 16 : index
    %165 = vector.load %arg16[%c0_36, %c4, %c16_37] : memref<2x8x32xf32, #tpu.memory_space<vmem>>, vector<2x1x16xf32>
    tpu.vector_store %arg16[%c0_36, %c4, %c16_37], %164 {strides = array<i32>} : memref<2x8x32xf32, #tpu.memory_space<vmem>>, vector<2x1x16xf32>,
    %166 = vector.extract_strided_slice %9 {offsets = [0, 4, 0], sizes = [2, 1, 128], strides = [1, 1, 1]} : vector<2x8x128xf32> to vector<2x1x128xf32>
    %167 = vector.shape_cast %166 : vector<2x1x128xf32> to vector<2x128xf32>
    %168 = vector.extract_strided_slice %11 {offsets = [0, 3, 0], sizes = [2, 1, 128], strides = [1, 1, 1]} : vector<2x8x128xf32> to vector<2x1x128xf32>
    %169 = vector.shape_cast %168 : vector<2x1x128xf32> to vector<2x128xf32>
    %170 = arith.addf %167, %169 : vector<2x128xf32>
    %cst_38 = arith.constant dense<0.000000e+00> : vector<2x128xf32>
    %171 = tpu.matmul %159, %4, %cst_38 {dimension_numbers = #tpu.dot_dimension_numbers<[1], [0], [0], [1], [0, 0, 1, 1], [], []>} : vector<2x32xf32>, vector<32x128xf32>, vector<2x128xf32> -> vector<2x128xf32>
    %172 = arith.addf %170, %171 : vector<2x128xf32>
    %173 = vector.extract_strided_slice %172 {offsets = [0, 0], sizes = [2, 32], strides = [1, 1]} : vector<2x128xf32> to vector<2x32xf32>
    %174 = arith.negf %173 : vector<2x32xf32>
    %175 = math.exp %174 : vector<2x32xf32>
    %cst_39 = arith.constant 1.000000e+00 : f32
    %176 = vector.broadcast %cst_39 : f32 to vector<2x32xf32>
    %177 = arith.addf %176, %175 : vector<2x32xf32>
    %178 = arith.divf %176, %177 : vector<2x32xf32>
    %179 = vector.extract_strided_slice %172 {offsets = [0, 32], sizes = [2, 32], strides = [1, 1]} : vector<2x128xf32> to vector<2x32xf32>
    %180 = arith.negf %179 : vector<2x32xf32>
    %181 = math.exp %180 : vector<2x32xf32>
    %cst_40 = arith.constant 1.000000e+00 : f32
    %182 = vector.broadcast %cst_40 : f32 to vector<2x32xf32>
    %183 = arith.addf %182, %181 : vector<2x32xf32>
    %184 = arith.divf %182, %183 : vector<2x32xf32>
    %185 = vector.extract_strided_slice %172 {offsets = [0, 64], sizes = [2, 32], strides = [1, 1]} : vector<2x128xf32> to vector<2x32xf32>
    %186 = math.tanh %185 : vector<2x32xf32>
    %187 = vector.extract_strided_slice %172 {offsets = [0, 96], sizes = [2, 32], strides = [1, 1]} : vector<2x128xf32> to vector<2x32xf32>
    %188 = arith.negf %187 : vector<2x32xf32>
    %189 = math.exp %188 : vector<2x32xf32>
    %cst_41 = arith.constant 1.000000e+00 : f32
    %190 = vector.broadcast %cst_41 : f32 to vector<2x32xf32>
    %191 = arith.addf %190, %189 : vector<2x32xf32>
    %192 = arith.divf %190, %191 : vector<2x32xf32>
    %193 = arith.mulf %184, %157 : vector<2x32xf32>
    %194 = arith.mulf %178, %186 : vector<2x32xf32>
    %195 = arith.addf %193, %194 : vector<2x32xf32>
    %196 = math.tanh %195 : vector<2x32xf32>
    %197 = arith.mulf %192, %196 : vector<2x32xf32>
    %198 = vector.extract_strided_slice %197 {offsets = [0, 0], sizes = [2, 16], strides = [1, 1]} : vector<2x32xf32> to vector<2x16xf32>
    %199 = vector.shape_cast %198 : vector<2x16xf32> to vector<2x1x16xf32>
    %c0_42 = arith.constant 0 : index
    %c4_43 = arith.constant 4 : index
    %c0_44 = arith.constant 0 : index
    %200 = vector.load %arg16[%c0_42, %c4_43, %c0_44] : memref<2x8x32xf32, #tpu.memory_space<vmem>>, vector<2x1x16xf32>
    tpu.vector_store %arg16[%c0_42, %c4_43, %c0_44], %199 {strides = array<i32>} : memref<2x8x32xf32, #tpu.memory_space<vmem>>, vector<2x1x16xf32>,
    %201 = vector.extract_strided_slice %197 {offsets = [0, 16], sizes = [2, 16], strides = [1, 1]} : vector<2x32xf32> to vector<2x16xf32>
    %202 = vector.shape_cast %201 : vector<2x16xf32> to vector<2x1x16xf32>
    %c0_45 = arith.constant 0 : index
    %c3_46 = arith.constant 3 : index
    %c16_47 = arith.constant 16 : index
    %203 = vector.load %arg16[%c0_45, %c3_46, %c16_47] : memref<2x8x32xf32, #tpu.memory_space<vmem>>, vector<2x1x16xf32>
    tpu.vector_store %arg16[%c0_45, %c3_46, %c16_47], %202 {strides = array<i32>} : memref<2x8x32xf32, #tpu.memory_space<vmem>>, vector<2x1x16xf32>,
    %204 = vector.extract_strided_slice %9 {offsets = [0, 5, 0], sizes = [2, 1, 128], strides = [1, 1, 1]} : vector<2x8x128xf32> to vector<2x1x128xf32>
    %205 = vector.shape_cast %204 : vector<2x1x128xf32> to vector<2x128xf32>
    %206 = vector.extract_strided_slice %11 {offsets = [0, 2, 0], sizes = [2, 1, 128], strides = [1, 1, 1]} : vector<2x8x128xf32> to vector<2x1x128xf32>
    %207 = vector.shape_cast %206 : vector<2x1x128xf32> to vector<2x128xf32>
    %208 = arith.addf %205, %207 : vector<2x128xf32>
    %cst_48 = arith.constant dense<0.000000e+00> : vector<2x128xf32>
    %209 = tpu.matmul %197, %4, %cst_48 {dimension_numbers = #tpu.dot_dimension_numbers<[1], [0], [0], [1], [0, 0, 1, 1], [], []>} : vector<2x32xf32>, vector<32x128xf32>, vector<2x128xf32> -> vector<2x128xf32>
    %210 = arith.addf %208, %209 : vector<2x128xf32>
    %211 = vector.extract_strided_slice %210 {offsets = [0, 0], sizes = [2, 32], strides = [1, 1]} : vector<2x128xf32> to vector<2x32xf32>
    %212 = arith.negf %211 : vector<2x32xf32>
    %213 = math.exp %212 : vector<2x32xf32>
    %cst_49 = arith.constant 1.000000e+00 : f32
    %214 = vector.broadcast %cst_49 : f32 to vector<2x32xf32>
    %215 = arith.addf %214, %213 : vector<2x32xf32>
    %216 = arith.divf %214, %215 : vector<2x32xf32>
    %217 = vector.extract_strided_slice %210 {offsets = [0, 32], sizes = [2, 32], strides = [1, 1]} : vector<2x128xf32> to vector<2x32xf32>
    %218 = arith.negf %217 : vector<2x32xf32>
    %219 = math.exp %218 : vector<2x32xf32>
    %cst_50 = arith.constant 1.000000e+00 : f32
    %220 = vector.broadcast %cst_50 : f32 to vector<2x32xf32>
    %221 = arith.addf %220, %219 : vector<2x32xf32>
    %222 = arith.divf %220, %221 : vector<2x32xf32>
    %223 = vector.extract_strided_slice %210 {offsets = [0, 64], sizes = [2, 32], strides = [1, 1]} : vector<2x128xf32> to vector<2x32xf32>
    %224 = math.tanh %223 : vector<2x32xf32>
    %225 = vector.extract_strided_slice %210 {offsets = [0, 96], sizes = [2, 32], strides = [1, 1]} : vector<2x128xf32> to vector<2x32xf32>
    %226 = arith.negf %225 : vector<2x32xf32>
    %227 = math.exp %226 : vector<2x32xf32>
    %cst_51 = arith.constant 1.000000e+00 : f32
    %228 = vector.broadcast %cst_51 : f32 to vector<2x32xf32>
    %229 = arith.addf %228, %227 : vector<2x32xf32>
    %230 = arith.divf %228, %229 : vector<2x32xf32>
    %231 = arith.mulf %222, %195 : vector<2x32xf32>
    %232 = arith.mulf %216, %224 : vector<2x32xf32>
    %233 = arith.addf %231, %232 : vector<2x32xf32>
    %234 = math.tanh %233 : vector<2x32xf32>
    %235 = arith.mulf %230, %234 : vector<2x32xf32>
    %236 = vector.extract_strided_slice %235 {offsets = [0, 0], sizes = [2, 16], strides = [1, 1]} : vector<2x32xf32> to vector<2x16xf32>
    %237 = vector.shape_cast %236 : vector<2x16xf32> to vector<2x1x16xf32>
    %c0_52 = arith.constant 0 : index
    %c5_53 = arith.constant 5 : index
    %c0_54 = arith.constant 0 : index
    %238 = vector.load %arg16[%c0_52, %c5_53, %c0_54] : memref<2x8x32xf32, #tpu.memory_space<vmem>>, vector<2x1x16xf32>
    tpu.vector_store %arg16[%c0_52, %c5_53, %c0_54], %237 {strides = array<i32>} : memref<2x8x32xf32, #tpu.memory_space<vmem>>, vector<2x1x16xf32>,
    %239 = vector.extract_strided_slice %235 {offsets = [0, 16], sizes = [2, 16], strides = [1, 1]} : vector<2x32xf32> to vector<2x16xf32>
    %240 = vector.shape_cast %239 : vector<2x16xf32> to vector<2x1x16xf32>
    %c0_55 = arith.constant 0 : index
    %c2_56 = arith.constant 2 : index
    %c16_57 = arith.constant 16 : index
    %241 = vector.load %arg16[%c0_55, %c2_56, %c16_57] : memref<2x8x32xf32, #tpu.memory_space<vmem>>, vector<2x1x16xf32>
    tpu.vector_store %arg16[%c0_55, %c2_56, %c16_57], %240 {strides = array<i32>} : memref<2x8x32xf32, #tpu.memory_space<vmem>>, vector<2x1x16xf32>,
    %242 = vector.extract_strided_slice %9 {offsets = [0, 6, 0], sizes = [2, 1, 128], strides = [1, 1, 1]} : vector<2x8x128xf32> to vector<2x1x128xf32>
    %243 = vector.shape_cast %242 : vector<2x1x128xf32> to vector<2x128xf32>
    %244 = vector.extract_strided_slice %11 {offsets = [0, 1, 0], sizes = [2, 1, 128], strides = [1, 1, 1]} : vector<2x8x128xf32> to vector<2x1x128xf32>
    %245 = vector.shape_cast %244 : vector<2x1x128xf32> to vector<2x128xf32>
    %246 = arith.addf %243, %245 : vector<2x128xf32>
    %cst_58 = arith.constant dense<0.000000e+00> : vector<2x128xf32>
    %247 = tpu.matmul %235, %4, %cst_58 {dimension_numbers = #tpu.dot_dimension_numbers<[1], [0], [0], [1], [0, 0, 1, 1], [], []>} : vector<2x32xf32>, vector<32x128xf32>, vector<2x128xf32> -> vector<2x128xf32>
    %248 = arith.addf %246, %247 : vector<2x128xf32>
    %249 = vector.extract_strided_slice %248 {offsets = [0, 0], sizes = [2, 32], strides = [1, 1]} : vector<2x128xf32> to vector<2x32xf32>
    %250 = arith.negf %249 : vector<2x32xf32>
    %251 = math.exp %250 : vector<2x32xf32>
    %cst_59 = arith.constant 1.000000e+00 : f32
    %252 = vector.broadcast %cst_59 : f32 to vector<2x32xf32>
    %253 = arith.addf %252, %251 : vector<2x32xf32>
    %254 = arith.divf %252, %253 : vector<2x32xf32>
    %255 = vector.extract_strided_slice %248 {offsets = [0, 32], sizes = [2, 32], strides = [1, 1]} : vector<2x128xf32> to vector<2x32xf32>
    %256 = arith.negf %255 : vector<2x32xf32>
    %257 = math.exp %256 : vector<2x32xf32>
    %cst_60 = arith.constant 1.000000e+00 : f32
    %258 = vector.broadcast %cst_60 : f32 to vector<2x32xf32>
    %259 = arith.addf %258, %257 : vector<2x32xf32>
    %260 = arith.divf %258, %259 : vector<2x32xf32>
    %261 = vector.extract_strided_slice %248 {offsets = [0, 64], sizes = [2, 32], strides = [1, 1]} : vector<2x128xf32> to vector<2x32xf32>
    %262 = math.tanh %261 : vector<2x32xf32>
    %263 = vector.extract_strided_slice %248 {offsets = [0, 96], sizes = [2, 32], strides = [1, 1]} : vector<2x128xf32> to vector<2x32xf32>
    %264 = arith.negf %263 : vector<2x32xf32>
    %265 = math.exp %264 : vector<2x32xf32>
    %cst_61 = arith.constant 1.000000e+00 : f32
    %266 = vector.broadcast %cst_61 : f32 to vector<2x32xf32>
    %267 = arith.addf %266, %265 : vector<2x32xf32>
    %268 = arith.divf %266, %267 : vector<2x32xf32>
    %269 = arith.mulf %260, %233 : vector<2x32xf32>
    %270 = arith.mulf %254, %262 : vector<2x32xf32>
    %271 = arith.addf %269, %270 : vector<2x32xf32>
    %272 = math.tanh %271 : vector<2x32xf32>
    %273 = arith.mulf %268, %272 : vector<2x32xf32>
    %274 = vector.extract_strided_slice %273 {offsets = [0, 0], sizes = [2, 16], strides = [1, 1]} : vector<2x32xf32> to vector<2x16xf32>
    %275 = vector.shape_cast %274 : vector<2x16xf32> to vector<2x1x16xf32>
    %c0_62 = arith.constant 0 : index
    %c6_63 = arith.constant 6 : index
    %c0_64 = arith.constant 0 : index
    %276 = vector.load %arg16[%c0_62, %c6_63, %c0_64] : memref<2x8x32xf32, #tpu.memory_space<vmem>>, vector<2x1x16xf32>
    tpu.vector_store %arg16[%c0_62, %c6_63, %c0_64], %275 {strides = array<i32>} : memref<2x8x32xf32, #tpu.memory_space<vmem>>, vector<2x1x16xf32>,
    %277 = vector.extract_strided_slice %273 {offsets = [0, 16], sizes = [2, 16], strides = [1, 1]} : vector<2x32xf32> to vector<2x16xf32>
    %278 = vector.shape_cast %277 : vector<2x16xf32> to vector<2x1x16xf32>
    %c0_65 = arith.constant 0 : index
    %c1_66 = arith.constant 1 : index
    %c16_67 = arith.constant 16 : index
    %279 = vector.load %arg16[%c0_65, %c1_66, %c16_67] : memref<2x8x32xf32, #tpu.memory_space<vmem>>, vector<2x1x16xf32>
    tpu.vector_store %arg16[%c0_65, %c1_66, %c16_67], %278 {strides = array<i32>} : memref<2x8x32xf32, #tpu.memory_space<vmem>>, vector<2x1x16xf32>,
    %280 = vector.extract_strided_slice %9 {offsets = [0, 7, 0], sizes = [2, 1, 128], strides = [1, 1, 1]} : vector<2x8x128xf32> to vector<2x1x128xf32>
    %281 = vector.shape_cast %280 : vector<2x1x128xf32> to vector<2x128xf32>
    %282 = vector.extract_strided_slice %11 {offsets = [0, 0, 0], sizes = [2, 1, 128], strides = [1, 1, 1]} : vector<2x8x128xf32> to vector<2x1x128xf32>
    %283 = vector.shape_cast %282 : vector<2x1x128xf32> to vector<2x128xf32>
    %284 = arith.addf %281, %283 : vector<2x128xf32>
    %cst_68 = arith.constant dense<0.000000e+00> : vector<2x128xf32>
    %285 = tpu.matmul %273, %4, %cst_68 {dimension_numbers = #tpu.dot_dimension_numbers<[1], [0], [0], [1], [0, 0, 1, 1], [], []>} : vector<2x32xf32>, vector<32x128xf32>, vector<2x128xf32> -> vector<2x128xf32>
    %286 = arith.addf %284, %285 : vector<2x128xf32>
    %287 = vector.extract_strided_slice %286 {offsets = [0, 0], sizes = [2, 32], strides = [1, 1]} : vector<2x128xf32> to vector<2x32xf32>
    %288 = arith.negf %287 : vector<2x32xf32>
    %289 = math.exp %288 : vector<2x32xf32>
    %cst_69 = arith.constant 1.000000e+00 : f32
    %290 = vector.broadcast %cst_69 : f32 to vector<2x32xf32>
    %291 = arith.addf %290, %289 : vector<2x32xf32>
    %292 = arith.divf %290, %291 : vector<2x32xf32>
    %293 = vector.extract_strided_slice %286 {offsets = [0, 32], sizes = [2, 32], strides = [1, 1]} : vector<2x128xf32> to vector<2x32xf32>
    %294 = arith.negf %293 : vector<2x32xf32>
    %295 = math.exp %294 : vector<2x32xf32>
    %cst_70 = arith.constant 1.000000e+00 : f32
    %296 = vector.broadcast %cst_70 : f32 to vector<2x32xf32>
    %297 = arith.addf %296, %295 : vector<2x32xf32>
    %298 = arith.divf %296, %297 : vector<2x32xf32>
    %299 = vector.extract_strided_slice %286 {offsets = [0, 64], sizes = [2, 32], strides = [1, 1]} : vector<2x128xf32> to vector<2x32xf32>
    %300 = math.tanh %299 : vector<2x32xf32>
    %301 = vector.extract_strided_slice %286 {offsets = [0, 96], sizes = [2, 32], strides = [1, 1]} : vector<2x128xf32> to vector<2x32xf32>
    %302 = arith.negf %301 : vector<2x32xf32>
    %303 = math.exp %302 : vector<2x32xf32>
    %cst_71 = arith.constant 1.000000e+00 : f32
    %304 = vector.broadcast %cst_71 : f32 to vector<2x32xf32>
    %305 = arith.addf %304, %303 : vector<2x32xf32>
    %306 = arith.divf %304, %305 : vector<2x32xf32>
    %307 = arith.mulf %298, %271 : vector<2x32xf32>
    %308 = arith.mulf %292, %300 : vector<2x32xf32>
    %309 = arith.addf %307, %308 : vector<2x32xf32>
    %310 = math.tanh %309 : vector<2x32xf32>
    %311 = arith.mulf %306, %310 : vector<2x32xf32>
    %312 = vector.extract_strided_slice %311 {offsets = [0, 0], sizes = [2, 16], strides = [1, 1]} : vector<2x32xf32> to vector<2x16xf32>
    %313 = vector.shape_cast %312 : vector<2x16xf32> to vector<2x1x16xf32>
    %c0_72 = arith.constant 0 : index
    %c7_73 = arith.constant 7 : index
    %c0_74 = arith.constant 0 : index
    %314 = vector.load %arg16[%c0_72, %c7_73, %c0_74] : memref<2x8x32xf32, #tpu.memory_space<vmem>>, vector<2x1x16xf32>
    tpu.vector_store %arg16[%c0_72, %c7_73, %c0_74], %313 {strides = array<i32>} : memref<2x8x32xf32, #tpu.memory_space<vmem>>, vector<2x1x16xf32>,
    %315 = vector.extract_strided_slice %311 {offsets = [0, 16], sizes = [2, 16], strides = [1, 1]} : vector<2x32xf32> to vector<2x16xf32>
    %316 = vector.shape_cast %315 : vector<2x16xf32> to vector<2x1x16xf32>
    %c0_75 = arith.constant 0 : index
    %c0_76 = arith.constant 0 : index
    %c16_77 = arith.constant 16 : index
    %317 = vector.load %arg16[%c0_75, %c0_76, %c16_77] : memref<2x8x32xf32, #tpu.memory_space<vmem>>, vector<2x1x16xf32>
    tpu.vector_store %arg16[%c0_75, %c0_76, %c16_77], %316 {strides = array<i32>} : memref<2x8x32xf32, #tpu.memory_space<vmem>>, vector<2x1x16xf32>,
    %c0_78 = arith.constant 0 : index
    %c0_79 = arith.constant 0 : index
    %c0_80 = arith.constant 0 : index
    %318 = vector.load %arg16[%c0_78, %c0_79, %c0_80] : memref<2x8x32xf32, #tpu.memory_space<vmem>>, vector<2x8x32xf32>
    %319 = vector.shape_cast %318 : vector<2x8x32xf32> to vector<16x32xf32>
    %c0_81 = arith.constant 0 : index
    %c0_82 = arith.constant 0 : index
    %320 = vector.load %arg2[%c0_81, %c0_82] : memref<16x1xf32, #tpu.memory_space<vmem>>, vector<16x1xf32>
    %c0_83 = arith.constant 0 : index
    %c0_84 = arith.constant 0 : index
    %321 = vector.load %arg1[%c0_83, %c0_84] : memref<16x64xf32, #tpu.memory_space<vmem>>, vector<16x64xf32>
    %c0_85 = arith.constant 0 : index
    %c0_86 = arith.constant 0 : index
    %322 = vector.load %arg5[%c0_85, %c0_86] : memref<64x64xf32, #tpu.memory_space<vmem>>, vector<64x64xf32>
    %cst_87 = arith.constant dense<0.000000e+00> : vector<16x64xf32>
    %323 = tpu.matmul %321, %322, %cst_87 {dimension_numbers = #tpu.dot_dimension_numbers<[1], [0], [0], [1], [0, 0, 1, 1], [], []>} : vector<16x64xf32>, vector<64x64xf32>, vector<16x64xf32> -> vector<16x64xf32>
    %c0_88 = arith.constant 0 : index
    %c0_89 = arith.constant 0 : index
    %324 = vector.load %arg6[%c0_88, %c0_89] : memref<1x64xf32, #tpu.memory_space<vmem>>, vector<1x64xf32>
    %325 = vector.broadcast %324 : vector<1x64xf32> to vector<16x64xf32>
    %326 = arith.addf %323, %325 : vector<16x64xf32>
    %cst_90 = arith.constant 0.000000e+00 : f32
    %327 = vector.broadcast %cst_90 : f32 to vector<16x64xf32>
    %328 = arith.maximumf %326, %327 : vector<16x64xf32>
    %c0_91 = arith.constant 0 : index
    %c0_92 = arith.constant 0 : index
    %329 = vector.load %arg7[%c0_91, %c0_92] : memref<64x4xf32, #tpu.memory_space<vmem>>, vector<64x4xf32>
    %cst_93 = arith.constant dense<0.000000e+00> : vector<16x4xf32>
    %330 = tpu.matmul %328, %329, %cst_93 {dimension_numbers = #tpu.dot_dimension_numbers<[1], [0], [0], [1], [0, 0, 1, 1], [], []>} : vector<16x64xf32>, vector<64x4xf32>, vector<16x4xf32> -> vector<16x4xf32>
    %c0_94 = arith.constant 0 : index
    %c0_95 = arith.constant 0 : index
    %331 = vector.load %arg8[%c0_94, %c0_95] : memref<1x4xf32, #tpu.memory_space<vmem>>, vector<1x4xf32>
    %332 = vector.broadcast %331 : vector<1x4xf32> to vector<16x4xf32>
    %333 = arith.addf %330, %332 : vector<16x4xf32>
    %cst_96 = arith.constant 0.000000e+00 : f32
    %334 = vector.broadcast %cst_96 : f32 to vector<16x1xf32>
    %335 = arith.cmpf ogt, %320, %334 : vector<16x1xf32>
    %cst_97 = arith.constant -1.000000e+30 : f32
    %336 = vector.shape_cast %335 : vector<16x1xi1> to vector<16x1xi1>
    %337 = vector.broadcast %336 : vector<16x1xi1> to vector<16x4xi1>
    %338 = vector.broadcast %cst_97 : f32 to vector<16x4xf32>
    %339 = arith.select %337, %333, %338 : vector<16x4xi1>, vector<16x4xf32>
    %340 = vector.shape_cast %339 : vector<16x4xf32> to vector<2x8x4xf32>
    %cst_98 = arith.constant dense<0xFF800000> : vector<2x4xf32>
    %341 = vector.multi_reduction <maximumf>, %340, %cst_98 [1] : vector<2x8x4xf32> to vector<2x4xf32>
    %342 = vector.shape_cast %341 : vector<2x4xf32> to vector<2x1x4xf32>
    %343 = vector.broadcast %342 : vector<2x1x4xf32> to vector<2x8x4xf32>
    %344 = arith.subf %340, %343 : vector<2x8x4xf32>
    %345 = math.exp %344 : vector<2x8x4xf32>
    %cst_99 = arith.constant dense<0.000000e+00> : vector<2x4xf32>
    %346 = vector.multi_reduction <add>, %345, %cst_99 [1] : vector<2x8x4xf32> to vector<2x4xf32>
    %347 = vector.shape_cast %346 : vector<2x4xf32> to vector<2x1x4xf32>
    %348 = vector.broadcast %347 : vector<2x1x4xf32> to vector<2x8x4xf32>
    %349 = arith.divf %345, %348 : vector<2x8x4xf32>
    %350 = vector.extract_strided_slice %349 {offsets = [0, 0, 0], sizes = [2, 8, 2], strides = [1, 1, 1]} : vector<2x8x4xf32> to vector<2x8x2xf32>
    %cst_100 = arith.constant dense<0.000000e+00> : vector<2x8xf32>
    %351 = vector.multi_reduction <add>, %350, %cst_100 [2] : vector<2x8x2xf32> to vector<2x8xf32>
    %352 = vector.shape_cast %351 : vector<2x8xf32> to vector<2x8x1xf32>
    %cst_101 = arith.constant 2.000000e+00 : f32
    %353 = vector.broadcast %cst_101 : f32 to vector<2x8x1xf32>
    %354 = arith.divf %352, %353 : vector<2x8x1xf32>
    %355 = vector.extract_strided_slice %349 {offsets = [0, 0, 2], sizes = [2, 8, 2], strides = [1, 1, 1]} : vector<2x8x4xf32> to vector<2x8x2xf32>
    %cst_102 = arith.constant dense<0.000000e+00> : vector<2x8xf32>
    %356 = vector.multi_reduction <add>, %355, %cst_102 [2] : vector<2x8x2xf32> to vector<2x8xf32>
    %357 = vector.shape_cast %356 : vector<2x8xf32> to vector<2x8x1xf32>
    %cst_103 = arith.constant 2.000000e+00 : f32
    %358 = vector.broadcast %cst_103 : f32 to vector<2x8x1xf32>
    %359 = arith.divf %357, %358 : vector<2x8x1xf32>
    %360 = vector.broadcast %354 : vector<2x8x1xf32> to vector<2x8x32xf32>
    %361 = arith.mulf %360, %318 : vector<2x8x32xf32>
    %362 = vector.shape_cast %361 : vector<2x8x32xf32> to vector<16x32xf32>
    %363 = vector.broadcast %359 : vector<2x8x1xf32> to vector<2x8x32xf32>
    %364 = arith.mulf %363, %318 : vector<2x8x32xf32>
    %365 = vector.shape_cast %364 : vector<2x8x32xf32> to vector<16x32xf32>
    %c0_104 = arith.constant 0 : index
    %c0_105 = arith.constant 0 : index
    %c0_106 = arith.constant 0 : index
    %366 = vector.load %arg3[%c0_104, %c0_105, %c0_106] : memref<2x8x8xf32, #tpu.memory_space<vmem>>, vector<2x8x8xf32>
    %c0_107 = arith.constant 0 : index
    %c0_108 = arith.constant 0 : index
    %367 = vector.load %arg9[%c0_107, %c0_108] : memref<32x64xf32, #tpu.memory_space<vmem>>, vector<32x64xf32>
    %cst_109 = arith.constant dense<0.000000e+00> : vector<16x64xf32>
    %368 = tpu.matmul %319, %367, %cst_109 {dimension_numbers = #tpu.dot_dimension_numbers<[1], [0], [0], [1], [0, 0, 1, 1], [], []>} : vector<16x32xf32>, vector<32x64xf32>, vector<16x64xf32> -> vector<16x64xf32>
    %c0_110 = arith.constant 0 : index
    %c0_111 = arith.constant 0 : index
    %369 = vector.load %arg10[%c0_110, %c0_111] : memref<64x4xf32, #tpu.memory_space<vmem>>, vector<64x4xf32>
    %cst_112 = arith.constant dense<0.000000e+00> : vector<16x4xf32>
    %370 = tpu.matmul %368, %369, %cst_112 {dimension_numbers = #tpu.dot_dimension_numbers<[1], [0], [0], [1], [0, 0, 1, 1], [], []>} : vector<16x64xf32>, vector<64x4xf32>, vector<16x4xf32> -> vector<16x4xf32>
    %371 = vector.extract_strided_slice %370 {offsets = [0, 0], sizes = [16, 2], strides = [1, 1]} : vector<16x4xf32> to vector<16x2xf32>
    %372 = vector.shape_cast %371 : vector<16x2xf32> to vector<2x8x2xf32>
    %373 = vector.extract_strided_slice %370 {offsets = [0, 2], sizes = [16, 2], strides = [1, 1]} : vector<16x4xf32> to vector<16x2xf32>
    %374 = vector.shape_cast %373 : vector<16x2xf32> to vector<2x8x2xf32>
    %cst_113 = arith.constant 0.000000e+00 : f32
    %375 = vector.broadcast %cst_113 : f32 to vector<2x8x32xf32>
    %376 = vector.extract_strided_slice %368 {offsets = [0, 0], sizes = [16, 32], strides = [1, 1]} : vector<16x64xf32> to vector<16x32xf32>
    %377 = vector.shape_cast %376 : vector<16x32xf32> to vector<2x8x32xf32>
    %378 = vector.extract_strided_slice %372 {offsets = [0, 0, 0], sizes = [2, 8, 1], strides = [1, 1, 1]} : vector<2x8x2xf32> to vector<2x8x1xf32>
    %379 = vector.extract_strided_slice %374 {offsets = [0, 0, 0], sizes = [2, 8, 1], strides = [1, 1, 1]} : vector<2x8x2xf32> to vector<2x8x1xf32>
    %380 = vector.shape_cast %379 : vector<2x8x1xf32> to vector<2x1x8xf32>
    %381 = vector.broadcast %378 : vector<2x8x1xf32> to vector<2x8x8xf32>
    %382 = vector.broadcast %380 : vector<2x1x8xf32> to vector<2x8x8xf32>
    %383 = arith.addf %381, %382 : vector<2x8x8xf32>
    %cst_114 = arith.constant 0.000000e+00 : f32
    %384 = vector.broadcast %cst_114 : f32 to vector<2x8x8xf32>
    %385 = arith.cmpf ogt, %383, %384 : vector<2x8x8xf32>
    %cst_115 = arith.constant 2.000000e-01 : f32
    %386 = vector.broadcast %cst_115 : f32 to vector<2x8x8xf32>
    %387 = arith.mulf %386, %383 : vector<2x8x8xf32>
    %388 = arith.select %385, %383, %387 : vector<2x8x8xi1>, vector<2x8x8xf32>
    %cst_116 = arith.constant 0.000000e+00 : f32
    %389 = vector.broadcast %cst_116 : f32 to vector<2x8x8xf32>
    %390 = arith.cmpf ogt, %366, %389 : vector<2x8x8xf32>
    %cst_117 = arith.constant -1.000000e+30 : f32
    %391 = vector.broadcast %cst_117 : f32 to vector<2x8x8xf32>
    %392 = arith.select %390, %388, %391 : vector<2x8x8xi1>, vector<2x8x8xf32>
    %cst_118 = arith.constant dense<0xFF800000> : vector<2x8xf32>
    %393 = vector.multi_reduction <maximumf>, %392, %cst_118 [2] : vector<2x8x8xf32> to vector<2x8xf32>
    %394 = vector.shape_cast %393 : vector<2x8xf32> to vector<2x8x1xf32>
    %395 = vector.broadcast %394 : vector<2x8x1xf32> to vector<2x8x8xf32>
    %396 = arith.subf %392, %395 : vector<2x8x8xf32>
    %397 = math.exp %396 : vector<2x8x8xf32>
    %cst_119 = arith.constant dense<0.000000e+00> : vector<2x8xf32>
    %398 = vector.multi_reduction <add>, %397, %cst_119 [2] : vector<2x8x8xf32> to vector<2x8xf32>
    %399 = vector.shape_cast %398 : vector<2x8xf32> to vector<2x8x1xf32>
    %400 = vector.broadcast %399 : vector<2x8x1xf32> to vector<2x8x8xf32>
    %401 = arith.divf %397, %400 : vector<2x8x8xf32>
    "tpu.trace_start"() <{level = 10 : i32, message = "bij,bjd->bid"}> : () -> ()
    %cst_120 = arith.constant dense<0.000000e+00> : vector<2x8x32xf32>
    %402 = tpu.matmul %401, %377, %cst_120 {dimension_numbers = #tpu.dot_dimension_numbers<[2], [1], [1], [2], [0, 0, 0, 1, 1, 2], [0], [0]>} : vector<2x8x8xf32>, vector<2x8x32xf32>, vector<2x8x32xf32> -> vector<2x8x32xf32>
    %cst_121 = arith.constant 0.000000e+00 : f32
    "tpu.trace_stop"() : () -> ()
    %403 = vector.broadcast %cst_121 : f32 to vector<2x8x32xf32>
    %404 = arith.cmpf ogt, %402, %403 : vector<2x8x32xf32>
    %cst_122 = arith.constant 0.000000e+00 : f32
    %405 = vector.broadcast %cst_122 : f32 to vector<2x8x32xf32>
    %406 = arith.minimumf %402, %405 : vector<2x8x32xf32>
    %407 = math.exp %406 : vector<2x8x32xf32>
    %cst_123 = arith.constant 1.000000e+00 : f32
    %408 = vector.broadcast %cst_123 : f32 to vector<2x8x32xf32>
    %409 = arith.subf %407, %408 : vector<2x8x32xf32>
    %410 = arith.select %404, %402, %409 : vector<2x8x32xi1>, vector<2x8x32xf32>
    %411 = arith.addf %375, %410 : vector<2x8x32xf32>
    %412 = vector.extract_strided_slice %368 {offsets = [0, 32], sizes = [16, 32], strides = [1, 1]} : vector<16x64xf32> to vector<16x32xf32>
    %413 = vector.shape_cast %412 : vector<16x32xf32> to vector<2x8x32xf32>
    %414 = vector.extract_strided_slice %372 {offsets = [0, 0, 1], sizes = [2, 8, 1], strides = [1, 1, 1]} : vector<2x8x2xf32> to vector<2x8x1xf32>
    %415 = vector.extract_strided_slice %374 {offsets = [0, 0, 1], sizes = [2, 8, 1], strides = [1, 1, 1]} : vector<2x8x2xf32> to vector<2x8x1xf32>
    %416 = vector.shape_cast %415 : vector<2x8x1xf32> to vector<2x1x8xf32>
    %417 = vector.broadcast %414 : vector<2x8x1xf32> to vector<2x8x8xf32>
    %418 = vector.broadcast %416 : vector<2x1x8xf32> to vector<2x8x8xf32>
    %419 = arith.addf %417, %418 : vector<2x8x8xf32>
    %cst_124 = arith.constant 0.000000e+00 : f32
    %420 = vector.broadcast %cst_124 : f32 to vector<2x8x8xf32>
    %421 = arith.cmpf ogt, %419, %420 : vector<2x8x8xf32>
    %cst_125 = arith.constant 2.000000e-01 : f32
    %422 = vector.broadcast %cst_125 : f32 to vector<2x8x8xf32>
    %423 = arith.mulf %422, %419 : vector<2x8x8xf32>
    %424 = arith.select %421, %419, %423 : vector<2x8x8xi1>, vector<2x8x8xf32>
    %cst_126 = arith.constant 0.000000e+00 : f32
    %425 = vector.broadcast %cst_126 : f32 to vector<2x8x8xf32>
    %426 = arith.cmpf ogt, %366, %425 : vector<2x8x8xf32>
    %cst_127 = arith.constant -1.000000e+30 : f32
    %427 = vector.broadcast %cst_127 : f32 to vector<2x8x8xf32>
    %428 = arith.select %426, %424, %427 : vector<2x8x8xi1>, vector<2x8x8xf32>
    %cst_128 = arith.constant dense<0xFF800000> : vector<2x8xf32>
    %429 = vector.multi_reduction <maximumf>, %428, %cst_128 [2] : vector<2x8x8xf32> to vector<2x8xf32>
    %430 = vector.shape_cast %429 : vector<2x8xf32> to vector<2x8x1xf32>
    %431 = vector.broadcast %430 : vector<2x8x1xf32> to vector<2x8x8xf32>
    %432 = arith.subf %428, %431 : vector<2x8x8xf32>
    %433 = math.exp %432 : vector<2x8x8xf32>
    %cst_129 = arith.constant dense<0.000000e+00> : vector<2x8xf32>
    %434 = vector.multi_reduction <add>, %433, %cst_129 [2] : vector<2x8x8xf32> to vector<2x8xf32>
    %435 = vector.shape_cast %434 : vector<2x8xf32> to vector<2x8x1xf32>
    %436 = vector.broadcast %435 : vector<2x8x1xf32> to vector<2x8x8xf32>
    %437 = arith.divf %433, %436 : vector<2x8x8xf32>
    "tpu.trace_start"() <{level = 10 : i32, message = "bij,bjd->bid"}> : () -> ()
    %cst_130 = arith.constant dense<0.000000e+00> : vector<2x8x32xf32>
    %438 = tpu.matmul %437, %413, %cst_130 {dimension_numbers = #tpu.dot_dimension_numbers<[2], [1], [1], [2], [0, 0, 0, 1, 1, 2], [0], [0]>} : vector<2x8x8xf32>, vector<2x8x32xf32>, vector<2x8x32xf32> -> vector<2x8x32xf32>
    %cst_131 = arith.constant 0.000000e+00 : f32
    "tpu.trace_stop"() : () -> ()
    %439 = vector.broadcast %cst_131 : f32 to vector<2x8x32xf32>
    %440 = arith.cmpf ogt, %438, %439 : vector<2x8x32xf32>
    %cst_132 = arith.constant 0.000000e+00 : f32
    %441 = vector.broadcast %cst_132 : f32 to vector<2x8x32xf32>
    %442 = arith.minimumf %438, %441 : vector<2x8x32xf32>
    %443 = math.exp %442 : vector<2x8x32xf32>
    %cst_133 = arith.constant 1.000000e+00 : f32
    %444 = vector.broadcast %cst_133 : f32 to vector<2x8x32xf32>
    %445 = arith.subf %443, %444 : vector<2x8x32xf32>
    %446 = arith.select %440, %438, %445 : vector<2x8x32xi1>, vector<2x8x32xf32>
    %447 = arith.addf %411, %446 : vector<2x8x32xf32>
    %cst_134 = arith.constant 5.000000e-01 : f32
    %448 = vector.broadcast %cst_134 : f32 to vector<2x8x32xf32>
    %449 = arith.mulf %447, %448 : vector<2x8x32xf32>
    %450 = vector.shape_cast %449 : vector<2x8x32xf32> to vector<16x32xf32>
    %c0_135 = arith.constant 0 : index
    %c0_136 = arith.constant 0 : index
    %451 = vector.load %arg11[%c0_135, %c0_136] : memref<32x32xf32, #tpu.memory_space<vmem>>, vector<32x32xf32>
    %cst_137 = arith.constant dense<0.000000e+00> : vector<16x32xf32>
    %452 = tpu.matmul %450, %451, %cst_137 {dimension_numbers = #tpu.dot_dimension_numbers<[1], [0], [0], [1], [0, 0, 1, 1], [], []>} : vector<16x32xf32>, vector<32x32xf32>, vector<16x32xf32> -> vector<16x32xf32>
    %c0_138 = arith.constant 0 : index
    %c0_139 = arith.constant 0 : index
    %453 = vector.load %arg12[%c0_138, %c0_139] : memref<32x2xf32, #tpu.memory_space<vmem>>, vector<32x2xf32>
    %cst_140 = arith.constant dense<0.000000e+00> : vector<16x2xf32>
    %454 = tpu.matmul %452, %453, %cst_140 {dimension_numbers = #tpu.dot_dimension_numbers<[1], [0], [0], [1], [0, 0, 1, 1], [], []>} : vector<16x32xf32>, vector<32x2xf32>, vector<16x2xf32> -> vector<16x2xf32>
    %455 = vector.extract_strided_slice %454 {offsets = [0, 0], sizes = [16, 1], strides = [1, 1]} : vector<16x2xf32> to vector<16x1xf32>
    %456 = vector.shape_cast %455 : vector<16x1xf32> to vector<2x8x1xf32>
    %457 = vector.extract_strided_slice %454 {offsets = [0, 1], sizes = [16, 1], strides = [1, 1]} : vector<16x2xf32> to vector<16x1xf32>
    %458 = vector.shape_cast %457 : vector<16x1xf32> to vector<2x1x8xf32>
    %459 = vector.broadcast %456 : vector<2x8x1xf32> to vector<2x8x8xf32>
    %460 = vector.broadcast %458 : vector<2x1x8xf32> to vector<2x8x8xf32>
    %461 = arith.addf %459, %460 : vector<2x8x8xf32>
    %cst_141 = arith.constant 0.000000e+00 : f32
    %462 = vector.broadcast %cst_141 : f32 to vector<2x8x8xf32>
    %463 = arith.cmpf ogt, %461, %462 : vector<2x8x8xf32>
    %cst_142 = arith.constant 2.000000e-01 : f32
    %464 = vector.broadcast %cst_142 : f32 to vector<2x8x8xf32>
    %465 = arith.mulf %464, %461 : vector<2x8x8xf32>
    %466 = arith.select %463, %461, %465 : vector<2x8x8xi1>, vector<2x8x8xf32>
    %cst_143 = arith.constant 0.000000e+00 : f32
    %467 = vector.broadcast %cst_143 : f32 to vector<2x8x8xf32>
    %468 = arith.cmpf ogt, %366, %467 : vector<2x8x8xf32>
    %cst_144 = arith.constant -1.000000e+30 : f32
    %469 = vector.broadcast %cst_144 : f32 to vector<2x8x8xf32>
    %470 = arith.select %468, %466, %469 : vector<2x8x8xi1>, vector<2x8x8xf32>
    %cst_145 = arith.constant dense<0xFF800000> : vector<2x8xf32>
    %471 = vector.multi_reduction <maximumf>, %470, %cst_145 [2] : vector<2x8x8xf32> to vector<2x8xf32>
    %472 = vector.shape_cast %471 : vector<2x8xf32> to vector<2x8x1xf32>
    %473 = vector.broadcast %472 : vector<2x8x1xf32> to vector<2x8x8xf32>
    %474 = arith.subf %470, %473 : vector<2x8x8xf32>
    %475 = math.exp %474 : vector<2x8x8xf32>
    %cst_146 = arith.constant dense<0.000000e+00> : vector<2x8xf32>
    %476 = vector.multi_reduction <add>, %475, %cst_146 [2] : vector<2x8x8xf32> to vector<2x8xf32>
    %477 = vector.shape_cast %476 : vector<2x8xf32> to vector<2x8x1xf32>
    %478 = vector.broadcast %477 : vector<2x8x1xf32> to vector<2x8x8xf32>
    %479 = arith.divf %475, %478 : vector<2x8x8xf32>
    %480 = vector.shape_cast %452 : vector<16x32xf32> to vector<2x8x32xf32>
    "tpu.trace_start"() <{level = 10 : i32, message = "bij,bjd->bid"}> : () -> ()
    %cst_147 = arith.constant dense<0.000000e+00> : vector<2x8x32xf32>
    %481 = tpu.matmul %479, %480, %cst_147 {dimension_numbers = #tpu.dot_dimension_numbers<[2], [1], [1], [2], [0, 0, 0, 1, 1, 2], [0], [0]>} : vector<2x8x8xf32>, vector<2x8x32xf32>, vector<2x8x32xf32> -> vector<2x8x32xf32>
    "tpu.trace_stop"() : () -> ()
    %cst_148 = arith.constant 0.000000e+00 : f32
    %482 = vector.broadcast %cst_148 : f32 to vector<2x8x32xf32>
    %483 = arith.maximumf %481, %482 : vector<2x8x32xf32>
    %484 = vector.shape_cast %483 : vector<2x8x32xf32> to vector<16x32xf32>
    %c0_149 = arith.constant 0 : index
    %c0_150 = arith.constant 0 : index
    %485 = vector.load %arg13[%c0_149, %c0_150] : memref<160x32xf32, #tpu.memory_space<vmem>>, vector<160x32xf32>
    %c0_151 = arith.constant 0 : index
    %c0_152 = arith.constant 0 : index
    %486 = vector.load %arg14[%c0_151, %c0_152] : memref<3x32xf32, #tpu.memory_space<vmem>>, vector<3x32xf32>
    %487 = vector.extract_strided_slice %485 {offsets = [0, 0], sizes = [32, 32], strides = [1, 1]} : vector<160x32xf32> to vector<32x32xf32>
    %cst_153 = arith.constant dense<0.000000e+00> : vector<16x32xf32>
    %488 = tpu.matmul %362, %487, %cst_153 {dimension_numbers = #tpu.dot_dimension_numbers<[1], [0], [0], [1], [0, 0, 1, 1], [], []>} : vector<16x32xf32>, vector<32x32xf32>, vector<16x32xf32> -> vector<16x32xf32>
    %489 = vector.extract_strided_slice %485 {offsets = [32, 0], sizes = [32, 32], strides = [1, 1]} : vector<160x32xf32> to vector<32x32xf32>
    %cst_154 = arith.constant dense<0.000000e+00> : vector<16x32xf32>
    %490 = tpu.matmul %365, %489, %cst_154 {dimension_numbers = #tpu.dot_dimension_numbers<[1], [0], [0], [1], [0, 0, 1, 1], [], []>} : vector<16x32xf32>, vector<32x32xf32>, vector<16x32xf32> -> vector<16x32xf32>
    %491 = arith.addf %488, %490 : vector<16x32xf32>
    %492 = vector.extract_strided_slice %485 {offsets = [64, 0], sizes = [32, 32], strides = [1, 1]} : vector<160x32xf32> to vector<32x32xf32>
    %cst_155 = arith.constant dense<0.000000e+00> : vector<16x32xf32>
    %493 = tpu.matmul %484, %492, %cst_155 {dimension_numbers = #tpu.dot_dimension_numbers<[1], [0], [0], [1], [0, 0, 1, 1], [], []>} : vector<16x32xf32>, vector<32x32xf32>, vector<16x32xf32> -> vector<16x32xf32>
    %494 = arith.addf %491, %493 : vector<16x32xf32>
    %495 = vector.extract_strided_slice %486 {offsets = [0, 0], sizes = [1, 32], strides = [1, 1]} : vector<3x32xf32> to vector<1x32xf32>
    %496 = vector.broadcast %495 : vector<1x32xf32> to vector<16x32xf32>
    %497 = arith.addf %494, %496 : vector<16x32xf32>
    %cst_156 = arith.constant 0.000000e+00 : f32
    %498 = vector.broadcast %cst_156 : f32 to vector<16x32xf32>
    %499 = arith.maximumf %497, %498 : vector<16x32xf32>
    %500 = vector.extract_strided_slice %485 {offsets = [96, 0], sizes = [32, 32], strides = [1, 1]} : vector<160x32xf32> to vector<32x32xf32>
    %cst_157 = arith.constant dense<0.000000e+00> : vector<16x32xf32>
    %501 = tpu.matmul %499, %500, %cst_157 {dimension_numbers = #tpu.dot_dimension_numbers<[1], [0], [0], [1], [0, 0, 1, 1], [], []>} : vector<16x32xf32>, vector<32x32xf32>, vector<16x32xf32> -> vector<16x32xf32>
    %502 = vector.extract_strided_slice %486 {offsets = [1, 0], sizes = [1, 32], strides = [1, 1]} : vector<3x32xf32> to vector<1x32xf32>
    %503 = vector.broadcast %502 : vector<1x32xf32> to vector<16x32xf32>
    %504 = arith.addf %501, %503 : vector<16x32xf32>
    %cst_158 = arith.constant 0.000000e+00 : f32
    %505 = vector.broadcast %cst_158 : f32 to vector<16x32xf32>
    %506 = arith.maximumf %504, %505 : vector<16x32xf32>
    %507 = vector.extract_strided_slice %485 {offsets = [128, 0], sizes = [32, 32], strides = [1, 1]} : vector<160x32xf32> to vector<32x32xf32>
    %cst_159 = arith.constant dense<0.000000e+00> : vector<16x32xf32>
    %508 = tpu.matmul %506, %507, %cst_159 {dimension_numbers = #tpu.dot_dimension_numbers<[1], [0], [0], [1], [0, 0, 1, 1], [], []>} : vector<16x32xf32>, vector<32x32xf32>, vector<16x32xf32> -> vector<16x32xf32>
    %509 = vector.extract_strided_slice %486 {offsets = [2, 0], sizes = [1, 32], strides = [1, 1]} : vector<3x32xf32> to vector<1x32xf32>
    %510 = vector.broadcast %509 : vector<1x32xf32> to vector<16x32xf32>
    %511 = arith.addf %508, %510 : vector<16x32xf32>
    %512 = vector.extract_strided_slice %511 {offsets = [0, 0], sizes = [16, 3], strides = [1, 1]} : vector<16x32xf32> to vector<16x3xf32>
    %c0_160 = arith.constant 0 : index
    %c0_161 = arith.constant 0 : index
    %513 = vector.load %arg15[%c0_160, %c0_161] : memref<16x3xf32, #tpu.memory_space<vmem>>, vector<16x3xf32>
    tpu.vector_store %arg15[%c0_160, %c0_161], %512 {strides = array<i32>} : memref<16x3xf32, #tpu.memory_space<vmem>>, vector<16x3xf32>,
    return
  }
}

</mosaic_0001>

<bundles_post_ra>
// kernel: forward.1
= control target key start
LH: loop header
LB: loop body
LE: loop exit
PB: predicated region body
PF: predicated region fallthrough
CT: control target
= control target key end

     0   :  { %20 = vsyncpa [#allocation4], 0  ;;  %s4950_s0 = inlined_call_operand.vmem [shape: f32[16,32], index: 0, kind: input, shape index: {}]   ;;  %s4951_s1 = inlined_call_operand.vmem [shape: f32[16,64], index: 1, kind: input, shape index: {}]   ;;  %s4952_s2 = inlined_call_operand.vmem [shape: f32[16,1], index: 2, kind: input, shape index: {}]   ;;  %s4953_s3 = inlined_call_operand.vmem [shape: f32[2,8,8], index: 3, kind: input, shape index: {}]   ;;  %s4954_s4 = inlined_call_operand.vmem [shape: f32[97,128], index: 4, kind: input, shape index: {}]   ;;  %s4955_s5 = inlined_call_operand.hbm [shape: f32[64,64], index: 5, kind: input, shape index: {}]   ;;  %s4956_s6 = inlined_call_operand.hbm [shape: f32[1,64], index: 6, kind: input, shape index: {}]   ;;  %s4957_s7 = inlined_call_operand.vmem [shape: f32[64,4], index: 7, kind: input, shape index: {}]   ;;  %s4958_s8 = inlined_call_operand.hbm [shape: f32[1,4], index: 8, kind: input, shape index: {}]   ;;  %s4959_s9 = inlined_call_operand.vmem [shape: f32[32,64], index: 9, kind: input, shape index: {}]   ;;  %s4960_s10 = inlined_call_operand.vmem [shape: f32[64,4], index: 10, kind: input, shape index: {}]   ;;  %s4961_s11 = inlined_call_operand.vmem [shape: f32[32,32], index: 11, kind: input, shape index: {}]   ;;  %s4962_s12 = inlined_call_operand.vmem [shape: f32[32,2], index: 12, kind: input, shape index: {}]   ;;  %s4963_s13 = inlined_call_operand.vmem [shape: f32[160,32], index: 13, kind: input, shape index: {}]   ;;  %s4964_s14 = inlined_call_operand.vmem [shape: f32[3,32], index: 14, kind: input, shape index: {}]   ;;  %s4965_s15 = inlined_call_operand.vmem [shape: f32[16,3], index: 15, kind: output, shape index: {}]  }
   0x1   :  { %21 = vsyncpa [#allocation6], 0  ;;  %s4206_s18 = smov [#allocation5]   ;;  %s4207_s20 = smov [#allocation3]  }
   0x2   :  { %s50_s19 = sshll.u32 %s4206_s18, 4  ;;  %s37_s21 = sshll.u32 %s4207_s20, 4  ;;  %s51_s19 = int_to_ptr.vmem [resolvable:$true] %s50_s19  ;;  %s4302_s21 = int_to_ptr.vmem [resolvable:$true] %s37_s21 }
   0x3   :  { %s4136_s24 = scalar_lea.hbm %s4956_s6, 16 }
   0x4   :  { %p4137_p0 = scmp.ne.s32.totalorder %s4956_s6, %s4136_s24  ;;  %p4140_p1 = scmp.lt.u32.totalorder %s4136_s24, %s4956_s6 }
   0x6   :  { %p4142_p2 = pnand %p4140_p1, %p4137_p0 }
   0x8   :  { %4145 = shalt.err (!%p4142_p2)
}
   0x9   :  { %s4146_s29 = scalar_lea.vmem %s51_s19, 16  ;;  %s4150_s30 = scalar_lea.vmem %s51_s19, 32 }
   0xa   :  { %p4147_p3 = scmp.ne.s32.totalorder %s51_s19, %s4146_s29  ;;  %p4151_p4 = scmp.lt.s32.totalorder %s51_s19, %s51_s19 }
   0xb   :  { %p4152_p5 = scmp.lt.s32.totalorder %s4150_s30, %s4146_s29 }
   0xd   :  { %p4153_p6 = por %p4152_p5, %p4151_p4 }
   0xf   :  { %p4154_p7 = pnand %p4153_p6, %p4147_p3 }
  0x11   :  { %4157 = shalt.err (!%p4154_p7)
}
  0x12   :  { %53 = dma.hbm_to_vmem [thread:$0]  %s4956_s6, 16, %s51_s19, [#allocation6]  }
  0x13   :  { %s4158_s22 = scalar_lea.hbm %s4955_s5, 1024 }
  0x14   :  { %p4159_p8 = scmp.ne.s32.totalorder %s4955_s5, %s4158_s22  ;;  %p4162_p9 = scmp.lt.u32.totalorder %s4158_s22, %s4955_s5 }
  0x16   :  { %p4164_p10 = pnand %p4162_p9, %p4159_p8 }
  0x18   :  { %4167 = shalt.err (!%p4164_p10)
}
  0x19   :  { %s4168_s27 = scalar_lea.vmem %s4302_s21, 1024  ;;  %p4173_p12 = scmp.lt.s32.totalorder %s4302_s21, %s4302_s21 }
  0x1a   :  { %p4169_p11 = scmp.ne.s32.totalorder %s4302_s21, %s4168_s27  ;;  %p4174_p13 = scmp.lt.s32.totalorder %s4168_s27, %s4168_s27 }
  0x1c   :  { %p4175_p0 = por %p4174_p13, %p4173_p12 }
  0x1e   :  { %p4176_p1 = pnand %p4175_p0, %p4169_p11 }
  0x20   :  { %4179 = shalt.err (!%p4176_p1)
}
  0x21   :  { %s4208_s6 = smov 128   ;;  %s4209_s19 = smov 8  }
  0x22   :  { %43 = dma.hbm_to_vmem [thread:$0]  %s4955_s5, 1024, %s4302_s21, [#allocation4], %s4208_s6, %s4208_s6, %s4209_s19  }
  0x23   :  { %s4210_s30 = smov [#allocation7]   ;;  %s4180_s20 = scalar_lea.hbm %s4958_s8, 16 }
  0x24   :  { %s62_s16 = sshll.u32 %s4210_s30, 4  ;;  %p4181_p2 = scmp.ne.s32.totalorder %s4958_s8, %s4180_s20  ;;  %s63_s16 = int_to_ptr.vmem [resolvable:$true] %s62_s16 }
  0x25   :  { %p4184_p3 = scmp.lt.u32.totalorder %s4180_s20, %s4958_s8 }
  0x27   :  { %p4186_p4 = pnand %p4184_p3, %p4181_p2 }
  0x29   :  { %4189 = shalt.err (!%p4186_p4)
}
  0x2a   :  { %s4190_s26 = scalar_lea.vmem %s63_s16, 16  ;;  %s4194_s5 = scalar_lea.vmem %s63_s16, 32 }
  0x2b   :  { %p4191_p5 = scmp.ne.s32.totalorder %s63_s16, %s4190_s26  ;;  %p4195_p6 = scmp.lt.s32.totalorder %s63_s16, %s63_s16 }
  0x2c   :  { %p4196_p7 = scmp.lt.s32.totalorder %s4194_s5, %s4190_s26 }
  0x2e   :  { %p4197_p8 = por %p4196_p7, %p4195_p6 }
  0x30   :  { %p4198_p9 = pnand %p4197_p8, %p4191_p5 }
  0x32   :  { %4201 = shalt.err (!%p4198_p9)
}
  0x33   :  { %65 = dma.hbm_to_vmem [thread:$0]  %s4958_s8, 16, %s63_s16, [#allocation6]  }
  0x34   :  { %4202 = dma.done.wait [#allocation4], 1024  }
  0x35   :  { %4203 = vsyncadd [#allocation4], 4294966272 }
  0x36   :  { %4204 = dma.done.wait [#allocation6], 32  }
  0x37   :  { %4205 = vsyncadd [#allocation6], 4294967264  ;;  %v89_v0 = vld [vmem:[%s4954_s4] sm:$0xff]  ;;  %v90_v1 = vld [vmem:[%s4954_s4 + $0x8] sm:$0xff]  ;;  %vm106_vm0 = vcmask 261120   ;;  %v4211_v17 = vmov 0.0|0.0  }
  0x38   :  { %v93_v2 = vld [vmem:[%s4954_s4 + $0x20] sm:$0xff]  ;;  %v3761_v3 = vpack.c.bf16 %v90_v1, %v89_v0  ;;  %v94_v4 = vld [vmem:[%s4954_s4 + $0x28] sm:$0xff]  ;;  %v91_v5 = vld [vmem:[%s4954_s4 + $0x10] sm:$0xff]  ;;  %vm4212_vm1 = vmmov 0   ;;  %v4213_v21 = vmov 0.0   ;;  %s4215_s23 = smov 32  }
  0x39   :  { %v92_v6 = vld [vmem:[%s4954_s4 + $0x18] sm:$0xff]  ;;  %v3769_v7 = vpack.c.bf16 %v94_v4, %v93_v2  ;;  %v95_v9 = vld [vmem:[%s4954_s4 + $0x30] sm:$0xff]  ;;  %v87_v11 = vld [vmem:[%s4950_s0] sm:$0xff]  ;;  %vm419_vm2 = vcmask 1041409   ;;  %vm1513_vm3 = vcmask 523264   ;;  %vm406_vm4 = vcmask 122880  }
  0x3a   :  { %v3765_v8 = vpack.c.bf16 %v92_v6, %v91_v5  ;;  %v96_v10 = vld [vmem:[%s4954_s4 + $0x38] sm:$0xff]  ;;  %3762 = vmatprep.subr.bf16.mxu0 %v3761_v3  ;;  %3484 = vmatprep.mubr.msk.f32.mxu0 %vm106_vm0, %v87_v11  ;;  %v97_v13 = vld [vmem:[%s4954_s4 + $0x40] sm:$0xff]  ;;  %v98_v14 = vld [vmem:[%s4954_s4 + $0x48] sm:$0xff]  ;;  %vm409_vm5 = vcmask 254080   ;;  %vm563_vm6 = vcmask 123905   ;;  %vm566_vm7 = vcmask 255105  }
  0x3b   :  { %v3773_v12 = vpack.c.bf16 %v96_v10, %v95_v9  ;;  %3770 = vmatprep.subr.bf16.mxu1 %v3769_v7  ;;  %3764 = vmatpush3.bf16.msra.mxu0 %v3761_v3  ;;  %v88_v15 = vld [vmem:[%s4950_s0 + $0x8] sm:$0xff]  ;;  %v4383_v16 = vpack.c.bf16 %v98_v14, %v97_v13  ;;  %v99_v18 = vld [vmem:[%s4954_s4 + $0x50] sm:$0xff]  ;;  %v100_v19 = vld [vmem:[%s4954_s4 + $0x58] sm:$0xff]  ;;  %vm720_vm8 = vcmask 124930   ;;  %vm723_vm9 = vcmask 256130  }
  0x3c   :  { %3772 = vmatpush3.bf16.msra.mxu1 %v3769_v7  ;;  %3766 = vmatprep.subr.bf16.mxu0 %v3765_v8  ;;  %v4396_v20 = vpack.c.bf16 %v100_v19, %v99_v18  ;;  %v3272_v22 = vld [vmem:[%s4954_s4 + $0x60] ss:$0 sm:$0xff]  ;;  %s4214_s4 = smov 64   ;;  %vm878_vm10 = vcmask 125955   ;;  %vm881_vm11 = vcmask 257155   ;;  %vm1030_vm12 = vcmask 126980  }
  0x3d   :  { %3774 = vmatprep.subr.bf16.mxu1 %v3773_v12  ;;  %3495 = vmatprep.mubr.msk.f32.mxu1 %vm106_vm0, %v87_v11  ;;  %vm1033_vm13 = vcmask 258180   ;;  %vm1182_vm14 = vcmask 128005   ;;  %vm1185_vm15 = vcmask 259205  }
  0x3f   :  { %3768 = vmatpush3.bf16.msra.mxu0 %v3765_v8 }
  0x40   :  { %3776 = vmatpush3.bf16.msra.mxu1 %v3773_v12  ;;  %3777 = vmatprep.subr.bf16.mxu0 %v4211_v17 }
  0x41   :  { %3783 = vmatprep.subr.bf16.mxu1 %v4211_v17 }
  0x42   :  { %3485 = vmatmul.mubr.msk.f32.vlgmr.msra.gmra.mrb[0].mxu0 %vm106_vm0, %v88_v15 }
  0x43   :  { %3496 = vmatmul.mubr.msk.f32.vlgmr.msra.gmra.mrb[0].mxu1 %vm106_vm0, %v88_v15  ;;  %3779 = vmatpush3.bf16.msra.mxu0 %v4383_v16 }
  0x44   :  { %3780 = vmatprep.subr.bf16.mxu0 %v4211_v17  ;;  %3506 = vmatprep.mubr.msk.f32.mxu0 %vm4212_vm1, %v4213_v21 }
  0x45   :  { %3785 = vmatpush3.bf16.msra.mxu1 %v4383_v16  ;;  %3517 = vmatprep.mubr.msk.f32.mxu1 %vm4212_vm1, %v4213_v21 }
  0x46   :  { %3786 = vmatprep.subr.bf16.mxu1 %v4211_v17 }
  0x47   :  { %3782 = vmatpush3.bf16.msra.mxu0 %v4396_v20 }
  0x48   :  { %3789 = vmatprep.subr.bf16.mxu0 %v4211_v17 }
  0x49   :  { %3788 = vmatpush3.bf16.msra.mxu1 %v4396_v20 }
  0x4a   :  { %3507 = vmatmul.mubr.f32.vlgmr.msra.gmra.mrb[2].mxu0 %v4213_v21  ;;  %3795 = vmatprep.subr.bf16.mxu1 %v4211_v17 }
  0x4b   :  { %3791 = vmatpush3.bf16.msra.mxu0 %v4383_v16  ;;  %3528 = vmatprep.mubr.msk.f32.mxu0 %vm4212_vm1, %v4213_v21 }
  0x4c   :  { %3792 = vmatprep.subr.bf16.mxu0 %v4211_v17 }
  0x4f   :  { %3794 = vmatpush3.bf16.msra.mxu0 %v4396_v20 }
  0x50   :  { %3801 = vmatprep.subr.bf16.mxu0 %v4211_v17 }
 0x115   :  { %v3486_v23 = vpop.f32.mrb[0].mxu0 }
 0x116   :  { %v185_v24 = vadd.f32 %v3486_v23, %v3272_v22  ;;  %v3497_v25 = vpop.f32.mrb[0].mxu1  ;;  %v179_v26 = vpop.f32.mrb[1].mxu0 }
 0x117   :  { %v266_v27 = vrot.slane %v3497_v25, 7  ;;  %v570_v28 = vrot.slane %v3497_v25, 3  ;;  %v727_v29 = vrot.slane %v3497_v25, 1  ;;  %v180_v30 = vadd.f32 %v3272_v22, %v179_v26  ;;  %v254_v31 = vpop.f32.mrb[1].mxu1 }
 0x118   :  { %v412_v32 = vrot.slane %v254_v31, 5  ;;  %v569_v33 = vrot.slane %v254_v31, 3  ;;  %v726_v34 = vrot.slane %v254_v31, 1  ;;  %v265_v35 = vrot.slane %v254_v31, 7 }
 0x119   :  { %v4419_v36 = vadd.f32 %v266_v27, %v185_v24  ;;  %v413_v37 = vrot.slane %v3497_v25, 5  ;;  %v4421_v38 = vadd.f32 %v570_v28, %v185_v24  ;;  %v4423_v39 = vadd.f32 %v727_v29, %v185_v24 }
 0x11a   :  { %v4425_v40 = vadd.f32 %v265_v35, %v180_v30  ;;  %v4427_v41 = vadd.f32 %v412_v32, %v180_v30  ;;  %v4429_v42 = vadd.f32 %v569_v33, %v180_v30  ;;  %v4431_v43 = vadd.f32 %v726_v34, %v180_v30 }
 0x11b   :  { %v4433_v44 = vadd.f32 %v413_v37, %v185_v24 }
 0x11d   :  { %v340_v45 = vpop.f32.mrb[2].mxu0 }
 0x11e   :  { %v345_v46 = vrot.slane %v340_v45, 1  ;;  %v3508_v47 = vpop.f32.mrb[3].mxu0  ;;  %v348_v49 = vadd.f32 %v340_v45, %v4425_v40 }
 0x120   :  { %v349_v48 = vadd.f32 %v345_v46, %v4419_v36  ;;  %v3277_v53 = vmul.f32 -1.442695, %v348_v49 }
 0x122   :  { %3968 = vtanh.f32 %v349_v48  ;;  %v3278_v52 = vmul.f32 -1.442695, %v349_v48 }
 0x123   :  { %3970 = vtanh.f32 %v348_v49 }
 0x124   :  { %3972 = vpow2.f32 %v3278_v52 }
 0x125   :  { %3974 = vpow2.f32 %v3277_v53 }
 0x12c   :  { %v3969_v50 = vpop.eup %3968 }
 0x12d   :  { %370 = vrot.lane.b32.xlu0 %v3969_v50, %s4214_s4  ;;  %v3971_v51 = vpop.eup %3970 }
 0x12e   :  { %v3973_v54 = vpop.eup %3972 }
 0x12f   :  { %v357_v55 = vadd.f32 1.0, %v3973_v54  ;;  %v3975_v56 = vpop.eup %3974 }
 0x130   :  { %v356_v57 = vadd.f32 1.0, %v3975_v56 }
 0x131   :  { %368 = vrot.lane.b32.xlu0 %v3971_v51, %s4214_s4  ;;  %3976 = vrcp.f32 %v357_v55 }
 0x132   :  { %3978 = vrcp.f32 %v356_v57 }
 0x13b   :  { %v3977_v58 = vpop.eup %3976 }
 0x13c   :  { %v3979_v61 = vpop.eup %3978  ;;  %v365_v0 = vmul.f32 0.0, %v3977_v58 }
 0x13d   :  { %v364_v3 = vmul.f32 0.0, %v3979_v61 }
 0x19f   :  { %v371_v59 = vpop.permute.xlu0 %370 }
 0x1a0   :  { %v375_v60 = vmul.f32 %v3977_v58, %v371_v59 }
 0x1a2   :  { %380 = vrot.lane.b32.xlu1 %v375_v60, %s4215_s23 }
 0x1a3   :  { %v369_v62 = vpop.permute.xlu0 %368 }
 0x1a4   :  { %v374_v63 = vmul.f32 %v3979_v61, %v369_v62 }
 0x1a6   :  { %378 = vrot.lane.b32.xlu1 %v374_v63, %s4215_s23 }
 0x214   :  { %v381_v1 = vpop.permute.xlu1 %380 }
 0x215   :  { %v385_v2 = vadd.f32 %v381_v1, %v365_v0 }
 0x217   :  { %3980 = vtanh.f32 %v385_v2  ;;  %v518_v46 = vrot.slane %v385_v2, 7 }
 0x218   :  { %v379_v4 = vpop.permute.xlu1 %378 }
 0x219   :  { %v384_v5 = vadd.f32 %v379_v4, %v364_v3 }
 0x21b   :  { %3982 = vtanh.f32 %v384_v5  ;;  %v517_v48 = vrot.slane %v384_v5, 7 }
 0x221   :  { %v3981_v6 = vpop.eup %3980 }
 0x222   :  { %392 = vrot.lane.b32.xlu0 %v3981_v6, %s4214_s4 }
 0x225   :  { %v3983_v7 = vpop.eup %3982 }
 0x226   :  { %390 = vrot.lane.b32.xlu1 %v3983_v7, %s4214_s4 }
 0x294   :  { %v393_v8 = vpop.permute.xlu0 %392 }
 0x295   :  { %v4443_v9 = vmul.f32 %v3977_v58, %v393_v8 }
 0x297   :  { %v418_v11 = vrot.slane %v4443_v9, 7 }
 0x298   :  { %v391_v10 = vpop.permute.xlu1 %390 }
 0x299   :  { %v4446_v12 = vmul.f32 %v3979_v61, %v391_v10 }
 0x29b   :  { %v420_v13 = vsel %vm419_vm2, %v418_v11, %v4446_v12 }
 0x29c   :  { %421 = vrot.lane.b32.xlu0 %v420_v13, %s4215_s23 }
 0x30e   :  { %v422_v14 = vpop.permute.xlu0 %421 }
 0x30f   :  { %3518 = vmatmul.mubr.msk.f32.vlgmr.msra.gmra.mrb[2].mxu1 %vm106_vm0, %v422_v14 }
 0x310   :  { %3797 = vmatpush3.bf16.msra.mxu1 %v4383_v16  ;;  %3539 = vmatprep.mubr.msk.f32.mxu1 %vm4212_vm1, %v4213_v21 }
 0x311   :  { %3798 = vmatprep.subr.bf16.mxu1 %v4211_v17 }
 0x314   :  { %3800 = vmatpush3.bf16.msra.mxu1 %v4396_v20 }
 0x315   :  { %3807 = vmatprep.subr.bf16.mxu1 %v4211_v17 }
 0x3e2   :  { %v491_v15 = vpop.f32.mrb[2].mxu1 }
 0x3e3   :  { %v496_v18 = vrot.slane %v491_v15, 7  ;;  %v500_v19 = vadd.f32 %v491_v15, %v4433_v44  ;;  %v3519_v22 = vpop.f32.mrb[3].mxu1 }
 0x3e5   :  { %v499_v23 = vadd.f32 %v496_v18, %v4427_v41  ;;  %3984 = vtanh.f32 %v500_v19  ;;  %v3281_v26 = vmul.f32 -1.442695, %v500_v19 }
 0x3e7   :  { %3986 = vtanh.f32 %v499_v23  ;;  %v3280_v27 = vmul.f32 -1.442695, %v499_v23 }
 0x3e8   :  { %3988 = vpow2.f32 %v3281_v26 }
 0x3e9   :  { %3990 = vpow2.f32 %v3280_v27 }
 0x3ef   :  { %v3985_v24 = vpop.eup %3984 }
 0x3f0   :  { %527 = vrot.lane.b32.xlu0 %v3985_v24, %s4214_s4 }
 0x3f1   :  { %v3987_v25 = vpop.eup %3986 }
 0x3f2   :  { %525 = vrot.lane.b32.xlu1 %v3987_v25, %s4214_s4  ;;  %v3989_v28 = vpop.eup %3988 }
 0x3f3   :  { %v3991_v29 = vpop.eup %3990  ;;  %v508_v30 = vadd.f32 1.0, %v3989_v28 }
 0x3f4   :  { %v507_v31 = vadd.f32 1.0, %v3991_v29 }
 0x3f5   :  { %3992 = vrcp.f32 %v508_v30 }
 0x3f6   :  { %3994 = vrcp.f32 %v507_v31 }
 0x3ff   :  { %v3993_v32 = vpop.eup %3992 }
 0x400   :  { %v3995_v35 = vpop.eup %3994  ;;  %v522_v47 = vmul.f32 %v3993_v32, %v518_v46 }
 0x401   :  { %v521_v51 = vmul.f32 %v3995_v35, %v517_v48 }
 0x462   :  { %v528_v33 = vpop.permute.xlu0 %527 }
 0x463   :  { %v532_v34 = vmul.f32 %v3993_v32, %v528_v33 }
 0x464   :  { %v526_v37 = vpop.permute.xlu1 %525 }
 0x465   :  { %537 = vrot.lane.b32.xlu0 %v532_v34, %s4215_s23  ;;  %v531_v45 = vmul.f32 %v3995_v35, %v526_v37 }
 0x467   :  { %535 = vrot.lane.b32.xlu1 %v531_v45, %s4215_s23 }
 0x4d7   :  { %v538_v49 = vpop.permute.xlu0 %537 }
 0x4d8   :  { %v542_v50 = vadd.f32 %v538_v49, %v522_v47 }
 0x4d9   :  { %v536_v52 = vpop.permute.xlu1 %535 }
 0x4da   :  { %3996 = vtanh.f32 %v542_v50  ;;  %v541_v53 = vadd.f32 %v536_v52, %v521_v51  ;;  %v675_v26 = vrot.slane %v542_v50, 7 }
 0x4dc   :  { %3998 = vtanh.f32 %v541_v53  ;;  %v674_v25 = vrot.slane %v541_v53, 7 }
 0x4e4   :  { %v3997_v54 = vpop.eup %3996 }
 0x4e5   :  { %549 = vrot.lane.b32.xlu0 %v3997_v54, %s4214_s4 }
 0x4e6   :  { %v3999_v55 = vpop.eup %3998 }
 0x4e7   :  { %547 = vrot.lane.b32.xlu1 %v3999_v55, %s4214_s4 }
 0x557   :  { %v550_v56 = vpop.permute.xlu0 %549 }
 0x558   :  { %v4468_v59 = vmul.f32 %v3993_v32, %v550_v56 }
 0x559   :  { %v548_v57 = vpop.permute.xlu1 %547 }
 0x55a   :  { %v4466_v58 = vmul.f32 %v3995_v35, %v548_v57 }
 0x55c   :  { %v575_v60 = vrot.slane %v4466_v58, 1 }
 0x55e   :  { %v576_v61 = vsel %vm419_vm2, %v4468_v59, %v575_v60 }
 0x55f   :  { %577 = vrot.lane.b32.xlu1 %v576_v61, %s4215_s23 }
 0x5d1   :  { %v578_v62 = vpop.permute.xlu1 %577 }
 0x5d2   :  { %3529 = vmatmul.mubr.msk.f32.vlgmr.msra.gmra.mrb[4].mxu0 %vm106_vm0, %v578_v62 }
 0x5d3   :  { %3803 = vmatpush3.bf16.msra.mxu0 %v4383_v16  ;;  %3550 = vmatprep.mubr.msk.f32.mxu0 %vm4212_vm1, %v4213_v21 }
 0x5d4   :  { %3804 = vmatprep.subr.bf16.mxu0 %v4211_v17 }
 0x5d7   :  { %3806 = vmatpush3.bf16.msra.mxu0 %v4396_v20 }
 0x5d8   :  { %3813 = vmatprep.subr.bf16.mxu0 %v4211_v17 }
 0x6a5   :  { %v647_v63 = vpop.f32.mrb[4].mxu0 }
 0x6a6   :  { %v652_v0 = vrot.slane %v647_v63, 6  ;;  %v653_v1 = vrot.slane %v647_v63, 7  ;;  %v3530_v2 = vpop.f32.mrb[5].mxu0 }
 0x6a8   :  { %v656_v3 = vadd.f32 %v652_v0, %v4429_v42  ;;  %v657_v4 = vadd.f32 %v653_v1, %v4421_v38 }
 0x6aa   :  { %4000 = vtanh.f32 %v656_v3  ;;  %v3283_v7 = vmul.f32 -1.442695, %v656_v3  ;;  %v3284_v8 = vmul.f32 -1.442695, %v657_v4 }
 0x6ab   :  { %4002 = vtanh.f32 %v657_v4 }
 0x6ac   :  { %4004 = vpow2.f32 %v3283_v7 }
 0x6ad   :  { %4006 = vpow2.f32 %v3284_v8 }
 0x6b4   :  { %v4001_v5 = vpop.eup %4000 }
 0x6b5   :  { %v4003_v6 = vpop.eup %4002  ;;  %682 = vrot.lane.b32.xlu0 %v4001_v5, %s4214_s4 }
 0x6b6   :  { %684 = vrot.lane.b32.xlu1 %v4003_v6, %s4214_s4  ;;  %v4005_v10 = vpop.eup %4004 }
 0x6b7   :  { %v4007_v11 = vpop.eup %4006  ;;  %v664_v13 = vadd.f32 1.0, %v4005_v10 }
 0x6b8   :  { %v665_v14 = vadd.f32 1.0, %v4007_v11 }
 0x6b9   :  { %4008 = vrcp.f32 %v664_v13 }
 0x6ba   :  { %4010 = vrcp.f32 %v665_v14 }
 0x6c3   :  { %v4009_v15 = vpop.eup %4008 }
 0x6c4   :  { %v4011_v19 = vpop.eup %4010  ;;  %v678_v27 = vmul.f32 %v4009_v15, %v674_v25 }
 0x6c5   :  { %v679_v28 = vmul.f32 %v4011_v19, %v675_v26 }
 0x727   :  { %v683_v18 = vpop.permute.xlu0 %682 }
 0x728   :  { %v685_v22 = vpop.permute.xlu1 %684  ;;  %v688_v23 = vmul.f32 %v4009_v15, %v683_v18 }
 0x729   :  { %v689_v24 = vmul.f32 %v4011_v19, %v685_v22 }
 0x72a   :  { %692 = vrot.lane.b32.xlu0 %v688_v23, %s4215_s23 }
 0x72b   :  { %694 = vrot.lane.b32.xlu1 %v689_v24, %s4215_s23 }
 0x79c   :  { %v693_v29 = vpop.permute.xlu0 %692 }
 0x79d   :  { %v695_v30 = vpop.permute.xlu1 %694  ;;  %v698_v31 = vadd.f32 %v693_v29, %v678_v27 }
 0x79e   :  { %v699_v32 = vadd.f32 %v695_v30, %v679_v28 }
 0x79f   :  { %4012 = vtanh.f32 %v698_v31  ;;  %v832_v10 = vrot.slane %v698_v31, 7 }
 0x7a0   :  { %4014 = vtanh.f32 %v699_v32  ;;  %v833_v11 = vrot.slane %v699_v32, 7 }
 0x7a9   :  { %v4013_v33 = vpop.eup %4012 }
 0x7aa   :  { %v4015_v34 = vpop.eup %4014  ;;  %704 = vrot.lane.b32.xlu0 %v4013_v33, %s4214_s4 }
 0x7ab   :  { %706 = vrot.lane.b32.xlu1 %v4015_v34, %s4214_s4 }
 0x81c   :  { %v705_v35 = vpop.permute.xlu0 %704 }
 0x81d   :  { %v707_v37 = vpop.permute.xlu1 %706  ;;  %v4489_v45 = vmul.f32 %v4009_v15, %v705_v35 }
 0x81e   :  { %v4491_v46 = vmul.f32 %v4011_v19, %v707_v37 }
 0x81f   :  { %v732_v47 = vrot.slane %v4489_v45, 2 }
 0x820   :  { %v733_v48 = vrot.slane %v4491_v46, 1 }
 0x822   :  { %v734_v49 = vsel %vm419_vm2, %v733_v48, %v732_v47 }
 0x823   :  { %735 = vrot.lane.b32.xlu0 %v734_v49, %s4215_s23 }
 0x895   :  { %v736_v50 = vpop.permute.xlu0 %735 }
 0x896   :  { %3540 = vmatmul.mubr.msk.f32.vlgmr.msra.gmra.mrb[4].mxu1 %vm106_vm0, %v736_v50 }
 0x897   :  { %3809 = vmatpush3.bf16.msra.mxu1 %v4383_v16  ;;  %3561 = vmatprep.mubr.msk.f32.mxu1 %vm4212_vm1, %v4213_v21 }
 0x898   :  { %3810 = vmatprep.subr.bf16.mxu1 %v4211_v17 }
 0x89b   :  { %3812 = vmatpush3.bf16.msra.mxu1 %v4396_v20 }
 0x89c   :  { %3819 = vmatprep.subr.bf16.mxu1 %v4211_v17 }
 0x969   :  { %v805_v51 = vpop.f32.mrb[4].mxu1 }
 0x96a   :  { %v810_v52 = vrot.slane %v805_v51, 5  ;;  %v811_v53 = vrot.slane %v805_v51, 6  ;;  %v3541_v54 = vpop.f32.mrb[5].mxu1 }
 0x96c   :  { %v814_v55 = vadd.f32 %v810_v52, %v4431_v43  ;;  %v815_v56 = vadd.f32 %v811_v53, %v4423_v39 }
 0x96e   :  { %4016 = vtanh.f32 %v814_v55  ;;  %v3286_v61 = vmul.f32 -1.442695, %v814_v55  ;;  %v3287_v62 = vmul.f32 -1.442695, %v815_v56 }
 0x96f   :  { %4018 = vtanh.f32 %v815_v56 }
 0x970   :  { %4020 = vpow2.f32 %v3286_v61 }
 0x971   :  { %4022 = vpow2.f32 %v3287_v62 }
 0x978   :  { %v4017_v57 = vpop.eup %4016 }
 0x979   :  { %v4019_v60 = vpop.eup %4018  ;;  %840 = vrot.lane.b32.xlu1 %v4017_v57, %s4214_s4 }
 0x97a   :  { %842 = vrot.lane.b32.xlu0 %v4019_v60, %s4214_s4  ;;  %v4021_v63 = vpop.eup %4020 }
 0x97b   :  { %v4023_v0 = vpop.eup %4022  ;;  %v822_v1 = vadd.f32 1.0, %v4021_v63 }
 0x97c   :  { %v823_v2 = vadd.f32 1.0, %v4023_v0 }
 0x97d   :  { %4024 = vrcp.f32 %v822_v1 }
 0x97e   :  { %4026 = vrcp.f32 %v823_v2 }
 0x987   :  { %v4025_v3 = vpop.eup %4024 }
 0x988   :  { %v4027_v5 = vpop.eup %4026  ;;  %v836_v13 = vmul.f32 %v4025_v3, %v832_v10 }
 0x989   :  { %v837_v14 = vmul.f32 %v4027_v5, %v833_v11 }
 0x9eb   :  { %v841_v4 = vpop.permute.xlu1 %840 }
 0x9ec   :  { %v843_v6 = vpop.permute.xlu0 %842  ;;  %v846_v7 = vmul.f32 %v4025_v3, %v841_v4 }
 0x9ed   :  { %v847_v8 = vmul.f32 %v4027_v5, %v843_v6 }
 0x9ee   :  { %850 = vrot.lane.b32.xlu1 %v846_v7, %s4215_s23 }
 0x9ef   :  { %852 = vrot.lane.b32.xlu0 %v847_v8, %s4215_s23 }
 0xa60   :  { %v851_v15 = vpop.permute.xlu1 %850 }
 0xa61   :  { %v853_v18 = vpop.permute.xlu0 %852  ;;  %v856_v19 = vadd.f32 %v851_v15, %v836_v13 }
 0xa62   :  { %v857_v22 = vadd.f32 %v853_v18, %v837_v14 }
 0xa63   :  { %4028 = vtanh.f32 %v856_v19  ;;  %v984_v63 = vrot.slane %v856_v19, 7 }
 0xa64   :  { %4030 = vtanh.f32 %v857_v22  ;;  %v985_v0 = vrot.slane %v857_v22, 7 }
 0xa6d   :  { %v4029_v23 = vpop.eup %4028 }
 0xa6e   :  { %v4031_v24 = vpop.eup %4030  ;;  %862 = vrot.lane.b32.xlu1 %v4029_v23, %s4214_s4 }
 0xa6f   :  { %864 = vrot.lane.b32.xlu0 %v4031_v24, %s4214_s4 }
 0xae0   :  { %v863_v25 = vpop.permute.xlu1 %862 }
 0xae1   :  { %v865_v26 = vpop.permute.xlu0 %864  ;;  %v4512_v27 = vmul.f32 %v4025_v3, %v863_v25 }
 0xae2   :  { %v4514_v28 = vmul.f32 %v4027_v5, %v865_v26 }
 0xae3   :  { %v884_v29 = vrot.slane %v4512_v27, 3 }
 0xae4   :  { %v885_v30 = vrot.slane %v4514_v28, 2 }
 0xae6   :  { %v886_v31 = vsel %vm419_vm2, %v885_v30, %v884_v29 }
 0xae7   :  { %887 = vrot.lane.b32.xlu1 %v886_v31, %s4215_s23 }
 0xb59   :  { %v888_v32 = vpop.permute.xlu1 %887 }
 0xb5a   :  { %3551 = vmatmul.mubr.msk.f32.vlgmr.msra.gmra.mrb[6].mxu0 %vm106_vm0, %v888_v32 }
 0xb5b   :  { %3815 = vmatpush3.bf16.msra.mxu0 %v4383_v16  ;;  %3572 = vmatprep.mubr.msk.f32.mxu0 %vm4212_vm1, %v4213_v21 }
 0xb5c   :  { %3816 = vmatprep.subr.bf16.mxu0 %v4211_v17 }
 0xb5f   :  { %3818 = vmatpush3.bf16.msra.mxu0 %v4396_v20 }
 0xc2d   :  { %v957_v33 = vpop.f32.mrb[6].mxu0 }
 0xc2e   :  { %v962_v34 = vrot.slane %v957_v33, 4  ;;  %v963_v35 = vrot.slane %v957_v33, 5  ;;  %v3552_v37 = vpop.f32.mrb[7].mxu0 }
 0xc30   :  { %v966_v47 = vadd.f32 %v962_v34, %v4425_v40  ;;  %v967_v48 = vadd.f32 %v963_v35, %v4419_v36 }
 0xc32   :  { %4032 = vtanh.f32 %v966_v47  ;;  %v3289_v51 = vmul.f32 -1.442695, %v966_v47  ;;  %v3290_v52 = vmul.f32 -1.442695, %v967_v48 }
 0xc33   :  { %4034 = vtanh.f32 %v967_v48 }
 0xc34   :  { %4036 = vpow2.f32 %v3289_v51 }
 0xc35   :  { %4038 = vpow2.f32 %v3290_v52 }
 0xc3c   :  { %v4033_v49 = vpop.eup %4032 }
 0xc3d   :  { %v4035_v50 = vpop.eup %4034  ;;  %992 = vrot.lane.b32.xlu0 %v4033_v49, %s4214_s4 }
 0xc3e   :  { %994 = vrot.lane.b32.xlu1 %v4035_v50, %s4214_s4  ;;  %v4037_v53 = vpop.eup %4036 }
 0xc3f   :  { %v4039_v54 = vpop.eup %4038  ;;  %v974_v55 = vadd.f32 1.0, %v4037_v53 }
 0xc40   :  { %v975_v56 = vadd.f32 1.0, %v4039_v54 }
 0xc41   :  { %4040 = vrcp.f32 %v974_v55 }
 0xc42   :  { %4042 = vrcp.f32 %v975_v56 }
 0xc4b   :  { %v4041_v40 = vpop.eup %4040 }
 0xc4c   :  { %v4043_v57 = vpop.eup %4042  ;;  %v988_v1 = vmul.f32 %v4041_v40, %v984_v63 }
 0xc4d   :  { %v989_v2 = vmul.f32 %v4043_v57, %v985_v0 }
 0xcaf   :  { %v993_v36 = vpop.permute.xlu0 %992 }
 0xcb0   :  { %v995_v60 = vpop.permute.xlu1 %994  ;;  %v998_v61 = vmul.f32 %v4041_v40, %v993_v36 }
 0xcb1   :  { %v999_v62 = vmul.f32 %v4043_v57, %v995_v60 }
 0xcb2   :  { %1002 = vrot.lane.b32.xlu0 %v998_v61, %s4215_s23 }
 0xcb3   :  { %1004 = vrot.lane.b32.xlu1 %v999_v62, %s4215_s23 }
 0xd24   :  { %v1003_v3 = vpop.permute.xlu0 %1002 }
 0xd25   :  { %v1005_v4 = vpop.permute.xlu1 %1004  ;;  %v1008_v5 = vadd.f32 %v1003_v3, %v988_v1 }
 0xd26   :  { %v1009_v6 = vadd.f32 %v1005_v4, %v989_v2 }
 0xd27   :  { %4044 = vtanh.f32 %v1008_v5  ;;  %v1136_v50 = vrot.slane %v1008_v5, 7 }
 0xd28   :  { %4046 = vtanh.f32 %v1009_v6  ;;  %v1137_v51 = vrot.slane %v1009_v6, 7 }
 0xd31   :  { %v4045_v7 = vpop.eup %4044 }
 0xd32   :  { %v4047_v8 = vpop.eup %4046  ;;  %1014 = vrot.lane.b32.xlu0 %v4045_v7, %s4214_s4 }
 0xd33   :  { %1016 = vrot.lane.b32.xlu1 %v4047_v8, %s4214_s4 }
 0xda4   :  { %v1015_v10 = vpop.permute.xlu0 %1014 }
 0xda5   :  { %v1017_v11 = vpop.permute.xlu1 %1016  ;;  %v4534_v13 = vmul.f32 %v4041_v40, %v1015_v10 }
 0xda6   :  { %v4536_v14 = vmul.f32 %v4043_v57, %v1017_v11 }
 0xda7   :  { %v1036_v15 = vrot.slane %v4534_v13, 4 }
 0xda8   :  { %v1037_v18 = vrot.slane %v4536_v14, 3 }
 0xdaa   :  { %v1038_v19 = vsel %vm419_vm2, %v1037_v18, %v1036_v15 }
 0xdab   :  { %1039 = vrot.lane.b32.xlu0 %v1038_v19, %s4215_s23 }
 0xe1d   :  { %v1040_v22 = vpop.permute.xlu0 %1039 }
 0xe1e   :  { %3562 = vmatmul.mubr.msk.f32.vlgmr.msra.gmra.mrb[6].mxu1 %vm106_vm0, %v1040_v22 }
 0xe1f   :  { %3821 = vmatpush3.bf16.msra.mxu1 %v4383_v16  ;;  %3583 = vmatprep.mubr.msk.f32.mxu1 %vm4212_vm1, %v4213_v21 }
 0xe20   :  { %3822 = vmatprep.subr.bf16.mxu1 %v4211_v17 }
 0xe23   :  { %3824 = vmatpush3.bf16.msra.mxu1 %v4396_v20 }
 0xef1   :  { %v1109_v23 = vpop.f32.mrb[6].mxu1 }
 0xef2   :  { %v1114_v24 = vrot.slane %v1109_v23, 3  ;;  %v1115_v25 = vrot.slane %v1109_v23, 4  ;;  %v3563_v26 = vpop.f32.mrb[7].mxu1 }
 0xef4   :  { %v1118_v29 = vadd.f32 %v1114_v24, %v4427_v41  ;;  %v1119_v30 = vadd.f32 %v1115_v25, %v4433_v44 }
 0xef6   :  { %4048 = vtanh.f32 %v1118_v29  ;;  %v3292_v16 = vmul.f32 -1.442695, %v1118_v29  ;;  %v3293_v17 = vmul.f32 -1.442695, %v1119_v30 }
 0xef7   :  { %4050 = vtanh.f32 %v1119_v30 }
 0xef8   :  { %4052 = vpow2.f32 %v3292_v16 }
 0xef9   :  { %4054 = vpow2.f32 %v3293_v17 }
 0xf00   :  { %v4049_v31 = vpop.eup %4048 }
 0xf01   :  { %v4051_v32 = vpop.eup %4050  ;;  %1144 = vrot.lane.b32.xlu1 %v4049_v31, %s4214_s4 }
 0xf02   :  { %1146 = vrot.lane.b32.xlu0 %v4051_v32, %s4214_s4  ;;  %v4053_v20 = vpop.eup %4052 }
 0xf03   :  { %v4055_v33 = vpop.eup %4054  ;;  %v1126_v34 = vadd.f32 1.0, %v4053_v20 }
 0xf04   :  { %v1127_v35 = vadd.f32 1.0, %v4055_v33 }
 0xf05   :  { %4056 = vrcp.f32 %v1126_v34 }
 0xf06   :  { %4058 = vrcp.f32 %v1127_v35 }
 0xf0f   :  { %v4057_v41 = vpop.eup %4056 }
 0xf10   :  { %v4059_v37 = vpop.eup %4058  ;;  %v1140_v52 = vmul.f32 %v4057_v41, %v1136_v50 }
 0xf11   :  { %v1141_v53 = vmul.f32 %v4059_v37, %v1137_v51 }
 0xf73   :  { %v1145_v44 = vpop.permute.xlu1 %1144 }
 0xf74   :  { %v1147_v47 = vpop.permute.xlu0 %1146  ;;  %v1150_v48 = vmul.f32 %v4057_v41, %v1145_v44 }
 0xf75   :  { %v1151_v49 = vmul.f32 %v4059_v37, %v1147_v47 }
 0xf76   :  { %1154 = vrot.lane.b32.xlu1 %v1150_v48, %s4215_s23 }
 0xf77   :  { %1156 = vrot.lane.b32.xlu0 %v1151_v49, %s4215_s23 }
 0xfe8   :  { %v1155_v54 = vpop.permute.xlu1 %1154 }
 0xfe9   :  { %v1157_v55 = vpop.permute.xlu0 %1156  ;;  %v1160_v56 = vadd.f32 %v1155_v54, %v1140_v52 }
 0xfea   :  { %v1161_v40 = vadd.f32 %v1157_v55, %v1141_v53 }
 0xfeb   :  { %4060 = vtanh.f32 %v1160_v56  ;;  %v1288_v32 = vrot.slane %v1160_v56, 7 }
 0xfec   :  { %4062 = vtanh.f32 %v1161_v40  ;;  %v1289_v16 = vrot.slane %v1161_v40, 7 }
 0xff5   :  { %v4061_v36 = vpop.eup %4060 }
 0xff6   :  { %v4063_v57 = vpop.eup %4062  ;;  %1166 = vrot.lane.b32.xlu1 %v4061_v36, %s4214_s4 }
 0xff7   :  { %1168 = vrot.lane.b32.xlu0 %v4063_v57, %s4214_s4 }
0x1068   :  { %v1167_v60 = vpop.permute.xlu1 %1166 }
0x1069   :  { %v1169_v61 = vpop.permute.xlu0 %1168  ;;  %v4556_v62 = vmul.f32 %v4057_v41, %v1167_v60 }
0x106a   :  { %v4558_v63 = vmul.f32 %v4059_v37, %v1169_v61 }
0x106b   :  { %v1188_v0 = vrot.slane %v4556_v62, 5 }
0x106c   :  { %v1189_v1 = vrot.slane %v4558_v63, 4 }
0x106e   :  { %v1190_v2 = vsel %vm419_vm2, %v1189_v1, %v1188_v0 }
0x106f   :  { %1191 = vrot.lane.b32.xlu1 %v1190_v2, %s4215_s23 }
0x10e1   :  { %v1192_v3 = vpop.permute.xlu1 %1191 }
0x10e2   :  { %3573 = vmatmul.mubr.msk.f32.vlgmr.msra.gmra.mrb[8].mxu0 %vm106_vm0, %v1192_v3 }
0x11b5   :  { %v1261_v4 = vpop.f32.mrb[8].mxu0 }
0x11b6   :  { %v1266_v5 = vrot.slane %v1261_v4, 2  ;;  %v1267_v6 = vrot.slane %v1261_v4, 3  ;;  %v3574_v7 = vpop.f32.mrb[9].mxu0 }
0x11b8   :  { %v1270_v8 = vadd.f32 %v1266_v5, %v4429_v42  ;;  %v1271_v10 = vadd.f32 %v1267_v6, %v4421_v38 }
0x11ba   :  { %4064 = vtanh.f32 %v1270_v8  ;;  %v3295_v18 = vmul.f32 -1.442695, %v1270_v8  ;;  %v3296_v19 = vmul.f32 -1.442695, %v1271_v10 }
0x11bb   :  { %4066 = vtanh.f32 %v1271_v10 }
0x11bc   :  { %4068 = vpow2.f32 %v3295_v18 }
0x11bd   :  { %4070 = vpow2.f32 %v3296_v19 }
0x11c4   :  { %v4065_v11 = vpop.eup %4064 }
0x11c5   :  { %v4067_v15 = vpop.eup %4066  ;;  %1296 = vrot.lane.b32.xlu0 %v4065_v11, %s4214_s4 }
0x11c6   :  { %1298 = vrot.lane.b32.xlu1 %v4067_v15, %s4214_s4  ;;  %v4069_v22 = vpop.eup %4068 }
0x11c7   :  { %v4071_v23 = vpop.eup %4070  ;;  %v1278_v24 = vadd.f32 1.0, %v4069_v22 }
0x11c8   :  { %v1279_v25 = vadd.f32 1.0, %v4071_v23 }
0x11c9   :  { %4072 = vrcp.f32 %v1278_v24 }
0x11ca   :  { %4074 = vrcp.f32 %v1279_v25 }
0x11d3   :  { %v4073_v42 = vpop.eup %4072 }
0x11d4   :  { %v4075_v26 = vpop.eup %4074  ;;  %v1292_v17 = vmul.f32 %v4073_v42, %v1288_v32  ;;  %v1497_v32 = vld [vmem:[%s4951_s1 + $0x8] sm:$0xff] }
0x11d5   :  { %v1293_v20 = vmul.f32 %v4075_v26, %v1289_v16 }
0x1237   :  { %v1297_v38 = vpop.permute.xlu0 %1296 }
0x1238   :  { %v1299_v29 = vpop.permute.xlu1 %1298  ;;  %v1302_v30 = vmul.f32 %v4073_v42, %v1297_v38 }
0x1239   :  { %v1303_v31 = vmul.f32 %v4075_v26, %v1299_v29  ;;  %v1500_v29 = vld [vmem:[#allocation3 + $0x10] sm:$0xff] }
0x123a   :  { %1306 = vrot.lane.b32.xlu0 %v1302_v30, %s4215_s23  ;;  %v1503_v30 = vld [vmem:[#allocation3 + $0x28] sm:$0xff] }
0x123b   :  { %1308 = vrot.lane.b32.xlu1 %v1303_v31, %s4215_s23 }
0x12ac   :  { %v1307_v33 = vpop.permute.xlu0 %1306 }
0x12ad   :  { %v1309_v34 = vpop.permute.xlu1 %1308  ;;  %v1312_v35 = vadd.f32 %v1307_v33, %v1292_v17  ;;  %v1780_v17 = vld [vmem:[%s4959_s9 + $0x10] sm:$0xff] }
0x12ae   :  { %v1313_v41 = vadd.f32 %v1309_v34, %v1293_v20  ;;  %v1781_v20 = vld [vmem:[%s4959_s9 + $0x18] sm:$0xff] }
0x12af   :  { %4076 = vtanh.f32 %v1312_v35  ;;  %v1440_v15 = vrot.slane %v1312_v35, 7  ;;  %v3861_v33 = vpack.c.bf16 %v1781_v20, %v1780_v17  ;;  %v4217_v17 = vmov 0  }
0x12b0   :  { %4078 = vtanh.f32 %v1313_v41  ;;  %v1441_v18 = vrot.slane %v1313_v41, 7  ;;  %v4218_v20 = vmov 3  }
0x12b9   :  { %v4077_v44 = vpop.eup %4076 }
0x12ba   :  { %v4079_v37 = vpop.eup %4078  ;;  %1318 = vrot.lane.b32.xlu0 %v4077_v44, %s4214_s4  ;;  %v1597_v44 = vld [vmem:[%s4957_s7] sm:$0xff] }
0x12bb   :  { %1320 = vrot.lane.b32.xlu1 %v4079_v37, %s4214_s4  ;;  %v1598_v37 = vld [vmem:[%s4957_s7 + $0x8] sm:$0xff] }
0x132c   :  { %v1319_v47 = vpop.permute.xlu0 %1318 }
0x132d   :  { %v1321_v48 = vpop.permute.xlu1 %1320  ;;  %v4573_v49 = vmul.f32 %v4073_v42, %v1319_v47  ;;  %v1599_v47 = vld [vmem:[%s4957_s7 + $0x10] sm:$0xff] }
0x132e   :  { %v4575_v50 = vmul.f32 %v4075_v26, %v1321_v48  ;;  %v3841_v48 = vpack.c.bf16 %v1598_v37, %v1597_v44 }
0x132f   :  { %v1340_v51 = vrot.slane %v4573_v49, 6 }
0x1330   :  { %v1341_v52 = vrot.slane %v4575_v50, 5  ;;  %3842 = vmatprep.subr.bf16.mxu1 %v3841_v48 }
0x1332   :  { %v1342_v53 = vsel %vm419_vm2, %v1341_v52, %v1340_v51  ;;  %v1601_v52 = vld [vmem:[%s4957_s7 + $0x20] sm:$0xff]  ;;  %vm1334_vm2 = vcmask 129030  }
0x1333   :  { %1343 = vrot.lane.b32.xlu0 %v1342_v53, %s4215_s23  ;;  %v1602_v53 = vld [vmem:[%s4957_s7 + $0x28] sm:$0xff] }
0x13a5   :  { %v1344_v54 = vpop.permute.xlu0 %1343 }
0x13a6   :  { %3584 = vmatmul.mubr.msk.f32.vlgmr.msra.gmra.mrb[8].mxu1 %vm106_vm0, %v1344_v54 }
0x13a7   :  { %3844 = vmatpush3.bf16.msra.mxu1 %v3841_v48 }
0x1479   :  { %v1413_v55 = vpop.f32.mrb[8].mxu1 }
0x147a   :  { %v1418_v56 = vrot.slane %v1413_v55, 1  ;;  %v1419_v40 = vrot.slane %v1413_v55, 2  ;;  %v3585_v36 = vpop.f32.mrb[9].mxu1 }
0x147c   :  { %v1422_v57 = vadd.f32 %v1418_v56, %v4431_v43  ;;  %v1423_v60 = vadd.f32 %v1419_v40, %v4423_v39  ;;  %v3849_v56 = vpack.c.bf16 %v1602_v53, %v1601_v52 }
0x147e   :  { %4080 = vtanh.f32 %v1422_v57  ;;  %v3298_v1 = vmul.f32 -1.442695, %v1422_v57  ;;  %v3299_v2 = vmul.f32 -1.442695, %v1423_v60  ;;  %v1603_v57 = vld [vmem:[%s4957_s7 + $0x30] sm:$0xff] }
0x147f   :  { %4082 = vtanh.f32 %v1423_v60  ;;  %v1604_v60 = vld [vmem:[%s4957_s7 + $0x38] sm:$0xff] }
0x1480   :  { %4084 = vpow2.f32 %v3298_v1 }
0x1481   :  { %4086 = vpow2.f32 %v3299_v2  ;;  %v1863_v2 = vld [vmem:[%s4960_s10] sm:$0xff] }
0x1488   :  { %v4081_v61 = vpop.eup %4080 }
0x1489   :  { %v4083_v0 = vpop.eup %4082  ;;  %1448 = vrot.lane.b32.xlu1 %v4081_v61, %s4214_s4 }
0x148a   :  { %1450 = vrot.lane.b32.xlu0 %v4083_v0, %s4214_s4  ;;  %v4085_v3 = vpop.eup %4084  ;;  %v3853_v0 = vpack.c.bf16 %v1604_v60, %v1603_v57 }
0x148b   :  { %v4087_v4 = vpop.eup %4086  ;;  %v1430_v5 = vadd.f32 1.0, %v4085_v3  ;;  %v1864_v3 = vld [vmem:[%s4960_s10 + $0x8] sm:$0xff] }
0x148c   :  { %v1431_v6 = vadd.f32 1.0, %v4087_v4  ;;  %v3865_v4 = vpack.c.bf16 %v1864_v3, %v1863_v2 }
0x148d   :  { %4088 = vrcp.f32 %v1430_v5 }
0x148e   :  { %4090 = vrcp.f32 %v1431_v6 }
0x1497   :  { %v4586_v43 = vpop.eup %4088 }
0x1498   :  { %v4588_v7 = vpop.eup %4090  ;;  %v1444_v19 = vmul.f32 %v4586_v43, %v1440_v15 }
0x1499   :  { %v1445_v22 = vmul.f32 %v4588_v7, %v1441_v18 }
0x14fb   :  { %v1449_v39 = vpop.permute.xlu1 %1448 }
0x14fc   :  { %v1451_v8 = vpop.permute.xlu0 %1450  ;;  %v1454_v10 = vmul.f32 %v4586_v43, %v1449_v39 }
0x14fd   :  { %v1455_v11 = vmul.f32 %v4588_v7, %v1451_v8 }
0x14fe   :  { %1458 = vrot.lane.b32.xlu1 %v1454_v10, %s4215_s23 }
0x14ff   :  { %1460 = vrot.lane.b32.xlu0 %v1455_v11, %s4215_s23 }
0x1570   :  { %v1459_v23 = vpop.permute.xlu1 %1458 }
0x1571   :  { %v1461_v24 = vpop.permute.xlu0 %1460  ;;  %v1464_v25 = vadd.f32 %v1459_v23, %v1444_v19  ;;  %v3300_v23 = vld [vmem:[#allocation5] ss:$0 sm:$0xff] }
0x1572   :  { %v1465_v42 = vadd.f32 %v1461_v24, %v1445_v22 }
0x1573   :  { %4092 = vtanh.f32 %v1464_v25 }
0x1574   :  { %4094 = vtanh.f32 %v1465_v42 }
0x157d   :  { %v4093_v38 = vpop.eup %4092 }
0x157e   :  { %v4095_v26 = vpop.eup %4094  ;;  %1470 = vrot.lane.b32.xlu1 %v4093_v38, %s4214_s4 }
0x157f   :  { %1472 = vrot.lane.b32.xlu0 %v4095_v26, %s4214_s4  ;;  %v1865_v26 = vld [vmem:[%s4960_s10 + $0x10] sm:$0xff] }
0x1582   :  { %400 = vrot.lane.b32.xlu1 %v4446_v12, %s4215_s23  ;;  %v1498_v12 = vld [vmem:[#allocation3] sm:$0xff] }
0x1583   :  { %557 = vrot.lane.b32.xlu0 %v4466_v58, %s4215_s23  ;;  %v1499_v58 = vld [vmem:[#allocation3 + $0x8] sm:$0xff] }
0x1586   :  { %714 = vrot.lane.b32.xlu1 %v4489_v45, %s4215_s23  ;;  %v3825_v45 = vpack.c.bf16 %v1499_v58, %v1498_v12  ;;  %v1866_v12 = vld [vmem:[%s4960_s10 + $0x18] sm:$0xff] }
0x1587   :  { %872 = vrot.lane.b32.xlu0 %v4512_v27, %s4215_s23  ;;  %v1501_v27 = vld [vmem:[#allocation3 + $0x18] sm:$0xff] }
0x1588   :  { %3826 = vmatprep.subr.bf16.mxu0 %v3825_v45 }
0x1589   :  { %3828 = vmatpush3.bf16.msra.mxu0 %v3825_v45  ;;  %v3869_v45 = vpack.c.bf16 %v1866_v12, %v1865_v26 }
0x158a   :  { %402 = vrot.lane.b32.xlu1 %v4443_v9, %s4215_s23  ;;  %v3829_v9 = vpack.c.bf16 %v1501_v27, %v1500_v29  ;;  %v1867_v27 = vld [vmem:[%s4960_s10 + $0x20] sm:$0xff] }
0x158b   :  { %559 = vrot.lane.b32.xlu0 %v4468_v59, %s4215_s23  ;;  %v1502_v59 = vld [vmem:[#allocation3 + $0x20] sm:$0xff] }
0x158c   :  { %3830 = vmatprep.subr.bf16.mxu0 %v3829_v9 }
0x158d   :  { %3832 = vmatpush3.bf16.msra.mxu0 %v3829_v9  ;;  %v1868_v9 = vld [vmem:[%s4960_s10 + $0x28] sm:$0xff] }
0x158e   :  { %716 = vrot.lane.b32.xlu1 %v4491_v46, %s4215_s23  ;;  %v1496_v46 = vld [vmem:[%s4951_s1] sm:$0xff] }
0x158f   :  { %874 = vrot.lane.b32.xlu0 %v4514_v28, %s4215_s23  ;;  %3602 = vmatprep.mubr.msk.f32.mxu0 %vm1513_vm3, %v1496_v46  ;;  %v3833_v28 = vpack.c.bf16 %v1503_v30, %v1502_v59  ;;  %v3873_v59 = vpack.c.bf16 %v1868_v9, %v1867_v27  ;;  %v1869_v30 = vld [vmem:[%s4960_s10 + $0x30] sm:$0xff]  ;;  %v1870_v46 = vld [vmem:[%s4960_s10 + $0x38] sm:$0xff] }
0x1591   :  { %3834 = vmatprep.subr.bf16.mxu0 %v3833_v28 }
0x1592   :  { %1024 = vrot.lane.b32.xlu1 %v4534_v13, %s4215_s23  ;;  %v1504_v13 = vld [vmem:[#allocation3 + $0x30] sm:$0xff]  ;;  %3836 = vmatpush3.bf16.msra.mxu0 %v3833_v28  ;;  %v3877_v28 = vpack.c.bf16 %v1870_v46, %v1869_v30 }
0x1593   :  { %1176 = vrot.lane.b32.xlu0 %v4556_v62, %s4215_s23  ;;  %v1505_v62 = vld [vmem:[#allocation3 + $0x38] sm:$0xff] }
0x1594   :  { %v3837_v31 = vpack.c.bf16 %v1505_v62, %v1504_v13  ;;  %v4216_v13 = vmov 2  }
0x1595   :  { %3957 = vset.pattern.permute.xlu1 %v4216_v13  ;;  %3960 = vset.pattern.permute.xlu0 %v4216_v13 }
0x1596   :  { %1328 = vrot.lane.b32.xlu1 %v4573_v49, %s4215_s23  ;;  %3838 = vmatprep.subr.bf16.mxu0 %v3837_v31  ;;  %v1600_v49 = vld [vmem:[%s4957_s7 + $0x18] sm:$0xff] }
0x1597   :  { %1178 = vrot.lane.b32.xlu0 %v4558_v63, %s4215_s23  ;;  %3840 = vmatpush3.bf16.msra.mxu0 %v3837_v31  ;;  %v1778_v63 = vld [vmem:[%s4959_s9] sm:$0xff]  ;;  %v3845_v51 = vpack.c.bf16 %v1600_v49, %v1599_v47 }
0x1599   :  { %3846 = vmatprep.subr.bf16.mxu1 %v3845_v51 }
0x159a   :  { %1026 = vrot.lane.b32.xlu1 %v4536_v14, %s4215_s23  ;;  %3603 = vmatmul.mubr.msk.f32.vlgmr.msra.gmra.mrb[10].mxu0 %vm1513_vm3, %v1497_v32  ;;  %v1779_v14 = vld [vmem:[%s4959_s9 + $0x8] sm:$0xff] }
0x159b   :  { %v3857_v16 = vpack.c.bf16 %v1779_v14, %v1778_v63  ;;  %3848 = vmatpush3.bf16.msra.mxu1 %v3845_v51 }
0x159c   :  { %3850 = vmatprep.subr.bf16.mxu1 %v3849_v56 }
0x159d   :  { %3858 = vmatprep.subr.bf16.mxu0 %v3857_v16 }
0x159e   :  { %1330 = vrot.lane.b32.xlu1 %v4575_v50, %s4215_s23  ;;  %3860 = vmatpush3.bf16.msra.mxu0 %v3857_v16 }
0x159f   :  { %3862 = vmatprep.subr.bf16.mxu0 %v3861_v33  ;;  %3852 = vmatpush3.bf16.msra.mxu1 %v3849_v56 }
0x15a0   :  { %3854 = vmatprep.subr.bf16.mxu1 %v3853_v0 }
0x15a2   :  { %3864 = vmatpush3.bf16.msra.mxu0 %v3861_v33  ;;  %v4219_v33 = vmov 1  }
0x15a3   :  { %3659 = vmatprep.subr.mxu0 %v4213_v21  ;;  %3856 = vmatpush3.bf16.msra.mxu1 %v3853_v0 }
0x15a4   :  { %3866 = vmatprep.subr.bf16.mxu1 %v3865_v4 }
0x15f0   :  { %v1471_v34 = vpop.permute.xlu1 %1470 }
0x15f1   :  { %v1473_v35 = vpop.permute.xlu0 %1472  ;;  %v1476_v41 = vmul.f32 %v4586_v43, %v1471_v34  ;;  %v1968_v34 = vlaneseq }
0x15f2   :  { %v1477_v54 = vmul.f32 %v4588_v7, %v1473_v35 }
0x15f3   :  { %1480 = vrot.lane.b32.xlu0 %v1476_v41, %s4215_s23  ;;  %v1969_v35 = vand.u32 127, %v1968_v34  ;;  %v4755_v41 = vshrl.u32 %v1968_v34, 7 }
0x15f4   :  { %v401_v50 = vpop.permute.xlu1 %400 }
0x15f5   :  { %v558_v55 = vpop.permute.xlu0 %557  ;;  %407 = vst.msk [vmem:[#allocation2] sm:$0x1] %vm406_vm4, %v401_v50  ;;  %v4758_v44 = vsub.s32 %v1969_v35, %v4755_v41 }
0x15f6   :  { %410 = vst.msk [vmem:[#allocation2 + $0x7] sm:$0x1] %vm409_vm5, %v401_v50  ;;  %v4764_v50 = vld [vmem:[%s4953_s3 + $0x8] sm:$0xff] }
0x15f7   :  { %564 = vst.msk [vmem:[#allocation2] sm:$0x2] %vm563_vm6, %v558_v55  ;;  %1482 = vrot.lane.b32.xlu0 %v1477_v54, %s4215_s23 }
0x15f8   :  { %567 = vst.msk [vmem:[#allocation2 + $0x5] sm:$0x2] %vm566_vm7, %v558_v55  ;;  %v715_v40 = vpop.permute.xlu1 %714 }
0x15f9   :  { %v873_v36 = vpop.permute.xlu0 %872  ;;  %721 = vst.msk [vmem:[#allocation2] sm:$0x4] %vm720_vm8, %v715_v40 }
0x15fa   :  { %724 = vst.msk [vmem:[#allocation2 + $0x3] sm:$0x4] %vm723_vm9, %v715_v40 }
0x15fb   :  { %879 = vst.msk [vmem:[#allocation2] sm:$0x8] %vm878_vm10, %v873_v36 }
0x15fc   :  { %882 = vst.msk [vmem:[#allocation2 + $0x1] sm:$0x8] %vm881_vm11, %v873_v36  ;;  %v403_v61 = vpop.permute.xlu1 %402 }
0x15fd   :  { %v560_v1 = vpop.permute.xlu0 %559  ;;  %408 = vst.msk [vmem:[#allocation2 + $0x8] sm:$0x1] %vm406_vm4, %v403_v61  ;;  %vm1337_vm4 = vcmask 260230  }
0x15fe   :  { %411 = vst.msk [vmem:[#allocation2 + $0xf] sm:$0x1] %vm409_vm5, %v403_v61  ;;  %vm1486_vm5 = vcmask 130055  }
0x15ff   :  { %565 = vst.msk [vmem:[#allocation2 + $0x8] sm:$0x2] %vm563_vm6, %v560_v1  ;;  %vm1489_vm6 = vcmask 261255  }
0x1600   :  { %568 = vst.msk [vmem:[#allocation2 + $0xd] sm:$0x2] %vm566_vm7, %v560_v1  ;;  %v717_v5 = vpop.permute.xlu1 %716  ;;  %vm2007_vm7 = vcmp.gt.f32.partialorder %v4764_v50, 0.0  ;;  %v4775_v1 = vld [vmem:[%s4953_s3] sm:$0xff]  ;;  %s4220_s3 = smov 96   ;;  %v1495_v50 = vld [vmem:[%s4952_s2 + $0x8] sm:$0xff] }
0x1601   :  { %v875_v6 = vpop.permute.xlu0 %874  ;;  %722 = vst.msk [vmem:[#allocation2 + $0x8] sm:$0x4] %vm720_vm8, %v717_v5  ;;  %vm2010_vm8 = vcmask 64512  }
0x1602   :  { %725 = vst.msk [vmem:[#allocation2 + $0xb] sm:$0x4] %vm723_vm9, %v717_v5 }
0x1603   :  { %880 = vst.msk [vmem:[#allocation2 + $0x8] sm:$0x8] %vm878_vm10, %v875_v6 }
0x1604   :  { %883 = vst.msk [vmem:[#allocation2 + $0x9] sm:$0x8] %vm881_vm11, %v875_v6  ;;  %v1025_v43 = vpop.permute.xlu1 %1024  ;;  %vm2006_vm11 = vcmp.gt.f32.partialorder %v4775_v1, 0.0 }
0x1605   :  { %v1177_v39 = vpop.permute.xlu0 %1176  ;;  %1031 = vst.msk [vmem:[#allocation2] sm:$0x10] %vm1030_vm12, %v1025_v43 }
0x1606   :  { %1034 = vst.msk [vmem:[#allocation2 - $0x1] sm:$0x10] %vm1033_vm13, %v1025_v43 }
0x1607   :  { %1183 = vst.msk [vmem:[#allocation2] sm:$0x20] %vm1182_vm14, %v1177_v39 }
0x1608   :  { %1186 = vst.msk [vmem:[#allocation2 - $0x3] sm:$0x20] %vm1185_vm15, %v1177_v39  ;;  %v1329_v7 = vpop.permute.xlu1 %1328 }
0x1609   :  { %v1179_v8 = vpop.permute.xlu0 %1178  ;;  %1335 = vst.msk [vmem:[#allocation2] sm:$0x40] %vm1334_vm2, %v1329_v7 }
0x160a   :  { %1338 = vst.msk [vmem:[#allocation2 - $0x5] sm:$0x40] %vm1337_vm4, %v1329_v7 }
0x160b   :  { %1184 = vst.msk [vmem:[#allocation2 + $0x8] sm:$0x20] %vm1182_vm14, %v1179_v8 }
0x160c   :  { %1187 = vst.msk [vmem:[#allocation2 + $0x5] sm:$0x20] %vm1185_vm15, %v1179_v8  ;;  %v1027_v10 = vpop.permute.xlu1 %1026 }
0x160d   :  { %1032 = vst.msk [vmem:[#allocation2 + $0x8] sm:$0x10] %vm1030_vm12, %v1027_v10 }
0x160e   :  { %1035 = vst.msk [vmem:[#allocation2 + $0x7] sm:$0x10] %vm1033_vm13, %v1027_v10 }
0x1610   :  { %v1331_v11 = vpop.permute.xlu1 %1330 }
0x1611   :  { %1336 = vst.msk [vmem:[#allocation2 + $0x8] sm:$0x40] %vm1334_vm2, %v1331_v11 }
0x1612   :  { %1339 = vst.msk [vmem:[#allocation2 + $0x3] sm:$0x40] %vm1337_vm4, %v1331_v11 }
0x1665   :  { %v1481_v15 = vpop.permute.xlu0 %1480 }
0x1666   :  { %1487 = vst.msk [vmem:[#allocation2] sm:$0x80] %vm1486_vm5, %v1481_v15 }
0x1667   :  { %1490 = vst.msk [vmem:[#allocation2 - $0x7] sm:$0x80] %vm1489_vm6, %v1481_v15 }
0x1669   :  { %v1483_v18 = vpop.permute.xlu0 %1482 }
0x166a   :  { %1488 = vst.msk [vmem:[#allocation2 + $0x8] sm:$0x80] %vm1486_vm5, %v1483_v18  ;;  %vm1694_vm5 = vcmp.gt.f32.partialorder %v1495_v50, 0.0 }
0x166b   :  { %1491 = vst.msk [vmem:[#allocation2 + $0x1] sm:$0x80] %vm1489_vm6, %v1483_v18 }
0x166d   :  { %v3604_v24 = vpop.f32.mrb[10].mxu0 }
0x166e   :  { %v4701_v19 = vld [vmem:[#allocation2] sm:$0xff]  ;;  %v1592_v25 = vadd.f32 %v3604_v24, %v3300_v23  ;;  %v1586_v42 = vpop.f32.mrb[11].mxu0 }
0x166f   :  { %3632 = vmatprep.mubr.msk.f32.mxu0 %vm106_vm0, %v4701_v19  ;;  %v1587_v38 = vadd.f32 %v3300_v23, %v1586_v42 }
0x1670   :  { %v1596_v58 = vmax.f32 %v1592_v25, 0.0 }
0x1671   :  { %v1595_v29 = vmax.f32 %v1587_v38, 0.0 }
0x1672   :  { %v4705_v22 = vld [vmem:[#allocation2 + $0x8] sm:$0xff] }
0x1673   :  { %3633 = vmatmul.mubr.msk.f32.vlgmr.msra.gmra.mrb[12].mxu0 %vm106_vm0, %v4705_v22  ;;  %3621 = vmatprep.mubr.msk.f32.mxu1 %vm1513_vm3, %v1595_v29 }
0x1674   :  { %3661 = vmatprep.mubr.msk.f32.mxu0 %vm4212_vm1, %v4213_v21  ;;  %3622 = vmatmul.mubr.msk.f32.vlgmr.msra.gmra.mrb[10].mxu1 %vm1513_vm3, %v1596_v58 }
0x1675   :  { %3868 = vmatpush3.bf16.msra.mxu1 %v3865_v4 }
0x1676   :  { %3870 = vmatprep.subr.bf16.mxu1 %v3869_v45 }
0x1679   :  { %3872 = vmatpush3.bf16.msra.mxu1 %v3869_v45 }
0x167a   :  { %3874 = vmatprep.subr.bf16.mxu1 %v3873_v59 }
0x167d   :  { %3876 = vmatpush3.bf16.msra.mxu1 %v3873_v59 }
0x167e   :  { %3878 = vmatprep.subr.bf16.mxu1 %v3877_v28 }
0x1681   :  { %3880 = vmatpush3.bf16.msra.mxu1 %v3877_v28 }
0x1682   :  { %3654 = vmatprep.subr.mxu1 %v4213_v21 }
0x1746   :  { %v4732_v62 = vpop.f32.mrb[12].mxu0 }
0x1747   :  { %v4734_v31 = vpop.f32.mrb[13].mxu0  ;;  %3660 = vmatpush3.msra.mxu0 %v4732_v62  ;;  %v4746_v32 = vpop.f32.mrb[10].mxu1 }
0x1748   :  { %3651 = vmatprep.mubr.msk.f32.mxu1 %vm1513_vm3, %v4734_v31  ;;  %3664 = vmatprep.subr.mxu0 %v4213_v21  ;;  %v4748_v63 = vpop.f32.mrb[11].mxu1 }
0x1749   :  { %3652 = vmatmul.mubr.msk.f32.vlgmr.msra.gmra.mrb[12].mxu1 %vm1513_vm3, %v4732_v62 }
0x174a   :  { %3655 = vmatpush3.msra.mxu1 %v4734_v31  ;;  %3656 = vmatprep.mubr.msk.f32.mxu1 %vm4212_vm1, %v4213_v21 }
0x174b   :  { %3669 = vmatprep.subr.mxu1 %v4213_v21 }
0x181c   :  { %v3653_v14 = vpop.f32.mrb[12].mxu1 }
0x181d   :  { %1966 = vperm.xlu1 %3957, %v3653_v14   ;;  %v1943_v16 = vpop.f32.mrb[13].mxu1 }
0x181e   :  { %1963 = vperm.xlu0 %3960, %v1943_v16  }
0x1821   :  { %3958 = vset.pattern.permute.xlu1 %v4217_v17 }
0x1822   :  { %1959 = vperm.xlu1 %3958, %v3653_v14   ;;  %3962 = vset.pattern.permute.xlu0 %v4218_v20 }
0x1823   :  { %2202 = vperm.xlu0 %3962, %v1943_v16  }
0x1826   :  { %3959 = vset.pattern.permute.xlu1 %v4218_v20 }
0x1827   :  { %2205 = vperm.xlu1 %3959, %v3653_v14   ;;  %3964 = vset.pattern.permute.xlu0 %v4219_v33 }
0x1828   :  { %2198 = vperm.xlu0 %3964, %v3653_v14  }
0x182b   :  { %3961 = vset.pattern.permute.xlu1 %v4217_v17 }
0x182c   :  { %1954 = vperm.xlu1 %3961, %v1943_v16   ;;  %3965 = vset.pattern.permute.xlu0 %v4217_v17 }
0x1830   :  { %3963 = vset.pattern.permute.xlu1 %v4219_v33 }
0x1831   :  { %2194 = vperm.xlu1 %3963, %v1943_v16  }
0x189c   :  { %v1967_v37 = vpop.permute.xlu1 %1966 }
0x189d   :  { %v1964_v47 = vpop.permute.xlu0 %1963  ;;  %v1977_v48 = vrot.slane %v1967_v37, %v4758_v44 }
0x189e   :  { %v1973_v61 = vrot.slane %v1964_v47, %v4758_v44 }
0x18a1   :  { %v1960_v49 = vpop.permute.xlu1 %1959 }
0x18a2   :  { %v1999_v51 = vadd.f32 %v1977_v48, %v1960_v49  ;;  %v2203_v52 = vpop.permute.xlu0 %2202 }
0x18a3   :  { %v2210_v5 = vrot.slane %v2203_v52, %v4758_v44 }
0x18a4   :  { %v2003_v53 = vmul.f32 0.2, %v1999_v51  ;;  %vm2001_vm3 = vcmp.gt.f32.partialorder %v1999_v51, 0.0 }
0x18a6   :  { %v2206_v54 = vpop.permute.xlu1 %2205  ;;  %v2005_v55 = vsel %vm2001_vm3, %v1999_v51, %v2003_v53  ;;  %vm1707_vm3 = vcmask 31744  }
0x18a7   :  { %v2214_v56 = vrot.slane %v2206_v54, %v4758_v44  ;;  %v2199_v40 = vpop.permute.xlu0 %2198  ;;  %v2009_v36 = vsel %vm2007_vm7, %v2005_v55, -1e+30 }
0x18a8   :  { %v2014_v57 = vsel %vm2010_vm8, %v2009_v36, -inf }
0x18a9   :  { %v2230_v60 = vadd.f32 %v2214_v56, %v2199_v40  ;;  %2015 = vmax.xlane.f32.xlu1 %v2014_v57 }
0x18ab   :  { %v1955_v0 = vpop.permute.xlu1 %1954  ;;  %v2234_v2 = vmul.f32 0.2, %v2230_v60  ;;  %vm2232_vm9 = vcmp.gt.f32.partialorder %v2230_v60, 0.0 }
0x18ac   :  { %v1998_v3 = vadd.f32 %v1973_v61, %v1955_v0  ;;  %v2430_v61 = vld [vmem:[%s4961_s11 + $0x8] sm:$0xff] }
0x18ad   :  { %v2236_v39 = vsel %vm2232_vm9, %v2230_v60, %v2234_v2  ;;  %v2429_v60 = vld [vmem:[%s4961_s11] sm:$0xff]  ;;  %v2431_v2 = vld [vmem:[%s4961_s11 + $0x10] sm:$0xff] }
0x18ae   :  { %v2002_v4 = vmul.f32 0.2, %v1998_v3  ;;  %vm2000_vm10 = vcmp.gt.f32.partialorder %v1998_v3, 0.0  ;;  %v2238_v15 = vsel %vm2007_vm7, %v2236_v39, -1e+30  ;;  %v3881_v0 = vpack.c.bf16 %v2430_v61, %v2429_v60 }
0x18af   :  { %v2242_v23 = vsel %vm2010_vm8, %v2238_v15, -inf }
0x18b0   :  { %v2195_v6 = vpop.permute.xlu1 %2194  ;;  %v2004_v43 = vsel %vm2000_vm10, %v1998_v3, %v2002_v4  ;;  %v2432_v3 = vld [vmem:[%s4961_s11 + $0x18] sm:$0xff]  ;;  %vm3263_vm10 = vcmask 23552  }
0x18b1   :  { %v2229_v7 = vadd.f32 %v2210_v5, %v2195_v6  ;;  %v2008_v8 = vsel %vm2006_vm11, %v2004_v43, -1e+30  ;;  %v3885_v4 = vpack.c.bf16 %v2432_v3, %v2431_v2  ;;  %v2514_v5 = vld [vmem:[%s4962_s12] sm:$0xff]  ;;  %v2515_v6 = vld [vmem:[%s4962_s12 + $0x8] sm:$0xff]  ;;  %v2516_v43 = vld [vmem:[%s4962_s12 + $0x10] sm:$0xff] }
0x18b2   :  { %v2011_v10 = vsel %vm2010_vm8, %v2008_v8, -inf  ;;  %v3889_v39 = vpack.c.bf16 %v2515_v6, %v2514_v5 }
0x18b3   :  { %v2233_v11 = vmul.f32 0.2, %v2229_v7  ;;  %2012 = vmax.xlane.f32.xlu0 %v2011_v10  ;;  %vm2231_vm12 = vcmp.gt.f32.partialorder %v2229_v7, 0.0 }
0x18b5   :  { %v2235_v18 = vsel %vm2231_vm12, %v2229_v7, %v2233_v11  ;;  %v2517_v7 = vld [vmem:[%s4962_s12 + $0x18] sm:$0xff] }
0x18b6   :  { %v2237_v24 = vsel %vm2006_vm11, %v2235_v18, -1e+30 }
0x18b7   :  { %2243 = vmax.xlane.f32.xlu0 %v2242_v23  ;;  %v2239_v25 = vsel %vm2010_vm8, %v2237_v24, -inf }
0x18b8   :  { %2240 = vmax.xlane.f32.xlu1 %v2239_v25 }
0x1936   :  { %v2016_v42 = vpop.xlane.xlu1 %2015 }
0x1937   :  { %v2018_v38 = vsub.f32 %v2009_v36, %v2016_v42 }
0x1939   :  { %v2021_v26 = vmul.f32 1.442695, %v2018_v38 }
0x193b   :  { %4096 = vpow2.f32 %v2021_v26 }
0x1940   :  { %v2013_v12 = vpop.xlane.xlu0 %2012 }
0x1941   :  { %v2017_v58 = vsub.f32 %v2008_v8, %v2013_v12  ;;  %v3893_v8 = vpack.c.bf16 %v2517_v7, %v2516_v43 }
0x1943   :  { %v2019_v46 = vmul.f32 1.442695, %v2017_v58 }
0x1944   :  { %v2244_v29 = vpop.xlane.xlu0 %2243 }
0x1945   :  { %v4097_v45 = vpop.eup %4096  ;;  %v2246_v27 = vsub.f32 %v2238_v15, %v2244_v29  ;;  %v2241_v9 = vpop.xlane.xlu1 %2240 }
0x1946   :  { %v2245_v59 = vsub.f32 %v2237_v24, %v2241_v9  ;;  %v2026_v30 = vsel %vm2010_vm8, %v4097_v45, 0.0 }
0x1947   :  { %v2249_v28 = vmul.f32 1.442695, %v2246_v27  ;;  %2027 = vadd.xlane.f32.xlu1 %v2026_v30 }
0x1948   :  { %v2247_v13 = vmul.f32 1.442695, %v2245_v59 }
0x1949   :  { %4098 = vpow2.f32 %v2249_v28 }
0x194a   :  { %4100 = vpow2.f32 %v2247_v13 }
0x194b   :  { %4102 = vpow2.f32 %v2019_v46 }
0x1953   :  { %v4099_v14 = vpop.eup %4098 }
0x1954   :  { %v4101_v16 = vpop.eup %4100  ;;  %v2254_v20 = vsel %vm2010_vm8, %v4099_v14, 0.0 }
0x1955   :  { %v4103_v34 = vpop.eup %4102  ;;  %2255 = vadd.xlane.f32.xlu0 %v2254_v20  ;;  %v2251_v35 = vsel %vm2010_vm8, %v4101_v16, 0.0 }
0x1956   :  { %2252 = vadd.xlane.f32.xlu1 %v2251_v35  ;;  %v2023_v37 = vsel %vm2010_vm8, %v4103_v34, 0.0 }
0x1959   :  { %2024 = vadd.xlane.f32.xlu0 %v2023_v37 }
0x1967   :  { %2261 = vrot.lane.b32.xlu1 %v4734_v31, %s4220_s3 }
0x196f   :  { %2337 = vrot.lane.b32.xlu0 %v4732_v62, %s4220_s3 }
0x19d4   :  { %v2028_v47 = vpop.xlane.xlu1 %2027 }
0x19d5   :  { %4104 = vrcp.f32 %v2028_v47 }
0x19df   :  { %v4105_v48 = vpop.eup %4104 }
0x19e0   :  { %v2032_v49 = vmul.f32 %v4105_v48, %v4097_v45 }
0x19e2   :  { %3662 = vmatmul.mubr.msk.f32.vlgmr.msra.gmra.mrb[14].mxu0 %vm2010_vm8, %v2032_v49  ;;  %v2256_v51 = vpop.xlane.xlu0 %2255 }
0x19e3   :  { %v2253_v52 = vpop.xlane.xlu1 %2252  ;;  %3666 = vmatprep.mubr.msk.f32.mxu0 %vm4212_vm1, %v4213_v21 }
0x19e4   :  { %4106 = vrcp.f32 %v2253_v52 }
0x19e6   :  { %v2025_v53 = vpop.xlane.xlu0 %2024 }
0x19e7   :  { %4108 = vrcp.f32 %v2025_v53  ;;  %v2262_v54 = vpop.permute.xlu1 %2261 }
0x19e8   :  { %3665 = vmatpush3.msra.mxu0 %v2262_v54  ;;  %4110 = vrcp.f32 %v2256_v51 }
0x19e9   :  { %3882 = vmatprep.subr.bf16.mxu0 %v3881_v0 }
0x19ea   :  { %v2338_v36 = vpop.permute.xlu0 %2337 }
0x19ee   :  { %v4107_v31 = vpop.eup %4106 }
0x19ef   :  { %v2258_v55 = vmul.f32 %v4107_v31, %v4101_v16 }
0x19f1   :  { %v4109_v62 = vpop.eup %4108  ;;  %3667 = vmatmul.mubr.msk.f32.vlgmr.msra.gmra.mrb[16].mxu0 %vm2010_vm8, %v2258_v55 }
0x19f2   :  { %v2030_v56 = vmul.f32 %v4109_v62, %v4103_v34  ;;  %v4111_v40 = vpop.eup %4110  ;;  %3884 = vmatpush3.bf16.msra.mxu0 %v3881_v0 }
0x19f3   :  { %v2260_v57 = vmul.f32 %v4111_v40, %v4099_v14  ;;  %3886 = vmatprep.subr.bf16.mxu0 %v3885_v4 }
0x19f4   :  { %3657 = vmatmul.mubr.msk.f32.vlgmr.msra.gmra.mrb[14].mxu1 %vm2010_vm8, %v2030_v56 }
0x19f5   :  { %3670 = vmatpush3.msra.mxu1 %v2338_v36  ;;  %3671 = vmatprep.mubr.msk.f32.mxu1 %vm4212_vm1, %v4213_v21 }
0x19f6   :  { %3888 = vmatpush3.bf16.msra.mxu0 %v3885_v4  ;;  %3890 = vmatprep.subr.bf16.mxu1 %v3889_v39 }
0x19f7   :  { %3696 = vmatprep.subr.mxu0 %v4213_v21 }
0x19f8   :  { %3672 = vmatmul.mubr.msk.f32.vlgmr.msra.gmra.mrb[16].mxu1 %vm2010_vm8, %v2260_v57 }
0x19f9   :  { %3892 = vmatpush3.bf16.msra.mxu1 %v3889_v39 }
0x19fa   :  { %3894 = vmatprep.subr.bf16.mxu1 %v3893_v8 }
0x19fd   :  { %3896 = vmatpush3.bf16.msra.mxu1 %v3893_v8 }
0x19fe   :  { %3701 = vmatprep.subr.mxu1 %v4213_v21 }
0x1ab5   :  { %v2175_v10 = vpop.f32.mrb[14].mxu0 }
0x1ab6   :  { %v3663_v11 = vpop.f32.mrb[15].mxu0  ;;  %v2182_v15 = vmin.f32 %v2175_v10, 0.0  ;;  %vm2180_vm15 = vcmp.gt.f32.partialorder %v2175_v10, 0.0 }
0x1ab8   :  { %v2185_v25 = vmul.f32 1.442695, %v2182_v15 }
0x1ac4   :  { %v2333_v18 = vpop.f32.mrb[16].mxu0 }
0x1ac5   :  { %v2415_v23 = vmin.f32 %v2333_v18, 0.0  ;;  %v3668_v24 = vpop.f32.mrb[17].mxu0  ;;  %vm2413_vm13 = vcmp.gt.f32.partialorder %v2333_v18, 0.0 }
0x1ac7   :  { %v2417_v42 = vmul.f32 1.442695, %v2415_v23  ;;  %v2102_v38 = vpop.f32.mrb[14].mxu1 }
0x1ac8   :  { %v2181_v26 = vmin.f32 %v2102_v38, 0.0  ;;  %v3658_v12 = vpop.f32.mrb[15].mxu1  ;;  %vm2179_vm14 = vcmp.gt.f32.partialorder %v2102_v38, 0.0 }
0x1ac9   :  { %4112 = vpow2.f32 %v2417_v42  ;;  %v1696_v42 = vsel %vm1694_vm5, 1, %v4217_v17 }
0x1aca   :  { %v2183_v58 = vmul.f32 1.442695, %v2181_v26  ;;  %4114 = vpow2.f32 %v2185_v25  ;;  %v1494_v25 = vld [vmem:[%s4952_s2] sm:$0xff]  ;;  %s4221_s2 = smov 126  }
0x1acb   :  { %v2409_v29 = vpop.f32.mrb[16].mxu1  ;;  %vm1693_vm6 = vcmp.gt.f32.partialorder %v1494_v25, 0.0 }
0x1acc   :  { %4116 = vpow2.f32 %v2183_v58  ;;  %v2416_v45 = vmin.f32 %v2409_v29, 0.0  ;;  %v3673_v27 = vpop.f32.mrb[17].mxu1  ;;  %vm2414_vm2 = vcmp.gt.f32.partialorder %v2409_v29, 0.0  ;;  %v3303_v58 = vld [vmem:[#allocation7] ss:$0 sm:$0xff] }
0x1acd   :  { %v1685_v27 = vadd.f32 %v3303_v58, %v4748_v63 }
0x1ace   :  { %v2419_v9 = vmul.f32 1.442695, %v2416_v45 }
0x1ad0   :  { %4118 = vpow2.f32 %v2419_v9 }
0x1ad3   :  { %v4113_v59 = vpop.eup %4112 }
0x1ad4   :  { %v4115_v30 = vpop.eup %4114  ;;  %v3316_v46 = vadd.f32 -1.0, %v4113_v59 }
0x1ad5   :  { %v3313_v14 = vadd.f32 -1.0, %v4115_v30 }
0x1ad6   :  { %v4117_v28 = vpop.eup %4116  ;;  %v2423_v16 = vsel %vm2413_vm13, %v2333_v18, %v3316_v46 }
0x1ad7   :  { %v3312_v13 = vadd.f32 -1.0, %v4117_v28  ;;  %v2190_v48 = vsel %vm2180_vm15, %v2175_v10, %v3313_v14 }
0x1ad9   :  { %v2189_v20 = vsel %vm2179_vm14, %v2102_v38, %v3312_v13  ;;  %v1695_v38 = vsel %vm1693_vm6, 1, %v4217_v17 }
0x1ada   :  { %v4119_v34 = vpop.eup %4118  ;;  %v2425_v35 = vadd.f32 %v2423_v16, %v2189_v20 }
0x1adb   :  { %v3317_v37 = vadd.f32 -1.0, %v4119_v34 }
0x1adc   :  { %v2427_v47 = vmul.f32 0.5, %v2425_v35 }
0x1add   :  { %v2424_v49 = vsel %vm2414_vm2, %v2409_v29, %v3317_v37  ;;  %v1690_v29 = vadd.f32 %v4746_v32, %v3303_v58  ;;  %v2817_v58 = vld [vmem:[%s4963_s13] sm:$0xff] }
0x1ade   :  { %v2426_v51 = vadd.f32 %v2424_v49, %v2190_v48  ;;  %3682 = vmatprep.mubr.msk.f32.mxu0 %vm106_vm0, %v2427_v47 }
0x1ae0   :  { %v2428_v52 = vmul.f32 0.5, %v2426_v51 }
0x1ae2   :  { %3683 = vmatmul.mubr.msk.f32.vlgmr.msra.gmra.mrb[18].mxu0 %vm106_vm0, %v2428_v52 }
0x1ae3   :  { %3698 = vmatprep.mubr.msk.f32.mxu0 %vm4212_vm1, %v4213_v21 }
0x1bb5   :  { %v3684_v53 = vpop.f32.mrb[18].mxu0 }
0x1bb6   :  { %v2505_v54 = vpop.f32.mrb[19].mxu0 }
0x1bb7   :  { %3693 = vmatprep.mubr.msk.f32.mxu1 %vm106_vm0, %v2505_v54  ;;  %3697 = vmatpush3.msra.mxu0 %v2505_v54 }
0x1bb8   :  { %3694 = vmatmul.mubr.msk.f32.vlgmr.msra.gmra.mrb[18].mxu1 %vm106_vm0, %v3684_v53 }
0x1bb9   :  { %3702 = vmatpush3.msra.mxu1 %v3684_v53  ;;  %3703 = vmatprep.mubr.msk.f32.mxu1 %vm4212_vm1, %v4213_v21 }
0x1c8b   :  { %v3695_v31 = vpop.f32.mrb[18].mxu1 }
0x1c8c   :  { %2613 = vperm.xlu1 %3963, %v3695_v31   ;;  %v2590_v55 = vpop.f32.mrb[19].mxu1 }
0x1c8d   :  { %2601 = vperm.xlu0 %3965, %v2590_v55  }
0x1c90   :  { %2610 = vperm.xlu1 %3963, %v2590_v55  }
0x1c94   :  { %3966 = vset.pattern.permute.xlu1 %v4217_v17 }
0x1c95   :  { %2606 = vperm.xlu1 %3966, %v3695_v31  }
0x1d0b   :  { %v2614_v62 = vpop.permute.xlu1 %2613 }
0x1d0c   :  { %v2602_v36 = vpop.permute.xlu0 %2601  ;;  %v2622_v60 = vrot.slane %v2614_v62, %v4758_v44 }
0x1d0f   :  { %v2611_v56 = vpop.permute.xlu1 %2610 }
0x1d10   :  { %v2618_v40 = vrot.slane %v2611_v56, %v4758_v44 }
0x1d12   :  { %v2637_v57 = vadd.f32 %v2618_v40, %v2602_v36 }
0x1d14   :  { %v2607_v61 = vpop.permute.xlu1 %2606  ;;  %vm2639_vm4 = vcmp.gt.f32.partialorder %v2637_v57, 0.0  ;;  %v2641_v0 = vmul.f32 0.2, %v2637_v57 }
0x1d15   :  { %v2638_v21 = vadd.f32 %v2622_v60, %v2607_v61 }
0x1d16   :  { %v2643_v2 = vsel %vm2639_vm4, %v2637_v57, %v2641_v0 }
0x1d17   :  { %v2642_v3 = vmul.f32 0.2, %v2638_v21  ;;  %v2645_v4 = vsel %vm2006_vm11, %v2643_v2, -1e+30  ;;  %vm2640_vm1 = vcmp.gt.f32.partialorder %v2638_v21, 0.0 }
0x1d18   :  { %v2647_v5 = vsel %vm2010_vm8, %v2645_v4, -inf }
0x1d19   :  { %2648 = vmax.xlane.f32.xlu1 %v2647_v5  ;;  %v2644_v6 = vsel %vm2640_vm1, %v2638_v21, %v2642_v3 }
0x1d1a   :  { %v2646_v43 = vsel %vm2007_vm7, %v2644_v6, -1e+30 }
0x1d1b   :  { %v2650_v39 = vsel %vm2010_vm8, %v2646_v43, -inf }
0x1d1c   :  { %2651 = vmax.xlane.f32.xlu0 %v2650_v39 }
0x1da6   :  { %v2649_v44 = vpop.xlane.xlu1 %2648 }
0x1da7   :  { %v2653_v7 = vsub.f32 %v2645_v4, %v2649_v44 }
0x1da9   :  { %v2655_v8 = vmul.f32 1.442695, %v2653_v7  ;;  %v2652_v10 = vpop.xlane.xlu0 %2651 }
0x1daa   :  { %v2654_v11 = vsub.f32 %v2646_v43, %v2652_v10 }
0x1dab   :  { %4120 = vpow2.f32 %v2655_v8 }
0x1dac   :  { %v2657_v15 = vmul.f32 1.442695, %v2654_v11  ;;  %v2821_v11 = vld [vmem:[%s4963_s13 + $0x20] sm:$0xff] }
0x1dae   :  { %4122 = vpow2.f32 %v2657_v15  ;;  %v2822_v15 = vld [vmem:[%s4963_s13 + $0x28] sm:$0xff] }
0x1db5   :  { %v4121_v1 = vpop.eup %4120 }
0x1db6   :  { %v2659_v18 = vsel %vm2010_vm8, %v4121_v1, 0.0 }
0x1db7   :  { %2660 = vadd.xlane.f32.xlu0 %v2659_v18 }
0x1db8   :  { %v4123_v23 = vpop.eup %4122 }
0x1db9   :  { %v2662_v24 = vsel %vm2010_vm8, %v4123_v23, 0.0 }
0x1dba   :  { %2663 = vadd.xlane.f32.xlu1 %v2662_v24 }
0x1dcb   :  { %1701 = vperm.xlu1 %3966, %v1696_v42  }
0x1dcd   :  { %1698 = vperm.xlu0 %3965, %v1695_v38   ;;  %v2823_v38 = vld [vmem:[%s4963_s13 + $0x30] sm:$0xff] }
0x1dd1   :  { %3967 = vset.pattern.permute.xlu0 %v4219_v33 }
0x1e44   :  { %v2661_v26 = vpop.xlane.xlu0 %2660 }
0x1e45   :  { %4124 = vrcp.f32 %v2661_v26  ;;  %v2824_v26 = vld [vmem:[%s4963_s13 + $0x38] sm:$0xff] }
0x1e47   :  { %v2664_v12 = vpop.xlane.xlu1 %2663 }
0x1e48   :  { %4126 = vrcp.f32 %v2664_v12  ;;  %v3901_v12 = vpack.c.bf16 %v2824_v26, %v2823_v38 }
0x1e4b   :  { %v1702_v45 = vpop.permute.xlu1 %1701 }
0x1e4c   :  { %vm1704_vm7 = vcmp.eq.s32.totalorder %v1702_v45, 1  ;;  %v1699_v9 = vpop.permute.xlu0 %1698 }
0x1e4d   :  { %v1706_v59 = vsel %vm1704_vm7, %v1690_v29, -1e+30  ;;  %vm1703_vm9 = vcmp.eq.s32.totalorder %v1699_v9, 1  ;;  %v2818_v29 = vld [vmem:[%s4963_s13 + $0x8] sm:$0xff] }
0x1e4e   :  { %v1715_v17 = vsel %vm1707_vm3, %v1706_v59, -inf  ;;  %v1705_v30 = vsel %vm1703_vm9, %v1685_v27, -1e+30  ;;  %v3905_v45 = vpack.c.bf16 %v2818_v29, %v2817_v58  ;;  %v2829_v27 = vld [vmem:[%s4963_s13 + $0x60] sm:$0xff]  ;;  %v2830_v9 = vld [vmem:[%s4963_s13 + $0x68] sm:$0xff] }
0x1e4f   :  { %v4125_v46 = vpop.eup %4124  ;;  %v1716_v33 = vrot.slane %v1715_v17, 4  ;;  %v1708_v28 = vsel %vm1707_vm3, %v1705_v30, -inf }
0x1e50   :  { %v2666_v13 = vmul.f32 %v4125_v46, %v4121_v1  ;;  %v1709_v14 = vrot.slane %v1708_v28, 4  ;;  %v3897_v1 = vpack.c.bf16 %v2822_v15, %v2821_v11  ;;  %v3093_v11 = vsub.s32 1, %v4755_v41 }
0x1e51   :  { %v1717_v16 = vmax.f32 %v1715_v17, %v1716_v33 }
0x1e52   :  { %v4127_v20 = vpop.eup %4126  ;;  %v1710_v32 = vmax.f32 %v1708_v28, %v1709_v14  ;;  %3699 = vmatmul.mubr.msk.f32.vlgmr.msra.gmra.mrb[20].mxu0 %vm2010_vm8, %v2666_v13  ;;  %3898 = vmatprep.subr.bf16.mxu0 %v3897_v1 }
0x1e53   :  { %v2668_v34 = vmul.f32 %v4127_v20, %v4123_v23  ;;  %v1718_v63 = vrot.slane %v1717_v16, 2  ;;  %3900 = vmatpush3.bf16.msra.mxu0 %v3897_v1  ;;  %v2819_v20 = vld [vmem:[%s4963_s13 + $0x10] sm:$0xff] }
0x1e54   :  { %v1711_v35 = vrot.slane %v1710_v32, 2  ;;  %3902 = vmatprep.subr.bf16.mxu0 %v3901_v12 }
0x1e55   :  { %v1719_v37 = vmax.f32 %v1717_v16, %v1718_v63  ;;  %3704 = vmatmul.mubr.msk.f32.vlgmr.msra.gmra.mrb[20].mxu1 %vm2010_vm8, %v2668_v34  ;;  %vm1746_vm8 = vcmask 15360  }
0x1e56   :  { %v1712_v47 = vmax.f32 %v1710_v32, %v1711_v35  ;;  %v2820_v32 = vld [vmem:[%s4963_s13 + $0x18] sm:$0xff] }
0x1e57   :  { %v1720_v48 = vrot.slane %v1719_v37, 1  ;;  %3904 = vmatpush3.bf16.msra.mxu0 %v3901_v12 }
0x1e58   :  { %v1713_v49 = vrot.slane %v1712_v47, 1  ;;  %3906 = vmatprep.subr.bf16.mxu0 %v3905_v45 }
0x1e59   :  { %v1721_v51 = vmax.f32 %v1719_v37, %v1720_v48 }
0x1e5a   :  { %v1714_v52 = vmax.f32 %v1712_v47, %v1713_v49  ;;  %v3909_v47 = vpack.c.bf16 %v2820_v32, %v2819_v20  ;;  %v2825_v49 = vld [vmem:[%s4963_s13 + $0x40] sm:$0xff] }
0x1e5b   :  { %v1723_v53 = vsub.f32 %v1706_v59, %v1721_v51  ;;  %v3921_v59 = vpack.c.bf16 %v2830_v9, %v2829_v27  ;;  %v2826_v51 = vld [vmem:[%s4963_s13 + $0x48] sm:$0xff] }
0x1e5c   :  { %v1722_v54 = vsub.f32 %v1705_v30, %v1714_v52 }
0x1e5d   :  { %v1726_v31 = vmul.f32 1.442695, %v1723_v53  ;;  %3922 = vmatprep.subr.bf16.mxu1 %v3921_v59 }
0x1e5e   :  { %v1724_v55 = vmul.f32 1.442695, %v1722_v54  ;;  %3924 = vmatpush3.bf16.msra.mxu1 %v3921_v59  ;;  %v3913_v54 = vpack.c.bf16 %v2826_v51, %v2825_v49 }
0x1e5f   :  { %4128 = vpow2.f32 %v1726_v31  ;;  %v2827_v31 = vld [vmem:[%s4963_s13 + $0x50] sm:$0xff] }
0x1e60   :  { %4130 = vpow2.f32 %v1724_v55  ;;  %v2828_v55 = vld [vmem:[%s4963_s13 + $0x58] sm:$0xff] }
0x1e69   :  { %v4129_v62 = vpop.eup %4128 }
0x1e6a   :  { %v4131_v56 = vpop.eup %4130  ;;  %v1735_v40 = vsel %vm1707_vm3, %v4129_v62, 0.0 }
0x1e6b   :  { %v1736_v36 = vrot.slane %v1735_v40, 4  ;;  %v1728_v57 = vsel %vm1707_vm3, %v4131_v56, 0.0 }
0x1e6c   :  { %v1729_v60 = vrot.slane %v1728_v57, 4 }
0x1e6d   :  { %v1737_v61 = vadd.f32 %v1736_v36, %v1735_v40  ;;  %v2831_v36 = vld [vmem:[%s4963_s13 + $0x70] sm:$0xff] }
0x1e6e   :  { %v1730_v0 = vadd.f32 %v1729_v60, %v1728_v57  ;;  %v2833_v60 = vld [vmem:[%s4963_s13 + $0x80] sm:$0xff] }
0x1e6f   :  { %v1738_v21 = vrot.slane %v1737_v61, 2 }
0x1e70   :  { %v1731_v2 = vrot.slane %v1730_v0, 2 }
0x1e71   :  { %v1739_v3 = vadd.f32 %v1738_v21, %v1737_v61  ;;  %v2834_v61 = vld [vmem:[%s4963_s13 + $0x88] sm:$0xff]  ;;  %v3085_v21 = vsub.s32 0, %v4755_v41 }
0x1e72   :  { %v1732_v4 = vadd.f32 %v1731_v2, %v1730_v0  ;;  %v3929_v0 = vpack.c.bf16 %v2834_v61, %v2833_v60  ;;  %v2837_v2 = vld [vmem:[%s4964_s14] sm:$0x7] }
0x1e73   :  { %v1740_v5 = vrot.slane %v1739_v3, 1  ;;  %v3094_v15 = vrot.slane %v2837_v2, %v3093_v11 }
0x1e74   :  { %v1733_v6 = vrot.slane %v1732_v4, 1 }
0x1e75   :  { %v1741_v43 = vadd.f32 %v1740_v5, %v1739_v3  ;;  %v3086_v3 = vrot.slane %v2837_v2, %v3085_v21 }
0x1e76   :  { %v1734_v39 = vadd.f32 %v1733_v6, %v1732_v4 }
0x1e77   :  { %4132 = vrcp.f32 %v1741_v43 }
0x1e78   :  { %4134 = vrcp.f32 %v1734_v39 }
0x1e81   :  { %v4133_v44 = vpop.eup %4132 }
0x1e82   :  { %v4135_v7 = vpop.eup %4134  ;;  %v1745_v8 = vmul.f32 %v4133_v44, %v4129_v62 }
0x1e83   :  { %v1743_v10 = vmul.f32 %v4135_v7, %v4131_v56  ;;  %v2835_v7 = vld [vmem:[%s4963_s13 + $0x90] sm:$0xff] }
0x1e84   :  { %1760 = vrot.lane.b32.xlu0 %v1745_v8, %s4221_s2  ;;  %v1750_v42 = vsel %vm1746_vm8, %v1745_v8, 0.0  ;;  %v2836_v8 = vld [vmem:[%s4963_s13 + $0x98] sm:$0xff] }
0x1e85   :  { %1758 = vrot.lane.b32.xlu1 %v1743_v10, %s4221_s2  ;;  %v1747_v25 = vsel %vm1746_vm8, %v1743_v10, 0.0  ;;  %v3933_v10 = vpack.c.bf16 %v2836_v8, %v2835_v7 }
0x1ef6   :  { %v1761_v18 = vpop.permute.xlu0 %1760 }
0x1ef7   :  { %v1767_v23 = vsel %vm1746_vm8, %v1761_v18, 0.0  ;;  %v1759_v24 = vpop.permute.xlu1 %1758 }
0x1ef8   :  { %v1764_v50 = vsel %vm1746_vm8, %v1759_v24, 0.0  ;;  %1768 = vadd.xlane.f32.xlu0 %v1767_v23 }
0x1ef9   :  { %1765 = vadd.xlane.f32.xlu1 %v1764_v50 }
0x1efc   :  { %1748 = vadd.xlane.f32.xlu0 %v1747_v25 }
0x1efd   :  { %1751 = vadd.xlane.f32.xlu1 %v1750_v42  ;;  %v3180_v42 = vsub.s32 2, %v4755_v41 }
0x1eff   :  { %v3181_v38 = vrot.slane %v2837_v2, %v3180_v42 }
0x1f25   :  { %v2738_v17 = vpop.f32.mrb[20].mxu0 }
0x1f26   :  { %v3700_v30 = vpop.f32.mrb[21].mxu0  ;;  %v2815_v56 = vmax.f32 %v2738_v17, 0.0 }
0x1f28   :  { %v2811_v46 = vpop.f32.mrb[20].mxu1 }
0x1f29   :  { %v3705_v33 = vpop.f32.mrb[21].mxu1  ;;  %v2816_v40 = vmax.f32 %v2811_v46, 0.0 }
0x1f85   :  { %v1769_v28 = vpop.xlane.xlu0 %1768 }
0x1f86   :  { %v1771_v13 = vmul.f32 0.5, %v1769_v28  ;;  %v1766_v14 = vpop.xlane.xlu1 %1765 }
0x1f87   :  { %v1770_v16 = vmul.f32 0.5, %v1766_v14 }
0x1f88   :  { %v1775_v35 = vmul.f32 %v1771_v13, %v4705_v22 }
0x1f89   :  { %v1774_v34 = vmul.f32 %v1770_v16, %v4701_v19  ;;  %v1749_v63 = vpop.xlane.xlu0 %1748 }
0x1f8a   :  { %v1754_v37 = vmul.f32 0.5, %v1749_v63  ;;  %v1752_v48 = vpop.xlane.xlu1 %1751 }
0x1f8b   :  { %3714 = vmatprep.mubr.msk.f32.mxu0 %vm106_vm0, %v1774_v34  ;;  %v1755_v53 = vmul.f32 0.5, %v1752_v48 }
0x1f8c   :  { %v1772_v52 = vmul.f32 %v1754_v37, %v4701_v19  ;;  %3715 = vmatmul.mubr.msk.f32.vlgmr.msra.gmra.mrb[22].mxu0 %vm106_vm0, %v1775_v35  ;;  %v3917_v19 = vpack.c.bf16 %v2828_v55, %v2827_v31 }
0x1f8d   :  { %3908 = vmatpush3.bf16.msra.mxu0 %v3905_v45  ;;  %v1773_v62 = vmul.f32 %v1755_v53, %v4705_v22  ;;  %v2832_v22 = vld [vmem:[%s4963_s13 + $0x78] sm:$0xff] }
0x1f8e   :  { %3725 = vmatprep.mubr.msk.f32.mxu0 %vm106_vm0, %v1772_v52  ;;  %3910 = vmatprep.subr.bf16.mxu0 %v3909_v47  ;;  %v3925_v57 = vpack.c.bf16 %v2832_v22, %v2831_v36 }
0x1f90   :  { %3926 = vmatprep.subr.bf16.mxu1 %v3925_v57 }
0x1f91   :  { %3912 = vmatpush3.bf16.msra.mxu0 %v3909_v47  ;;  %3928 = vmatpush3.bf16.msra.mxu1 %v3925_v57 }
0x1f92   :  { %3914 = vmatprep.subr.bf16.mxu0 %v3913_v54  ;;  %3930 = vmatprep.subr.bf16.mxu1 %v3929_v0 }
0x1f94   :  { %3726 = vmatmul.mubr.msk.f32.vlgmr.msra.gmra.mrb[22].mxu0 %vm106_vm0, %v1773_v62 }
0x1f95   :  { %3916 = vmatpush3.bf16.msra.mxu0 %v3913_v54  ;;  %3736 = vmatprep.mubr.msk.f32.mxu0 %vm106_vm0, %v2815_v56 }
0x1f96   :  { %3918 = vmatprep.subr.bf16.mxu0 %v3917_v19 }
0x1f99   :  { %3920 = vmatpush3.bf16.msra.mxu0 %v3917_v19 }
0x1f9c   :  { %3737 = vmatmul.mubr.msk.f32.vlgmr.msra.gmra.mrb[22].mxu0 %vm106_vm0, %v2816_v40 }
0x206f   :  { %v3738_v4 = vpop.f32.mrb[22].mxu0 }
0x2070   :  { %v3088_v5 = vadd.f32 %v3738_v4, %v3086_v3  ;;  %v3072_v6 = vpop.f32.mrb[23].mxu0 }
0x2071   :  { %v3087_v43 = vadd.f32 %v3086_v3, %v3072_v6 }
0x2072   :  { %v3090_v44 = vmax.f32 %v3088_v5, 0.0 }
0x2073   :  { %v3089_v39 = vmax.f32 %v3087_v43, 0.0 }
0x2075   :  { %3747 = vmatprep.mubr.msk.f32.mxu1 %vm106_vm0, %v3089_v39 }
0x2076   :  { %3748 = vmatmul.mubr.msk.f32.vlgmr.msra.gmra.mrb[22].mxu1 %vm106_vm0, %v3090_v44 }
0x2077   :  { %3932 = vmatpush3.bf16.msra.mxu1 %v3929_v0 }
0x2078   :  { %3934 = vmatprep.subr.bf16.mxu1 %v3933_v10 }
0x207b   :  { %3936 = vmatpush3.bf16.msra.mxu1 %v3933_v10 }
0x2149   :  { %v3749_v1 = vpop.f32.mrb[22].mxu1 }
0x214a   :  { %v3173_v18 = vadd.f32 %v3749_v1, %v3094_v15  ;;  %v3167_v23 = vpop.f32.mrb[23].mxu1 }
0x214b   :  { %v3168_v24 = vadd.f32 %v3167_v23, %v3094_v15 }
0x214c   :  { %v3177_v25 = vmax.f32 %v3173_v18, 0.0 }
0x214d   :  { %v3176_v50 = vmax.f32 %v3168_v24, 0.0 }
0x214f   :  { %3758 = vmatprep.mubr.msk.f32.mxu1 %vm106_vm0, %v3176_v50 }
0x2150   :  { %3759 = vmatmul.mubr.msk.f32.vlgmr.msra.gmra.mrb[24].mxu1 %vm106_vm0, %v3177_v25 }
0x2223   :  { %v3760_v26 = vpop.f32.mrb[24].mxu1 }
0x2224   :  { %v3260_v12 = vadd.f32 %v3760_v26, %v3181_v38  ;;  %v3254_v58 = vpop.f32.mrb[25].mxu1 }
0x2225   :  { %v3255_v29 = vadd.f32 %v3254_v58, %v3181_v38 }
0x2226   :  { %3265 = vst.msk [vmem:[%s4965_s15 + $0x8] sm:$0xff] %vm3263_vm10, %v3260_v12 }
0x2227   :  { %3264 = vst.msk [vmem:[%s4965_s15] sm:$0xff] %vm3263_vm10, %v3255_v29 }
0x2228   :  { %3270 = vsyncpa [#allocation4], 1 }
0x2229   :  { %3271 = vsyncpa [#allocation6], 1 }

</bundles_post_ra>
